<compile_context>
chip_gen: v6e
topology: v6e:2x2x1
jax: 0.10.0
libtpu: 0.0.40
codegen_flags: <defaults>
</compile_context>

<pallas_src>
import functools

import jax
import jax.numpy as jnp
from jax.experimental import pallas as pl
from jax.experimental.pallas import tpu as pltpu


def _rvq_kernel(x_ref, cb_ref, cn_ref, q_ref, idx_ref, *,
                num_codebooks, scores_dtype):
    """One tile of rows.

    x_ref  : (TN, D)   f32   input rows (blocked)
    cb_ref : (K, M, D) f32   stacked codebooks (whole array, VMEM resident)
    cn_ref : (K, M)    f32   precomputed 0.5 * ||codeword||^2
    q_ref  : (TN, D)   f32   quantized output (x - final residual)
    idx_ref: (K, TN)   i32   argmin index per codebook
    """
    x = x_ref[...]                                   # (TN, D)
    residual = x
    tn = x.shape[0]
    m = cb_ref.shape[1]
    cn_half = cn_ref[...]                            # (K, M)

    # Hoisted out of the K loop: JAX does not CSE broadcast_in_dim.
    col_iota = jax.lax.broadcasted_iota(jnp.int32, (tn, m), 1)

    for k in range(num_codebooks):                   # K small & static -> unrolled
        cb_k = cb_ref[k]                             # (M, D) f32
        # scores[n, j] = sum_d residual[n, d] * cb_k[j, d]   (MXU, f32 acc)
        scores = jax.lax.dot_general(
            residual.astype(scores_dtype), cb_k.astype(scores_dtype),
            dimension_numbers=(((1,), (1,)), ((), ())),
            preferred_element_type=jnp.float32)      # (TN, M)
        # argmin ||r - c||^2  ==  argmin (0.5*||c||^2 - r.c)   (||r||^2 const)
        dist = cn_half[k][None, :] - scores          # (TN, M)
        idx = jnp.argmin(dist, axis=-1).astype(jnp.int32)   # (TN,)
        idx_ref[k] = idx                             # incremental store
        # Gather codewords via one-hot matmul (MXU, f32) -> exact codewords.
        onehot = (col_iota == idx[:, None]).astype(jnp.float32)   # (TN, M)
        q_k = jnp.dot(onehot, cb_k, preferred_element_type=jnp.float32)
        residual = residual - q_k

    q_ref[...] = x - residual


def rvq_forward(x, codebooks, *, tile_n=512, scores_dtype=jnp.bfloat16):
    """x: (B, S, D) f32; codebooks: (K, M, D) f32 -> (quantized, [indices]*K)."""
    B, S, D = x.shape
    K, M, _ = codebooks.shape
    N = B * S

    # Row tile: multiple of 128 (lane-dense index stores / MXU row fill),
    # shrunk for small inputs so we don't pad a handful of rows up to 512.
    n_ceil = pl.cdiv(N, 128) * 128
    tile_n = max(128, min((tile_n // 128) * 128, n_ceil))
    n_pad = pl.cdiv(N, tile_n) * tile_n

    xf = x.reshape(N, D).astype(jnp.float32)
    if n_pad != N:                                   # pad only when needed
        xf = jnp.pad(xf, ((0, n_pad - N), (0, 0)))

    cb = codebooks.astype(jnp.float32)
    cn_half = 0.5 * jnp.sum(cb * cb, axis=-1)        # (K, M)

    # VMEM budget (keep below v7x's 64 MiB/TC): double-buffered x/q/idx tiles,
    # single-buffered codebooks + norms, a few (TN, M) f32 temporaries.
    vmem_bytes = (
        2 * tile_n * D * 4      # x tile (double-buffered)
        + 2 * tile_n * D * 4    # q tile
        + 2 * K * tile_n * 4    # idx tile
        + K * M * D * 4         # codebooks (single-buffered, unblocked)
        + K * M * 4             # 0.5 * codeword norms
        + 8 * tile_n * M * 4    # scores / dist / one-hot temporaries
        + (4 << 20))            # headroom
    vmem_limit = int(min(max(vmem_bytes, 32 << 20), 60 << 20))

    q, idx = pl.pallas_call(
        functools.partial(_rvq_kernel, num_codebooks=K,
                          scores_dtype=scores_dtype),
        out_shape=(jax.ShapeDtypeStruct((n_pad, D), jnp.float32),
                   jax.ShapeDtypeStruct((K, n_pad), jnp.int32)),
        grid_spec=pltpu.PrefetchScalarGridSpec(
            num_scalar_prefetch=0,
            grid=(n_pad // tile_n,),
            in_specs=[
                pl.BlockSpec((tile_n, D), lambda i: (i, 0)),        # row tile
                pl.BlockSpec(memory_space=pltpu.MemorySpace.VMEM),  # codebooks
                pl.BlockSpec(memory_space=pltpu.MemorySpace.VMEM),  # 0.5*||c||^2
            ],
            out_specs=(
                pl.BlockSpec((tile_n, D), lambda i: (i, 0)),
                pl.BlockSpec((K, tile_n), lambda i: (0, i)),
            ),
        ),
        compiler_params=pltpu.CompilerParams(
            dimension_semantics=("parallel",),       # row tiles shard across TCs
            vmem_limit_bytes=vmem_limit),
    )(xf, cb, cn_half)

    quantized = q[:N].reshape(B, S, D)
    indices = [idx[k, :N].reshape(B, S) for k in range(K)]
    return quantized, indices


def rvq_reference(x, codebooks):
    """Pure-JAX reference matching the PyTorch forward semantics (exact f32)."""
    residual = x
    indices = []
    for k in range(codebooks.shape[0]):
        cb = codebooks[k]
        dist = jnp.linalg.norm(residual[:, :, None, :] - cb[None, None, :, :],
                               axis=-1)
        idx = jnp.argmin(dist, axis=-1)
        indices.append(idx)
        residual = residual - cb[idx]
    return x - residual, indices


if __name__ == "__main__":
    # Small shapes consistent with the module's conventions.
    B, S, D = 2, 16, 64          # batch, sequence, embedding_dim
    K, M = 4, 256                # num_codebooks, codebook_size

    key = jax.random.PRNGKey(0)
    kx, kc = jax.random.split(key)
    x = jax.random.normal(kx, (B, S, D), dtype=jnp.float32)
    # Deterministic init mirroring nn.init.uniform_(-1/M, 1/M).
    codebooks = jax.random.uniform(kc, (K, M, D), dtype=jnp.float32,
                                   minval=-1.0 / M, maxval=1.0 / M)

    q_ref, idx_ref_list = rvq_reference(x, codebooks)

    # 1) Exact-precision run: must reproduce the reference bit-for-bit.
    q32, idx32 = rvq_forward(x, codebooks, scores_dtype=jnp.float32)
    q32 = jax.block_until_ready(q32)
    idx32 = [jax.block_until_ready(i) for i in idx32]
    assert q32.shape == (B, S, D)
    assert all(i.shape == (B, S) for i in idx32)
    assert jnp.allclose(q32, q_ref, atol=1e-5), "f32 quantized mismatch"
    assert all(bool(jnp.all(a == b)) for a, b in zip(idx32, idx_ref_list)), \
        "f32 index mismatch"

    # 2) Default fast path (bf16 scores matmul, f32 gather): indices can flip
    #    on near-ties, so validate with a match-rate threshold + loose atol.
    qbf, idxbf = rvq_forward(x, codebooks)
    qbf = jax.block_until_ready(qbf)
    idxbf = [jax.block_until_ready(i) for i in idxbf]
    assert jnp.allclose(qbf, q_ref, atol=5e-2), "bf16 quantized mismatch"
    matches = sum(int(jnp.sum(a == b)) for a, b in zip(idxbf, idx_ref_list))
    total = sum(int(a.size) for a in idxbf)
    assert matches / total >= 0.90, \
        f"bf16 index match rate too low: {matches / total:.3f}"

    print("KERNEL_OK")
</pallas_src>

<mosaic_0001>
module attributes {stable_mosaic.version = 11 : i64} {
  func.func @_rvq_kernel(%arg0: i32, %arg1: memref<128x64xf32, #tpu.memory_space<vmem>>, %arg2: memref<4x256x64xf32, #tpu.memory_space<vmem>>, %arg3: memref<4x256xf32, #tpu.memory_space<vmem>>, %arg4: memref<128x64xf32, #tpu.memory_space<vmem>>, %arg5: memref<4x128xi32, #tpu.memory_space<vmem>>) attributes {dimension_semantics = [#tpu.dimension_semantics<parallel>], iteration_bounds = array<i64: 1>, scalar_prefetch = 0 : i64, scratch_operands = 0 : i64, tpu.core_type = #tpu.core_type<tc>, window_params = [{transform_indices = @transform_0, window_bounds = array<i64: 128, 64>}, {pipeline_mode = #tpu.pipeline_mode<synchronous>, transform_indices = @transform_1, window_bounds = array<i64: 4, 256, 64>}, {pipeline_mode = #tpu.pipeline_mode<synchronous>, transform_indices = @transform_2, window_bounds = array<i64: 4, 256>}, {transform_indices = @transform_3, window_bounds = array<i64: 128, 64>}, {transform_indices = @transform_4, window_bounds = array<i64: 4, 128>}]} {
    %c0 = arith.constant 0 : index
    %c0_0 = arith.constant 0 : index
    %0 = vector.load %arg1[%c0, %c0_0] : memref<128x64xf32, #tpu.memory_space<vmem>>, vector<128x64xf32>
    %c0_1 = arith.constant 0 : index
    %c0_2 = arith.constant 0 : index
    %1 = vector.load %arg3[%c0_1, %c0_2] : memref<4x256xf32, #tpu.memory_space<vmem>>, vector<4x256xf32>
    %2 = tpu.iota {dimensions = array<i32: 1>} : vector<128x256xi32>
    %c0_3 = arith.constant 0 : index
    %c0_4 = arith.constant 0 : index
    %c0_5 = arith.constant 0 : index
    %3 = vector.load %arg2[%c0_3, %c0_4, %c0_5] : memref<4x256x64xf32, #tpu.memory_space<vmem>>, vector<1x256x64xf32>
    %4 = vector.shape_cast %3 : vector<1x256x64xf32> to vector<256x64xf32>
    %cst = arith.constant dense<0.000000e+00> : vector<128x256xf32>
    %5 = tpu.matmul %0, %4, %cst {dimension_numbers = #tpu.dot_dimension_numbers<[1], [1], [0], [0], [0, 0, 1, 0], [], []>} : vector<128x64xf32>, vector<256x64xf32>, vector<128x256xf32> -> vector<128x256xf32>
    %6 = vector.extract_strided_slice %1 {offsets = [0, 0], sizes = [1, 256], strides = [1, 1]} : vector<4x256xf32> to vector<1x256xf32>
    %7 = vector.shape_cast %6 : vector<1x256xf32> to vector<256xf32>
    %8 = vector.shape_cast %7 : vector<256xf32> to vector<1x256xf32>
    %9 = vector.broadcast %8 : vector<1x256xf32> to vector<128x256xf32>
    %10 = arith.subf %9, %5 : vector<128x256xf32>
    %11 = tpu.reduce_index %10 {axis = 1 : i32, kind = #tpu.reduction_kind<arg_min>} : vector<128x256xf32> -> vector<128xi32>
    %c0_6 = arith.constant 0 : index
    %c0_7 = arith.constant 0 : index
    %12 = vector.load %arg5[%c0_6, %c0_7] : memref<4x128xi32, #tpu.memory_space<vmem>>, vector<1x128xi32>
    %13 = vector.shape_cast %12 : vector<1x128xi32> to vector<128xi32>
    %14 = vector.shape_cast %11 : vector<128xi32> to vector<1x128xi32>
    tpu.vector_store %arg5[%c0_6, %c0_7], %14 {strides = array<i32>} : memref<4x128xi32, #tpu.memory_space<vmem>>, vector<1x128xi32>,
    %15 = vector.shape_cast %11 : vector<128xi32> to vector<128x1xi32>
    %16 = vector.broadcast %15 : vector<128x1xi32> to vector<128x256xi32>
    %17 = arith.cmpi eq, %2, %16 : vector<128x256xi32>
    %18 = arith.extui %17 : vector<128x256xi1> to vector<128x256xi32>
    %19 = arith.sitofp %18 : vector<128x256xi32> to vector<128x256xf32>
    %cst_8 = arith.constant dense<0.000000e+00> : vector<128x64xf32>
    %20 = tpu.matmul %19, %4, %cst_8 {dimension_numbers = #tpu.dot_dimension_numbers<[1], [0], [0], [1], [0, 0, 1, 1], [], []>} : vector<128x256xf32>, vector<256x64xf32>, vector<128x64xf32> -> vector<128x64xf32>
    %21 = arith.subf %0, %20 : vector<128x64xf32>
    %c1 = arith.constant 1 : index
    %c0_9 = arith.constant 0 : index
    %c0_10 = arith.constant 0 : index
    %22 = vector.load %arg2[%c1, %c0_9, %c0_10] : memref<4x256x64xf32, #tpu.memory_space<vmem>>, vector<1x256x64xf32>
    %23 = vector.shape_cast %22 : vector<1x256x64xf32> to vector<256x64xf32>
    %cst_11 = arith.constant dense<0.000000e+00> : vector<128x256xf32>
    %24 = tpu.matmul %21, %23, %cst_11 {dimension_numbers = #tpu.dot_dimension_numbers<[1], [1], [0], [0], [0, 0, 1, 0], [], []>} : vector<128x64xf32>, vector<256x64xf32>, vector<128x256xf32> -> vector<128x256xf32>
    %25 = vector.extract_strided_slice %1 {offsets = [1, 0], sizes = [1, 256], strides = [1, 1]} : vector<4x256xf32> to vector<1x256xf32>
    %26 = vector.shape_cast %25 : vector<1x256xf32> to vector<256xf32>
    %27 = vector.shape_cast %26 : vector<256xf32> to vector<1x256xf32>
    %28 = vector.broadcast %27 : vector<1x256xf32> to vector<128x256xf32>
    %29 = arith.subf %28, %24 : vector<128x256xf32>
    %30 = tpu.reduce_index %29 {axis = 1 : i32, kind = #tpu.reduction_kind<arg_min>} : vector<128x256xf32> -> vector<128xi32>
    %c1_12 = arith.constant 1 : index
    %c0_13 = arith.constant 0 : index
    %31 = vector.load %arg5[%c1_12, %c0_13] : memref<4x128xi32, #tpu.memory_space<vmem>>, vector<1x128xi32>
    %32 = vector.shape_cast %31 : vector<1x128xi32> to vector<128xi32>
    %33 = vector.shape_cast %30 : vector<128xi32> to vector<1x128xi32>
    tpu.vector_store %arg5[%c1_12, %c0_13], %33 {strides = array<i32>} : memref<4x128xi32, #tpu.memory_space<vmem>>, vector<1x128xi32>,
    %34 = vector.shape_cast %30 : vector<128xi32> to vector<128x1xi32>
    %35 = vector.broadcast %34 : vector<128x1xi32> to vector<128x256xi32>
    %36 = arith.cmpi eq, %2, %35 : vector<128x256xi32>
    %37 = arith.extui %36 : vector<128x256xi1> to vector<128x256xi32>
    %38 = arith.sitofp %37 : vector<128x256xi32> to vector<128x256xf32>
    %cst_14 = arith.constant dense<0.000000e+00> : vector<128x64xf32>
    %39 = tpu.matmul %38, %23, %cst_14 {dimension_numbers = #tpu.dot_dimension_numbers<[1], [0], [0], [1], [0, 0, 1, 1], [], []>} : vector<128x256xf32>, vector<256x64xf32>, vector<128x64xf32> -> vector<128x64xf32>
    %40 = arith.subf %21, %39 : vector<128x64xf32>
    %c2 = arith.constant 2 : index
    %c0_15 = arith.constant 0 : index
    %c0_16 = arith.constant 0 : index
    %41 = vector.load %arg2[%c2, %c0_15, %c0_16] : memref<4x256x64xf32, #tpu.memory_space<vmem>>, vector<1x256x64xf32>
    %42 = vector.shape_cast %41 : vector<1x256x64xf32> to vector<256x64xf32>
    %cst_17 = arith.constant dense<0.000000e+00> : vector<128x256xf32>
    %43 = tpu.matmul %40, %42, %cst_17 {dimension_numbers = #tpu.dot_dimension_numbers<[1], [1], [0], [0], [0, 0, 1, 0], [], []>} : vector<128x64xf32>, vector<256x64xf32>, vector<128x256xf32> -> vector<128x256xf32>
    %44 = vector.extract_strided_slice %1 {offsets = [2, 0], sizes = [1, 256], strides = [1, 1]} : vector<4x256xf32> to vector<1x256xf32>
    %45 = vector.shape_cast %44 : vector<1x256xf32> to vector<256xf32>
    %46 = vector.shape_cast %45 : vector<256xf32> to vector<1x256xf32>
    %47 = vector.broadcast %46 : vector<1x256xf32> to vector<128x256xf32>
    %48 = arith.subf %47, %43 : vector<128x256xf32>
    %49 = tpu.reduce_index %48 {axis = 1 : i32, kind = #tpu.reduction_kind<arg_min>} : vector<128x256xf32> -> vector<128xi32>
    %c2_18 = arith.constant 2 : index
    %c0_19 = arith.constant 0 : index
    %50 = vector.load %arg5[%c2_18, %c0_19] : memref<4x128xi32, #tpu.memory_space<vmem>>, vector<1x128xi32>
    %51 = vector.shape_cast %50 : vector<1x128xi32> to vector<128xi32>
    %52 = vector.shape_cast %49 : vector<128xi32> to vector<1x128xi32>
    tpu.vector_store %arg5[%c2_18, %c0_19], %52 {strides = array<i32>} : memref<4x128xi32, #tpu.memory_space<vmem>>, vector<1x128xi32>,
    %53 = vector.shape_cast %49 : vector<128xi32> to vector<128x1xi32>
    %54 = vector.broadcast %53 : vector<128x1xi32> to vector<128x256xi32>
    %55 = arith.cmpi eq, %2, %54 : vector<128x256xi32>
    %56 = arith.extui %55 : vector<128x256xi1> to vector<128x256xi32>
    %57 = arith.sitofp %56 : vector<128x256xi32> to vector<128x256xf32>
    %cst_20 = arith.constant dense<0.000000e+00> : vector<128x64xf32>
    %58 = tpu.matmul %57, %42, %cst_20 {dimension_numbers = #tpu.dot_dimension_numbers<[1], [0], [0], [1], [0, 0, 1, 1], [], []>} : vector<128x256xf32>, vector<256x64xf32>, vector<128x64xf32> -> vector<128x64xf32>
    %59 = arith.subf %40, %58 : vector<128x64xf32>
    %c3 = arith.constant 3 : index
    %c0_21 = arith.constant 0 : index
    %c0_22 = arith.constant 0 : index
    %60 = vector.load %arg2[%c3, %c0_21, %c0_22] : memref<4x256x64xf32, #tpu.memory_space<vmem>>, vector<1x256x64xf32>
    %61 = vector.shape_cast %60 : vector<1x256x64xf32> to vector<256x64xf32>
    %cst_23 = arith.constant dense<0.000000e+00> : vector<128x256xf32>
    %62 = tpu.matmul %59, %61, %cst_23 {dimension_numbers = #tpu.dot_dimension_numbers<[1], [1], [0], [0], [0, 0, 1, 0], [], []>} : vector<128x64xf32>, vector<256x64xf32>, vector<128x256xf32> -> vector<128x256xf32>
    %63 = vector.extract_strided_slice %1 {offsets = [3, 0], sizes = [1, 256], strides = [1, 1]} : vector<4x256xf32> to vector<1x256xf32>
    %64 = vector.shape_cast %63 : vector<1x256xf32> to vector<256xf32>
    %65 = vector.shape_cast %64 : vector<256xf32> to vector<1x256xf32>
    %66 = vector.broadcast %65 : vector<1x256xf32> to vector<128x256xf32>
    %67 = arith.subf %66, %62 : vector<128x256xf32>
    %68 = tpu.reduce_index %67 {axis = 1 : i32, kind = #tpu.reduction_kind<arg_min>} : vector<128x256xf32> -> vector<128xi32>
    %c3_24 = arith.constant 3 : index
    %c0_25 = arith.constant 0 : index
    %69 = vector.load %arg5[%c3_24, %c0_25] : memref<4x128xi32, #tpu.memory_space<vmem>>, vector<1x128xi32>
    %70 = vector.shape_cast %69 : vector<1x128xi32> to vector<128xi32>
    %71 = vector.shape_cast %68 : vector<128xi32> to vector<1x128xi32>
    tpu.vector_store %arg5[%c3_24, %c0_25], %71 {strides = array<i32>} : memref<4x128xi32, #tpu.memory_space<vmem>>, vector<1x128xi32>,
    %72 = vector.shape_cast %68 : vector<128xi32> to vector<128x1xi32>
    %73 = vector.broadcast %72 : vector<128x1xi32> to vector<128x256xi32>
    %74 = arith.cmpi eq, %2, %73 : vector<128x256xi32>
    %75 = arith.extui %74 : vector<128x256xi1> to vector<128x256xi32>
    %76 = arith.sitofp %75 : vector<128x256xi32> to vector<128x256xf32>
    %cst_26 = arith.constant dense<0.000000e+00> : vector<128x64xf32>
    %77 = tpu.matmul %76, %61, %cst_26 {dimension_numbers = #tpu.dot_dimension_numbers<[1], [0], [0], [1], [0, 0, 1, 1], [], []>} : vector<128x256xf32>, vector<256x64xf32>, vector<128x64xf32> -> vector<128x64xf32>
    %78 = arith.subf %59, %77 : vector<128x64xf32>
    %79 = arith.subf %0, %78 : vector<128x64xf32>
    %c0_27 = arith.constant 0 : index
    %c0_28 = arith.constant 0 : index
    %80 = vector.load %arg4[%c0_27, %c0_28] : memref<128x64xf32, #tpu.memory_space<vmem>>, vector<128x64xf32>
    tpu.vector_store %arg4[%c0_27, %c0_28], %79 {strides = array<i32>} : memref<128x64xf32, #tpu.memory_space<vmem>>, vector<128x64xf32>,
    return
  }
  func.func @transform_0(%arg0: i32) -> (i32, i32) {
    %c0_i32 = arith.constant 0 : i32
    %c0_i32_0 = arith.constant 0 : i32
    return %arg0, %c0_i32 : i32, i32
  }
  func.func @transform_1(%arg0: i32) -> (i32, i32, i32) {
    %c0_i32 = arith.constant 0 : i32
    %c0_i32_0 = arith.constant 0 : i32
    %c0_i32_1 = arith.constant 0 : i32
    %c0_i32_2 = arith.constant 0 : i32
    return %c0_i32, %c0_i32_0, %c0_i32_1 : i32, i32, i32
  }
  func.func @transform_2(%arg0: i32) -> (i32, i32) {
    %c0_i32 = arith.constant 0 : i32
    %c0_i32_0 = arith.constant 0 : i32
    %c0_i32_1 = arith.constant 0 : i32
    return %c0_i32, %c0_i32_0 : i32, i32
  }
  func.func @transform_3(%arg0: i32) -> (i32, i32) {
    %c0_i32 = arith.constant 0 : i32
    %c0_i32_0 = arith.constant 0 : i32
    return %arg0, %c0_i32 : i32, i32
  }
  func.func @transform_4(%arg0: i32) -> (i32, i32) {
    %c0_i32 = arith.constant 0 : i32
    %c0_i32_0 = arith.constant 0 : i32
    return %c0_i32, %arg0 : i32, i32
  }
}

</mosaic_0001>

<bundles_post_ra>
// kernel: tpu_custom_call.1
= control target key start
LH: loop header
LB: loop body
LE: loop exit
PB: predicated region body
PF: predicated region fallthrough
CT: control target
= control target key end

     0   :  { %vm69_vm0 = vcmask 523264   ;;  %s7745_s0 = inlined_call_operand.vmem [shape: f32[128,64], index: 0, kind: input, shape index: {}]   ;;  %s7746_s1 = inlined_call_operand.vmem [shape: f32[4,256,64], index: 1, kind: input, shape index: {}]   ;;  %s7747_s2 = inlined_call_operand.vmem [shape: f32[4,256], index: 2, kind: input, shape index: {}]   ;;  %s7748_s3 = inlined_call_operand.vmem [shape: f32[128,64], index: 3, kind: output, shape index: {0}]   ;;  %s7749_s4 = inlined_call_operand.hbm [shape: s32[4,128], index: 4, kind: output, shape index: {1}]  }
   0x1   :  { %v68_v0 = vld [vmem:[%s7746_s1 + $0xf8] sm:$0xff]  ;;  %v67_v2 = vld [vmem:[%s7746_s1 + $0xf0] sm:$0xff]  ;;  %v66_v4 = vld [vmem:[%s7746_s1 + $0xe8] sm:$0xff] }
   0x2   :  { %v52_v1 = vld [vmem:[%s7746_s1 + $0x78] sm:$0xff]  ;;  %4074 = vmatprep.subr.msk.mxu0 %vm69_vm0, %v68_v0  ;;  %4138 = vmatprep.subr.mxu1 %v68_v0  ;;  %v51_v3 = vld [vmem:[%s7746_s1 + $0x70] sm:$0xff]  ;;  %v50_v5 = vld [vmem:[%s7746_s1 + $0x68] sm:$0xff] }
   0x3   :  { %4075 = vmatpush3.xpose.msk.msra.mxu0 %vm69_vm0, %v52_v1  ;;  %4139 = vmatpush3.msra.mxu1 %v52_v1  ;;  %v65_v6 = vld [vmem:[%s7746_s1 + $0xe0] sm:$0xff]  ;;  %v64_v8 = vld [vmem:[%s7746_s1 + $0xd8] sm:$0xff]  ;;  %v63_v11 = vld [vmem:[%s7746_s1 + $0xd0] sm:$0xff] }
   0x4   :  { %4076 = vmatprep.subr.msk.mxu0 %vm69_vm0, %v67_v2  ;;  %4140 = vmatprep.subr.mxu1 %v67_v2  ;;  %v49_v7 = vld [vmem:[%s7746_s1 + $0x60] sm:$0xff]  ;;  %v48_v9 = vld [vmem:[%s7746_s1 + $0x58] sm:$0xff]  ;;  %v47_v12 = vld [vmem:[%s7746_s1 + $0x50] sm:$0xff] }
   0x5   :  { %4141 = vmatpush3.msra.mxu1 %v51_v3  ;;  %v4868_v10 = vld [vmem:[%s7745_s0] sm:$0xff]  ;;  %v62_v13 = vld [vmem:[%s7746_s1 + $0xc8] sm:$0xff] }
   0x6   :  { %4142 = vmatprep.subr.mxu1 %v66_v4  ;;  %4106 = vmatprep.mubr.msk.f32.mxu0 %vm69_vm0, %v4868_v10  ;;  %v46_v14 = vld [vmem:[%s7746_s1 + $0x48] sm:$0xff]  ;;  %v61_v15 = vld [vmem:[%s7746_s1 + $0xc0] sm:$0xff] }
   0x7   :  { %4077 = vmatpush3.xpose.msk.msra.mxu0 %vm69_vm0, %v51_v3  ;;  %4143 = vmatpush3.msra.mxu1 %v50_v5 }
   0x8   :  { %4078 = vmatprep.subr.msk.mxu0 %vm69_vm0, %v66_v4  ;;  %4144 = vmatprep.subr.mxu1 %v65_v6 }
   0x9   :  { %4145 = vmatpush3.msra.mxu1 %v49_v7 }
   0xa   :  { %4146 = vmatprep.subr.mxu1 %v64_v8 }
   0xb   :  { %4079 = vmatpush3.xpose.msk.msra.mxu0 %vm69_vm0, %v50_v5  ;;  %4147 = vmatpush3.msra.mxu1 %v48_v9 }
   0xc   :  { %4080 = vmatprep.subr.msk.mxu0 %vm69_vm0, %v65_v6  ;;  %4148 = vmatprep.subr.mxu1 %v63_v11 }
   0xd   :  { %4149 = vmatpush3.msra.mxu1 %v47_v12 }
   0xe   :  { %4150 = vmatprep.subr.mxu1 %v62_v13 }
   0xf   :  { %4081 = vmatpush3.xpose.msk.msra.mxu0 %vm69_vm0, %v49_v7  ;;  %4151 = vmatpush3.msra.mxu1 %v46_v14 }
  0x10   :  { %4082 = vmatprep.subr.msk.mxu0 %vm69_vm0, %v64_v8 }
  0x11   :  { %10 = vsyncpa [#allocation3], 0  ;;  %v45_v16 = vld [vmem:[%s7746_s1 + $0x40] sm:$0xff]  ;;  %4152 = vmatprep.subr.mxu1 %v61_v15  ;;  %v60_v17 = vld [vmem:[%s7746_s1 + $0xb8] sm:$0xff]  ;;  %v34_v48 = vlaneseq }
  0x12   :  { %4153 = vmatpush3.msra.mxu1 %v45_v16  ;;  %v44_v18 = vld [vmem:[%s7746_s1 + $0x38] sm:$0xff]  ;;  %v59_v19 = vld [vmem:[%s7746_s1 + $0xb0] sm:$0xff]  ;;  %v58_v21 = vld [vmem:[%s7746_s1 + $0xa8] sm:$0xff] }
  0x13   :  { %4083 = vmatpush3.xpose.msk.msra.mxu0 %vm69_vm0, %v48_v9  ;;  %4154 = vmatprep.subr.mxu1 %v60_v17  ;;  %v43_v20 = vld [vmem:[%s7746_s1 + $0x30] sm:$0xff]  ;;  %v42_v22 = vld [vmem:[%s7746_s1 + $0x28] sm:$0xff]  ;;  %v57_v23 = vld [vmem:[%s7746_s1 + $0xa0] sm:$0xff]  ;;  %v5050_v49 = vshrl.u32 %v34_v48, 7 }
  0x14   :  { %4084 = vmatprep.subr.msk.mxu0 %vm69_vm0, %v63_v11  ;;  %4155 = vmatpush3.msra.mxu1 %v44_v18  ;;  %v41_v24 = vld [vmem:[%s7746_s1 + $0x20] sm:$0xff]  ;;  %v56_v25 = vld [vmem:[%s7746_s1 + $0x98] sm:$0xff]  ;;  %v55_v27 = vld [vmem:[%s7746_s1 + $0x90] sm:$0xff] }
  0x15   :  { %4156 = vmatprep.subr.mxu1 %v59_v19  ;;  %v40_v26 = vld [vmem:[%s7746_s1 + $0x18] sm:$0xff]  ;;  %v39_v28 = vld [vmem:[%s7746_s1 + $0x10] sm:$0xff]  ;;  %v54_v29 = vld [vmem:[%s7746_s1 + $0x88] sm:$0xff]  ;;  %7793 = vst [vmem:[#allocation5_spill] sm:$0xff] %v5050_v49  ;;  %v378_v50 = vsub.s32 0, %v5050_v49  ;;  %v382_v51 = vsub.s32 4, %v5050_v49 }
  0x16   :  { %4157 = vmatpush3.msra.mxu1 %v43_v20  ;;  %v38_v30 = vld [vmem:[%s7746_s1 + $0x8] sm:$0xff]  ;;  %v53_v31 = vld [vmem:[%s7746_s1 + $0x80] sm:$0xff]  ;;  %v4976_v34 = vld [vmem:[%s7745_s0 + $0x10] sm:$0xff] }
  0x17   :  { %4085 = vmatpush3.xpose.msk.msra.mxu0 %vm69_vm0, %v47_v12  ;;  %4158 = vmatprep.subr.mxu1 %v58_v21  ;;  %v37_v32 = vld [vmem:[%s7746_s1] sm:$0xff]  ;;  %v4967_v33 = vld [vmem:[%s7745_s0 + $0x8] sm:$0xff]  ;;  %v20_v35 = vld [vmem:[%s7745_s0 + $0x18] sm:$0xff] }
  0x18   :  { %4086 = vmatprep.subr.msk.mxu0 %vm69_vm0, %v62_v13  ;;  %4159 = vmatpush3.msra.mxu1 %v42_v22  ;;  %v21_v36 = vld [vmem:[%s7745_s0 + $0x20] sm:$0xff]  ;;  %v22_v37 = vld [vmem:[%s7745_s0 + $0x28] sm:$0xff]  ;;  %v23_v38 = vld [vmem:[%s7745_s0 + $0x30] sm:$0xff] }
  0x19   :  { %4160 = vmatprep.subr.mxu1 %v57_v23  ;;  %v24_v39 = vld [vmem:[%s7745_s0 + $0x38] sm:$0xff]  ;;  %v25_v40 = vld [vmem:[%s7745_s0 + $0x40] sm:$0xff]  ;;  %v26_v41 = vld [vmem:[%s7745_s0 + $0x48] sm:$0xff] }
  0x1a   :  { %4161 = vmatpush3.msra.mxu1 %v41_v24  ;;  %v27_v42 = vld [vmem:[%s7745_s0 + $0x50] sm:$0xff]  ;;  %v28_v43 = vld [vmem:[%s7745_s0 + $0x58] sm:$0xff]  ;;  %v29_v44 = vld [vmem:[%s7745_s0 + $0x60] sm:$0xff] }
  0x1b   :  { %4087 = vmatpush3.xpose.msk.msra.mxu0 %vm69_vm0, %v46_v14  ;;  %4162 = vmatprep.subr.mxu1 %v56_v25  ;;  %v30_v45 = vld [vmem:[%s7745_s0 + $0x68] sm:$0xff]  ;;  %v31_v46 = vld [vmem:[%s7745_s0 + $0x70] sm:$0xff]  ;;  %v32_v47 = vld [vmem:[%s7745_s0 + $0x78] sm:$0xff] }
  0x1c   :  { %4088 = vmatprep.subr.msk.mxu0 %vm69_vm0, %v61_v15  ;;  %4163 = vmatpush3.msra.mxu1 %v40_v26  ;;  %v33_v52 = vld [vmem:[%s7747_s2] sm:$0xff] }
  0x1d   :  { %4164 = vmatprep.subr.mxu1 %v55_v27  ;;  %v379_v53 = vrot.slane %v33_v52, %v378_v50  ;;  %v383_v54 = vrot.slane %v33_v52, %v382_v51 }
  0x1e   :  { %4165 = vmatpush3.msra.mxu1 %v39_v28 }
  0x1f   :  { %4089 = vmatpush3.xpose.msk.msra.mxu0 %vm69_vm0, %v45_v16  ;;  %4166 = vmatprep.subr.mxu1 %v54_v29  ;;  %v5057_v55 = vrot.slane %v379_v53, %v378_v50  ;;  %v5059_v56 = vrot.slane %v383_v54, %v378_v50 }
  0x20   :  { %4090 = vmatprep.subr.msk.mxu0 %vm69_vm0, %v60_v17  ;;  %4167 = vmatpush3.msra.mxu1 %v38_v30 }
  0x21   :  { %4168 = vmatprep.subr.mxu1 %v53_v31 }
  0x22   :  { %4169 = vmatpush3.msra.mxu1 %v37_v32 }
  0x23   :  { %4091 = vmatpush3.xpose.msk.msra.mxu0 %vm69_vm0, %v44_v18 }
  0x24   :  { %4092 = vmatprep.subr.msk.mxu0 %vm69_vm0, %v59_v19 }
  0x27   :  { %4093 = vmatpush3.xpose.msk.msra.mxu0 %vm69_vm0, %v43_v20 }
  0x28   :  { %4094 = vmatprep.subr.msk.mxu0 %vm69_vm0, %v58_v21 }
  0x2b   :  { %4095 = vmatpush3.xpose.msk.msra.mxu0 %vm69_vm0, %v42_v22 }
  0x2c   :  { %4096 = vmatprep.subr.msk.mxu0 %vm69_vm0, %v57_v23 }
  0x2f   :  { %4097 = vmatpush3.xpose.msk.msra.mxu0 %vm69_vm0, %v41_v24 }
  0x30   :  { %4098 = vmatprep.subr.msk.mxu0 %vm69_vm0, %v56_v25 }
  0x33   :  { %4099 = vmatpush3.xpose.msk.msra.mxu0 %vm69_vm0, %v40_v26 }
  0x34   :  { %4100 = vmatprep.subr.msk.mxu0 %vm69_vm0, %v55_v27 }
  0x37   :  { %4101 = vmatpush3.xpose.msk.msra.mxu0 %vm69_vm0, %v39_v28 }
  0x38   :  { %4102 = vmatprep.subr.msk.mxu0 %vm69_vm0, %v54_v29 }
  0x3b   :  { %4103 = vmatpush3.xpose.msk.msra.mxu0 %vm69_vm0, %v38_v30 }
  0x3c   :  { %4104 = vmatprep.subr.msk.mxu0 %vm69_vm0, %v53_v31 }
  0x3f   :  { %4105 = vmatpush3.xpose.msk.msra.mxu0 %vm69_vm0, %v37_v32 }
  0x42   :  { %4107 = vmatmul.mubr.msk.f32.vlgmr.msra.gmra.mxu0 %vm69_vm0, %v4868_v10 }
  0x43   :  { %4108 = vmatprep.mubr.msk.f32.mxu0 %vm69_vm0, %v4967_v33 }
  0x46   :  { %4109 = vmatmul.mubr.msk.f32.gmra.mxu0 %vm69_vm0, %v4967_v33 }
  0x47   :  { %4110 = vmatprep.mubr.msk.f32.mxu0 %vm69_vm0, %v4976_v34 }
  0x4a   :  { %4111 = vmatmul.mubr.msk.f32.gmra.mxu0 %vm69_vm0, %v4976_v34 }
  0x4b   :  { %4112 = vmatprep.mubr.msk.f32.mxu0 %vm69_vm0, %v20_v35 }
  0x4e   :  { %4113 = vmatmul.mubr.msk.f32.gmra.mxu0 %vm69_vm0, %v20_v35 }
  0x4f   :  { %4114 = vmatprep.mubr.msk.f32.mxu0 %vm69_vm0, %v21_v36 }
  0x52   :  { %4115 = vmatmul.mubr.msk.f32.gmra.mxu0 %vm69_vm0, %v21_v36 }
  0x53   :  { %4116 = vmatprep.mubr.msk.f32.mxu0 %vm69_vm0, %v22_v37 }
  0x56   :  { %4117 = vmatmul.mubr.msk.f32.gmra.mxu0 %vm69_vm0, %v22_v37 }
  0x57   :  { %4118 = vmatprep.mubr.msk.f32.mxu0 %vm69_vm0, %v23_v38 }
  0x5a   :  { %4119 = vmatmul.mubr.msk.f32.gmra.mxu0 %vm69_vm0, %v23_v38 }
  0x5b   :  { %4120 = vmatprep.mubr.msk.f32.mxu0 %vm69_vm0, %v24_v39 }
  0x5e   :  { %4121 = vmatmul.mubr.msk.f32.gmra.mxu0 %vm69_vm0, %v24_v39 }
  0x5f   :  { %4122 = vmatprep.mubr.msk.f32.mxu0 %vm69_vm0, %v25_v40 }
  0x62   :  { %4123 = vmatmul.mubr.msk.f32.gmra.mxu0 %vm69_vm0, %v25_v40 }
  0x63   :  { %4124 = vmatprep.mubr.msk.f32.mxu0 %vm69_vm0, %v26_v41 }
  0x66   :  { %4125 = vmatmul.mubr.msk.f32.gmra.mxu0 %vm69_vm0, %v26_v41 }
  0x67   :  { %4126 = vmatprep.mubr.msk.f32.mxu0 %vm69_vm0, %v27_v42 }
  0x6a   :  { %4127 = vmatmul.mubr.msk.f32.gmra.mxu0 %vm69_vm0, %v27_v42 }
  0x6b   :  { %4128 = vmatprep.mubr.msk.f32.mxu0 %vm69_vm0, %v28_v43 }
  0x6e   :  { %4129 = vmatmul.mubr.msk.f32.gmra.mxu0 %vm69_vm0, %v28_v43 }
  0x6f   :  { %4130 = vmatprep.mubr.msk.f32.mxu0 %vm69_vm0, %v29_v44 }
  0x72   :  { %4131 = vmatmul.mubr.msk.f32.gmra.mxu0 %vm69_vm0, %v29_v44 }
  0x73   :  { %4132 = vmatprep.mubr.msk.f32.mxu0 %vm69_vm0, %v30_v45 }
  0x76   :  { %4133 = vmatmul.mubr.msk.f32.gmra.mxu0 %vm69_vm0, %v30_v45 }
  0x77   :  { %4134 = vmatprep.mubr.msk.f32.mxu0 %vm69_vm0, %v31_v46 }
  0x7a   :  { %4135 = vmatmul.mubr.msk.f32.gmra.mxu0 %vm69_vm0, %v31_v46 }
  0x7b   :  { %4136 = vmatprep.mubr.msk.f32.mxu0 %vm69_vm0, %v32_v47 }
  0x7e   :  { %4137 = vmatmul.mubr.msk.f32.gmra.mxu0 %vm69_vm0, %v32_v47 }
 0x102   :  { %v280_v57 = vpop.f32.mrf.mxu0 }
 0x103   :  { %v5062_v59 = vsub.f32 %v5057_v55, %v280_v57 }
 0x104   :  { %v282_v58 = vpop.f32.mrf.mxu0 }
 0x105   :  { %v5065_v60 = vsub.f32 %v5059_v56, %v282_v58 }
 0x106   :  { %v286_v61 = vpop.f32.mrf.mxu0 }
 0x107   :  { %vm426_vm1 = vcmp.le.f32.partialorder %v5062_v59, %v5065_v60  ;;  %v5075_v0 = vsub.f32 %v5057_v55, %v286_v61 }
 0x108   :  { %v288_v62 = vpop.f32.mrf.mxu0  ;;  %v427_v63 = vsel %vm426_vm1, %v5062_v59, %v5065_v60 }
 0x109   :  { %v5078_v1 = vsub.f32 %v5059_v56, %v288_v62  ;;  %429 = vmin.index.xlane.f32.xlu0 %v427_v63 }
 0x10a   :  { %v292_v2 = vpop.f32.mrf.mxu0 }
 0x10b   :  { %vm434_vm2 = vcmp.le.f32.partialorder %v5075_v0, %v5078_v1  ;;  %v5088_v5 = vsub.f32 %v5057_v55, %v292_v2 }
 0x10c   :  { %v294_v3 = vpop.f32.mrf.mxu0  ;;  %v435_v4 = vsel %vm434_vm2, %v5075_v0, %v5078_v1 }
 0x10d   :  { %v5091_v6 = vsub.f32 %v5059_v56, %v294_v3  ;;  %437 = vmin.index.xlane.f32.xlu1 %v435_v4 }
 0x10e   :  { %v298_v7 = vpop.f32.mrf.mxu0 }
 0x10f   :  { %vm442_vm3 = vcmp.le.f32.partialorder %v5088_v5, %v5091_v6  ;;  %v5101_v10 = vsub.f32 %v5057_v55, %v298_v7 }
 0x110   :  { %v300_v8 = vpop.f32.mrf.mxu0  ;;  %v443_v9 = vsel %vm442_vm3, %v5088_v5, %v5091_v6 }
 0x111   :  { %v5104_v11 = vsub.f32 %v5059_v56, %v300_v8  ;;  %445 = vmin.index.xlane.f32.xlu1 %v443_v9 }
 0x112   :  { %v304_v12 = vpop.f32.mrf.mxu0 }
 0x113   :  { %vm450_vm4 = vcmp.le.f32.partialorder %v5101_v10, %v5104_v11  ;;  %v5114_v15 = vsub.f32 %v5057_v55, %v304_v12 }
 0x114   :  { %v306_v13 = vpop.f32.mrf.mxu0  ;;  %v451_v14 = vsel %vm450_vm4, %v5101_v10, %v5104_v11 }
 0x115   :  { %v5117_v16 = vsub.f32 %v5059_v56, %v306_v13  ;;  %453 = vmin.index.xlane.f32.xlu0 %v451_v14  ;;  %v5244_v13 = vand.u32 127, %v34_v48 }
 0x116   :  { %v310_v17 = vpop.f32.mrf.mxu0 }
 0x117   :  { %vm458_vm5 = vcmp.le.f32.partialorder %v5114_v15, %v5117_v16  ;;  %v5127_v20 = vsub.f32 %v5057_v55, %v310_v17  ;;  %v5247_v17 = vadd.s32 128, %v5244_v13 }
 0x118   :  { %v312_v18 = vpop.f32.mrf.mxu0  ;;  %v459_v19 = vsel %vm458_vm5, %v5114_v15, %v5117_v16 }
 0x119   :  { %v5130_v21 = vsub.f32 %v5059_v56, %v312_v18  ;;  %461 = vmin.index.xlane.f32.xlu1 %v459_v19  ;;  %v428_v19 = vsel %vm426_vm1, %v5244_v13, %v5247_v17  ;;  %v436_v48 = vsel %vm434_vm2, %v5244_v13, %v5247_v17  ;;  %v452_v60 = vsel %vm450_vm4, %v5244_v13, %v5247_v17 }
 0x11a   :  { %v316_v22 = vpop.f32.mrf.mxu0  ;;  %v460_v1 = vsel %vm458_vm5, %v5244_v13, %v5247_v17 }
 0x11b   :  { %vm466_vm6 = vcmp.le.f32.partialorder %v5127_v20, %v5130_v21  ;;  %v5135_v23 = vsub.f32 %v5057_v55, %v316_v22 }
 0x11c   :  { %v318_v24 = vpop.f32.mrf.mxu0  ;;  %v467_v25 = vsel %vm466_vm6, %v5127_v20, %v5130_v21  ;;  %v468_v5 = vsel %vm466_vm6, %v5244_v13, %v5247_v17  ;;  %vm563_vm6 = vcmask 130112  }
 0x11d   :  { %v5143_v26 = vsub.f32 %v5059_v56, %v318_v24  ;;  %469 = vmin.index.xlane.f32.xlu1 %v467_v25  ;;  %v444_v25 = vsel %vm442_vm3, %v5244_v13, %v5247_v17 }
 0x11e   :  { %v322_v27 = vpop.f32.mrf.mxu0 }
 0x11f   :  { %vm474_vm7 = vcmp.le.f32.partialorder %v5135_v23, %v5143_v26  ;;  %v5148_v28 = vsub.f32 %v5057_v55, %v322_v27 }
 0x120   :  { %v324_v29 = vpop.f32.mrf.mxu0  ;;  %v475_v30 = vsel %vm474_vm7, %v5135_v23, %v5143_v26  ;;  %v476_v15 = vsel %vm474_vm7, %v5244_v13, %v5247_v17  ;;  %vm7774_vm7 = vcmask 195712  }
 0x121   :  { %v5156_v31 = vsub.f32 %v5059_v56, %v324_v29  ;;  %477 = vmin.index.xlane.f32.xlu0 %v475_v30 }
 0x122   :  { %v328_v32 = vpop.f32.mrf.mxu0 }
 0x123   :  { %vm482_vm8 = vcmp.le.f32.partialorder %v5148_v28, %v5156_v31  ;;  %v5161_v35 = vsub.f32 %v5057_v55, %v328_v32 }
 0x124   :  { %v330_v36 = vpop.f32.mrf.mxu0  ;;  %v483_v37 = vsel %vm482_vm8, %v5148_v28, %v5156_v31  ;;  %v484_v16 = vsel %vm482_vm8, %v5244_v13, %v5247_v17 }
 0x125   :  { %v5169_v38 = vsub.f32 %v5059_v56, %v330_v36  ;;  %485 = vmin.index.xlane.f32.xlu1 %v483_v37 }
 0x126   :  { %v334_v39 = vpop.f32.mrf.mxu0 }
 0x127   :  { %vm490_vm9 = vcmp.le.f32.partialorder %v5161_v35, %v5169_v38  ;;  %v5174_v40 = vsub.f32 %v5057_v55, %v334_v39 }
 0x128   :  { %v336_v41 = vpop.f32.mrf.mxu0  ;;  %v491_v42 = vsel %vm490_vm9, %v5161_v35, %v5169_v38  ;;  %v492_v21 = vsel %vm490_vm9, %v5244_v13, %v5247_v17 }
 0x129   :  { %v5182_v43 = vsub.f32 %v5059_v56, %v336_v41  ;;  %493 = vmin.index.xlane.f32.xlu1 %v491_v42 }
 0x12a   :  { %v340_v44 = vpop.f32.mrf.mxu0 }
 0x12b   :  { %vm498_vm10 = vcmp.le.f32.partialorder %v5174_v40, %v5182_v43  ;;  %v5187_v45 = vsub.f32 %v5057_v55, %v340_v44 }
 0x12c   :  { %v499_v46 = vsel %vm498_vm10, %v5174_v40, %v5182_v43  ;;  %v342_v47 = vpop.f32.mrf.mxu0  ;;  %v500_v23 = vsel %vm498_vm10, %v5244_v13, %v5247_v17 }
 0x12d   :  { %501 = vmin.index.xlane.f32.xlu1 %v499_v46  ;;  %v5195_v50 = vsub.f32 %v5059_v56, %v342_v47  ;;  %v3672_v46 = vld [vmem:[%s7746_s1 + $0x1f0] sm:$0xff] }
 0x12e   :  { %v346_v51 = vpop.f32.mrf.mxu0  ;;  %v3656_v47 = vld [vmem:[%s7746_s1 + $0x170] sm:$0xff] }
 0x12f   :  { %vm506_vm11 = vcmp.le.f32.partialorder %v5187_v45, %v5195_v50  ;;  %v5200_v52 = vsub.f32 %v5057_v55, %v346_v51  ;;  %v3655_v51 = vld [vmem:[%s7746_s1 + $0x168] sm:$0xff] }
 0x130   :  { %v507_v53 = vsel %vm506_vm11, %v5187_v45, %v5195_v50  ;;  %v348_v54 = vpop.f32.mrf.mxu0  ;;  %v508_v29 = vsel %vm506_vm11, %v5244_v13, %v5247_v17  ;;  %v3657_v45 = vld [vmem:[%s7746_s1 + $0x178] sm:$0xff]  ;;  %v3671_v50 = vld [vmem:[%s7746_s1 + $0x1e8] sm:$0xff] }
 0x131   :  { %509 = vmin.index.xlane.f32.xlu0 %v507_v53  ;;  %v5208_v57 = vsub.f32 %v5059_v56, %v348_v54  ;;  %v565_v54 = vadd.s32 4294967280, %v5244_v13 }
 0x132   :  { %v352_v58 = vpop.f32.mrf.mxu0 }
 0x133   :  { %vm514_vm12 = vcmp.le.f32.partialorder %v5200_v52, %v5208_v57  ;;  %v5213_v61 = vsub.f32 %v5057_v55, %v352_v58 }
 0x134   :  { %v515_v62 = vsel %vm514_vm12, %v5200_v52, %v5208_v57  ;;  %v354_v63 = vpop.f32.mrf.mxu0  ;;  %v516_v36 = vsel %vm514_vm12, %v5244_v13, %v5247_v17  ;;  %v558_v52 = vadd.s32 4294967288, %v5244_v13  ;;  %v7760_v57 = vmov 1.0  }
 0x135   :  { %517 = vmin.index.xlane.f32.xlu0 %v515_v62  ;;  %v5221_v2 = vsub.f32 %v5059_v56, %v354_v63  ;;  %v5381_v63 = vsub.s32 %v565_v54, %v5050_v49  ;;  %vm7773_vm12 = vcmask 261312   ;;  %v3652_v54 = vld [vmem:[%s7746_s1 + $0x150] sm:$0xff] }
 0x136   :  { %v358_v3 = vpop.f32.mrf.mxu0  ;;  %v5370_v58 = vsub.s32 %v558_v52, %v5050_v49  ;;  %v3653_v52 = vld [vmem:[%s7746_s1 + $0x158] sm:$0xff] }
 0x137   :  { %vm522_vm13 = vcmp.le.f32.partialorder %v5213_v61, %v5221_v2  ;;  %v5226_v4 = vsub.f32 %v5057_v55, %v358_v3  ;;  %7796 = vst [vmem:[#allocation8_spill] sm:$0xff] %v5381_v63  ;;  %v572_v3 = vadd.s32 4294967272, %v5244_v13 }
 0x138   :  { %v523_v7 = vsel %vm522_vm13, %v5213_v61, %v5221_v2  ;;  %v360_v8 = vpop.f32.mrf.mxu0  ;;  %v524_v40 = vsel %vm522_vm13, %v5244_v13, %v5247_v17  ;;  %7794 = vst [vmem:[#allocation6_spill] sm:$0xff] %v5370_v58  ;;  %v5375_v61 = vsub.s32 %v5244_v13, %v5050_v49  ;;  %vm7769_vm13 = vcmask 326912  }
 0x139   :  { %525 = vmin.index.xlane.f32.xlu0 %v523_v7  ;;  %v5234_v9 = vsub.f32 %v5059_v56, %v360_v8 }
 0x13a   :  { %v364_v28 = vpop.f32.mrf.mxu0  ;;  %7795 = vst [vmem:[#allocation7_spill] sm:$0xff] %v5375_v61 }
 0x13b   :  { %vm530_vm14 = vcmp.le.f32.partialorder %v5226_v4, %v5234_v9  ;;  %v5328_v42 = vsub.f32 %v5057_v55, %v364_v28 }
 0x13c   :  { %v531_v12 = vsel %vm530_vm14, %v5226_v4, %v5234_v9  ;;  %v366_v31 = vpop.f32.mrf.mxu0  ;;  %v532_v44 = vsel %vm530_vm14, %v5244_v13, %v5247_v17  ;;  %v579_v9 = vadd.s32 4294967264, %v5244_v13 }
 0x13d   :  { %533 = vmin.index.xlane.f32.xlu0 %v531_v12  ;;  %v5331_v43 = vsub.f32 %v5059_v56, %v366_v31 }
 0x13e   :  { %v370_v35 = vpop.f32.mrf.mxu0 }
 0x13f   :  { %v5310_v38 = vsub.f32 %v5057_v55, %v370_v35  ;;  %vm538_vm1 = vcmp.le.f32.partialorder %v5328_v42, %v5331_v43 }
 0x140   :  { %v372_v37 = vpop.f32.mrf.mxu0  ;;  %v539_v55 = vsel %vm538_vm1, %v5328_v42, %v5331_v43  ;;  %v3642_v42 = vld [vmem:[%s7746_s1 + $0x100] sm:$0xff] }
 0x141   :  { %v5313_v39 = vsub.f32 %v5059_v56, %v372_v37  ;;  %v3673_v56 = vld [vmem:[%s7746_s1 + $0x1f8] sm:$0xff] }
 0x142   :  { %4218 = vmatprep.subr.msk.mxu1 %vm69_vm0, %v3673_v56  ;;  %4282 = vmatprep.subr.mxu0 %v3673_v56 }
 0x143   :  { %vm546_vm15 = vcmp.le.f32.partialorder %v5310_v38, %v5313_v39  ;;  %4283 = vmatpush3.msra.mxu0 %v3657_v45 }
 0x144   :  { %v547_v41 = vsel %vm546_vm15, %v5310_v38, %v5313_v39  ;;  %4284 = vmatprep.subr.mxu0 %v3672_v46  ;;  %v3665_v38 = vld [vmem:[%s7746_s1 + $0x1b8] sm:$0xff] }
 0x145   :  { %4285 = vmatpush3.msra.mxu0 %v3656_v47  ;;  %v3649_v39 = vld [vmem:[%s7746_s1 + $0x138] sm:$0xff] }
 0x146   :  { %4286 = vmatprep.subr.mxu0 %v3671_v50 }
 0x147   :  { %4287 = vmatpush3.msra.mxu0 %v3655_v51 }
 0x192   :  { %v430_v14 = vpop.xlane.xlu0 %429 }
 0x193   :  { %4684 = vset.pattern.permute.xlu0 %v430_v14  ;;  %v5398_v14 = vsub.s32 %v572_v3, %v5050_v49  ;;  %v3651_v3 = vld [vmem:[%s7746_s1 + $0x148] sm:$0xff] }
 0x195   :  { %7797 = vst [vmem:[#allocation9_spill] sm:$0xff] %v5398_v14 }
 0x196   :  { %v438_v18 = vpop.xlane.xlu1 %437 }
 0x197   :  { %4685 = vset.pattern.permute.xlu1 %v438_v18  ;;  %432 = vperm.xlu0 %4684, %v428_v19  }
 0x19a   :  { %v446_v22 = vpop.xlane.xlu1 %445 }
 0x19b   :  { %440 = vperm.xlu1 %4685, %v436_v48   ;;  %4686 = vset.pattern.permute.xlu0 %v446_v22  ;;  %v5406_v22 = vsub.s32 %v579_v9, %v5050_v49 }
 0x19d   :  { %7798 = vst [vmem:[#allocation10_spill] sm:$0xff] %v5406_v22 }
 0x19e   :  { %v454_v24 = vpop.xlane.xlu0 %453 }
 0x19f   :  { %4687 = vset.pattern.permute.xlu1 %v454_v24  ;;  %448 = vperm.xlu0 %4686, %v444_v25  }
 0x1a2   :  { %v462_v59 = vpop.xlane.xlu1 %461 }
 0x1a3   :  { %456 = vperm.xlu1 %4687, %v452_v60   ;;  %4688 = vset.pattern.permute.xlu0 %v462_v59  ;;  %v586_v60 = vadd.s32 4294967256, %v5244_v13 }
 0x1a6   :  { %v470_v0 = vpop.xlane.xlu1 %469 }
 0x1a7   :  { %4689 = vset.pattern.permute.xlu1 %v470_v0  ;;  %464 = vperm.xlu0 %4688, %v460_v1  }
 0x1aa   :  { %v478_v6 = vpop.xlane.xlu0 %477 }
 0x1ab   :  { %472 = vperm.xlu1 %4689, %v468_v5   ;;  %v593_v5 = vadd.s32 4294967248, %v5244_v13 }
 0x1ae   :  { %v486_v10 = vpop.xlane.xlu1 %485 }
 0x1af   :  { %4690 = vset.pattern.permute.xlu1 %v478_v6  ;;  %4691 = vset.pattern.permute.xlu0 %v486_v10  ;;  %v600_v6 = vadd.s32 4294967240, %v5244_v13  ;;  %v5424_v10 = vsub.s32 %v586_v60, %v5050_v49  ;;  %v3645_v60 = vld [vmem:[%s7746_s1 + $0x118] sm:$0xff] }
 0x1b1   :  { %7799 = vst [vmem:[#allocation11_spill] sm:$0xff] %v5424_v10 }
 0x1b2   :  { %v494_v11 = vpop.xlane.xlu1 %493 }
 0x1b3   :  { %480 = vperm.xlu1 %4690, %v476_v15   ;;  %488 = vperm.xlu0 %4691, %v484_v16   ;;  %v5432_v15 = vsub.s32 %v600_v6, %v5050_v49  ;;  %v3659_v6 = vld [vmem:[%s7746_s1 + $0x188] sm:$0xff] }
 0x1b6   :  { %v502_v20 = vpop.xlane.xlu1 %501 }
 0x1b7   :  { %4692 = vset.pattern.permute.xlu1 %v494_v11  ;;  %4693 = vset.pattern.permute.xlu0 %v502_v20  ;;  %v5429_v11 = vsub.s32 %v593_v5, %v5050_v49  ;;  %v3644_v5 = vld [vmem:[%s7746_s1 + $0x110] sm:$0xff] }
 0x1b9   :  { %7800 = vst [vmem:[#allocation12_spill] sm:$0xff] %v5429_v11 }
 0x1ba   :  { %v510_v27 = vpop.xlane.xlu0 %509 }
 0x1bb   :  { %496 = vperm.xlu1 %4692, %v492_v21   ;;  %504 = vperm.xlu0 %4693, %v500_v23   ;;  %v614_v23 = vadd.s32 4294967224, %v5244_v13 }
 0x1bd   :  { %v5452_v35 = vsub.s32 %v614_v23, %v5050_v49 }
 0x1be   :  { %v518_v26 = vpop.xlane.xlu0 %517 }
 0x1bf   :  { %4694 = vset.pattern.permute.xlu1 %v510_v27  ;;  %v607_v27 = vadd.s32 4294967232, %v5244_v13 }
 0x1c2   :  { %v526_v30 = vpop.xlane.xlu0 %525 }
 0x1c3   :  { %512 = vperm.xlu1 %4694, %v508_v29  }
 0x1c6   :  { %v534_v32 = vpop.xlane.xlu0 %533 }
 0x1c7   :  { %4695 = vset.pattern.permute.xlu1 %v518_v26  ;;  %4697 = vset.pattern.permute.xlu0 %v534_v32  ;;  %v5449_v32 = vsub.s32 %v607_v27, %v5050_v49 }
 0x1cb   :  { %520 = vperm.xlu1 %4695, %v516_v36  }
 0x1cf   :  { %4696 = vset.pattern.permute.xlu1 %v526_v30 }
 0x1d3   :  { %528 = vperm.xlu1 %4696, %v524_v40  }
 0x1da   :  { %549 = vmin.index.xlane.f32.xlu0 %v547_v41 }
 0x1f0   :  { %536 = vperm.xlu0 %4697, %v532_v44  }
 0x1f7   :  { %541 = vmin.index.xlane.f32.xlu1 %v539_v55 }
 0x212   :  { %v433_v53 = vpop.permute.xlu0 %432 }
 0x213   :  { %vm665_vm2 = vcmp.eq.s32.totalorder %v5247_v17, %v433_v53  ;;  %vm664_vm3 = vcmp.eq.s32.totalorder %v5244_v13, %v433_v53  ;;  %v557_v4 = vrot.slane %v433_v53, %v5375_v61  ;;  %v3668_v53 = vld [vmem:[%s7746_s1 + $0x1d0] sm:$0xff] }
 0x214   :  { %3610 = vmatprep.mubr.msk.f32.mxu1 %vm665_vm2, %v7760_v57 }
 0x215   :  { %3611 = vmatmul.mubr.msk.f32.vlgmr.msra.gmra.mxu1 %vm664_vm3, %v7760_v57 }
 0x216   :  { %v441_v62 = vpop.permute.xlu1 %440  ;;  %4219 = vmatpush3.xpose.msk.msra.mxu1 %vm69_vm0, %v3657_v45 }
 0x217   :  { %vm667_vm4 = vcmp.eq.s32.totalorder %v5247_v17, %v441_v62  ;;  %vm666_vm5 = vcmp.eq.s32.totalorder %v5244_v13, %v441_v62  ;;  %4220 = vmatprep.subr.msk.mxu1 %vm69_vm0, %v3672_v46  ;;  %v562_v2 = vrot.slane %v441_v62, %v5370_v58 }
 0x218   :  { %3612 = vmatprep.mubr.msk.f32.mxu1 %vm667_vm4, %v7760_v57 }
 0x219   :  { %3613 = vmatmul.mubr.msk.f32.gmra.mxu1 %vm666_vm5, %v7760_v57  ;;  %v564_v12 = vsel %vm563_vm6, %v562_v2, %v557_v4  ;;  %vm7764_vm5 = vcmask 392512   ;;  %v3667_v2 = vld [vmem:[%s7746_s1 + $0x1c8] sm:$0xff]  ;;  %v548_v4 = vsel %vm546_vm15, %v5244_v13, %v5247_v17 }
 0x21a   :  { %v449_v7 = vpop.permute.xlu0 %448  ;;  %4221 = vmatpush3.xpose.msk.msra.mxu1 %vm69_vm0, %v3656_v47  ;;  %v3670_v47 = vld [vmem:[%s7746_s1 + $0x1e0] sm:$0xff] }
 0x21b   :  { %v569_v8 = vrot.slane %v449_v7, %v5381_v63  ;;  %vm669_vm8 = vcmp.eq.s32.totalorder %v5247_v17, %v449_v7  ;;  %vm668_vm9 = vcmp.eq.s32.totalorder %v5244_v13, %v449_v7  ;;  %4222 = vmatprep.subr.msk.mxu1 %vm69_vm0, %v3671_v50  ;;  %v3654_v50 = vld [vmem:[%s7746_s1 + $0x160] sm:$0xff]  ;;  %4288 = vmatprep.subr.mxu0 %v3670_v47 }
 0x21c   :  { %3614 = vmatprep.mubr.msk.f32.mxu1 %vm669_vm8, %v7760_v57  ;;  %vm7759_vm8 = vcmask 458112   ;;  %4289 = vmatpush3.msra.mxu0 %v3654_v50  ;;  %v3666_v7 = vld [vmem:[%s7746_s1 + $0x1c0] sm:$0xff] }
 0x21d   :  { %v571_v18 = vsel %vm7774_vm7, %v569_v8, %v564_v12  ;;  %3615 = vmatmul.mubr.msk.f32.gmra.mxu1 %vm668_vm9, %v7760_v57  ;;  %vm7758_vm9 = vcmask 523712   ;;  %v3650_v8 = vld [vmem:[%s7746_s1 + $0x140] sm:$0xff]  ;;  %v3664_v12 = vld [vmem:[%s7746_s1 + $0x1b0] sm:$0xff] }
 0x21e   :  { %v457_v19 = vpop.permute.xlu1 %456  ;;  %4223 = vmatpush3.xpose.msk.msra.mxu1 %vm69_vm0, %v3655_v51  ;;  %v3669_v51 = vld [vmem:[%s7746_s1 + $0x1d8] sm:$0xff] }
 0x21f   :  { %vm671_vm10 = vcmp.eq.s32.totalorder %v5247_v17, %v457_v19  ;;  %vm670_vm11 = vcmp.eq.s32.totalorder %v5244_v13, %v457_v19  ;;  %v576_v48 = vrot.slane %v457_v19, %v5398_v14  ;;  %4224 = vmatprep.subr.msk.mxu1 %vm69_vm0, %v3670_v47  ;;  %4290 = vmatprep.subr.mxu0 %v3669_v51  ;;  %v3663_v19 = vld [vmem:[%s7746_s1 + $0x1a8] sm:$0xff] }
 0x220   :  { %3616 = vmatprep.mubr.msk.f32.mxu1 %vm671_vm10, %v7760_v57  ;;  %4291 = vmatpush3.msra.mxu0 %v3653_v52 }
 0x221   :  { %3617 = vmatmul.mubr.msk.f32.gmra.mxu1 %vm670_vm11, %v7760_v57  ;;  %v578_v59 = vsel %vm7773_vm12, %v576_v48, %v571_v18  ;;  %4292 = vmatprep.subr.mxu0 %v3668_v53  ;;  %v3648_v18 = vld [vmem:[%s7746_s1 + $0x130] sm:$0xff]  ;;  %v3647_v48 = vld [vmem:[%s7746_s1 + $0x128] sm:$0xff] }
 0x222   :  { %v465_v24 = vpop.permute.xlu0 %464  ;;  %4225 = vmatpush3.xpose.msk.msra.mxu1 %vm69_vm0, %v3654_v50  ;;  %4293 = vmatpush3.msra.mxu0 %v3652_v54  ;;  %v642_v50 = vadd.s32 4294967192, %v5244_v13 }
 0x223   :  { %v583_v25 = vrot.slane %v465_v24, %v5406_v22  ;;  %vm673_vm14 = vcmp.eq.s32.totalorder %v5247_v17, %v465_v24  ;;  %vm672_vm2 = vcmp.eq.s32.totalorder %v5244_v13, %v465_v24  ;;  %4226 = vmatprep.subr.msk.mxu1 %vm69_vm0, %v3669_v51  ;;  %4294 = vmatprep.subr.mxu0 %v3667_v2  ;;  %v3662_v24 = vld [vmem:[%s7746_s1 + $0x1a0] sm:$0xff] }
 0x224   :  { %3618 = vmatprep.mubr.msk.f32.mxu1 %vm673_vm14, %v7760_v57  ;;  %4295 = vmatpush3.msra.mxu0 %v3651_v3 }
 0x225   :  { %v585_v0 = vsel %vm7769_vm13, %v583_v25, %v578_v59  ;;  %3619 = vmatmul.mubr.msk.f32.gmra.mxu1 %vm672_vm2, %v7760_v57  ;;  %4296 = vmatprep.subr.mxu0 %v3666_v7  ;;  %v3646_v25 = vld [vmem:[%s7746_s1 + $0x120] sm:$0xff]  ;;  %v3661_v59 = vld [vmem:[%s7746_s1 + $0x198] sm:$0xff] }
 0x226   :  { %v473_v1 = vpop.permute.xlu1 %472  ;;  %4227 = vmatpush3.xpose.msk.msra.mxu1 %vm69_vm0, %v3653_v52  ;;  %4297 = vmatpush3.msra.mxu0 %v3650_v8 }
 0x227   :  { %vm675_vm3 = vcmp.eq.s32.totalorder %v5247_v17, %v473_v1  ;;  %vm674_vm4 = vcmp.eq.s32.totalorder %v5244_v13, %v473_v1  ;;  %v590_v16 = vrot.slane %v473_v1, %v5424_v10  ;;  %4228 = vmatprep.subr.msk.mxu1 %vm69_vm0, %v3668_v53  ;;  %4298 = vmatprep.subr.mxu0 %v3665_v38 }
 0x228   :  { %3620 = vmatprep.mubr.msk.f32.mxu1 %vm675_vm3, %v7760_v57  ;;  %vm7750_vm3 = vcmask 589312   ;;  %4299 = vmatpush3.msra.mxu0 %v3649_v39 }
 0x229   :  { %3621 = vmatmul.mubr.msk.f32.gmra.mxu1 %vm674_vm4, %v7760_v57  ;;  %v592_v29 = vsel %vm7764_vm5, %v590_v16, %v585_v0  ;;  %vm7757_vm4 = vcmask 654912   ;;  %4300 = vmatprep.subr.mxu0 %v3664_v12  ;;  %v3660_v0 = vld [vmem:[%s7746_s1 + $0x190] sm:$0xff]  ;;  %v540_v16 = vsel %vm538_vm1, %v5244_v13, %v5247_v17  ;;  %vm7751_vm1 = vcmask 720512  }
 0x22a   :  { %4229 = vmatpush3.xpose.msk.msra.mxu1 %vm69_vm0, %v3652_v54  ;;  %4301 = vmatpush3.msra.mxu0 %v3648_v18  ;;  %v649_v54 = vadd.s32 4294967184, %v5244_v13 }
 0x22b   :  { %4230 = vmatprep.subr.msk.mxu1 %vm69_vm0, %v3667_v2  ;;  %4302 = vmatprep.subr.mxu0 %v3663_v19  ;;  %v5639_v2 = vsub.s32 %v642_v50, %v5050_v49 }
 0x22c   :  { %4303 = vmatpush3.msra.mxu0 %v3647_v48 }
 0x22d   :  { %4304 = vmatprep.subr.mxu0 %v3662_v24 }
 0x22e   :  { %v481_v20 = vpop.permute.xlu1 %480  ;;  %v489_v21 = vpop.permute.xlu0 %488  ;;  %4231 = vmatpush3.xpose.msk.msra.mxu1 %vm69_vm0, %v3651_v3  ;;  %4305 = vmatpush3.msra.mxu0 %v3646_v25  ;;  %v656_v3 = vadd.s32 4294967176, %v5244_v13 }
 0x22f   :  { %v597_v26 = vrot.slane %v481_v20, %v5429_v11  ;;  %v604_v28 = vrot.slane %v489_v21, %v5432_v15  ;;  %vm677_vm10 = vcmp.eq.s32.totalorder %v5247_v17, %v481_v20  ;;  %vm676_vm11 = vcmp.eq.s32.totalorder %v5244_v13, %v481_v20  ;;  %4232 = vmatprep.subr.msk.mxu1 %vm69_vm0, %v3666_v7  ;;  %v3643_v20 = vld [vmem:[%s7746_s1 + $0x108] sm:$0xff] }
 0x230   :  { %3622 = vmatprep.mubr.msk.f32.mxu1 %vm677_vm10, %v7760_v57  ;;  %vm679_vm14 = vcmp.eq.s32.totalorder %v5247_v17, %v489_v21  ;;  %vm678_vm2 = vcmp.eq.s32.totalorder %v5244_v13, %v489_v21  ;;  %4306 = vmatprep.subr.mxu0 %v3661_v59  ;;  %v3658_v21 = vld [vmem:[%s7746_s1 + $0x180] sm:$0xff] }
 0x231   :  { %v599_v30 = vsel %vm7759_vm8, %v597_v26, %v592_v29  ;;  %3623 = vmatmul.mubr.msk.f32.gmra.mxu1 %vm676_vm11, %v7760_v57  ;;  %4307 = vmatpush3.msra.mxu0 %v3645_v60 }
 0x232   :  { %v606_v31 = vsel %vm7758_vm9, %v604_v28, %v599_v30  ;;  %3624 = vmatprep.mubr.msk.f32.mxu1 %vm679_vm14, %v7760_v57  ;;  %4233 = vmatpush3.xpose.msk.msra.mxu1 %vm69_vm0, %v3650_v8 }
 0x233   :  { %4234 = vmatprep.subr.msk.mxu1 %vm69_vm0, %v3665_v38  ;;  %4308 = vmatprep.subr.mxu0 %v3660_v0 }
 0x234   :  { %4309 = vmatpush3.msra.mxu0 %v3644_v5 }
 0x235   :  { %3625 = vmatmul.mubr.msk.f32.gmra.mxu1 %vm678_vm2, %v7760_v57  ;;  %4310 = vmatprep.subr.mxu0 %v3659_v6 }
 0x236   :  { %v497_v36 = vpop.permute.xlu1 %496  ;;  %v505_v37 = vpop.permute.xlu0 %504  ;;  %4235 = vmatpush3.xpose.msk.msra.mxu1 %vm69_vm0, %v3649_v39  ;;  %4311 = vmatpush3.msra.mxu0 %v3643_v20  ;;  %v5647_v39 = vsub.s32 %v649_v54, %v5050_v49 }
 0x237   :  { %v611_v40 = vrot.slane %v497_v36, %v5449_v32  ;;  %v618_v41 = vrot.slane %v505_v37, %v5452_v35  ;;  %vm681_vm10 = vcmp.eq.s32.totalorder %v5247_v17, %v497_v36  ;;  %vm680_vm11 = vcmp.eq.s32.totalorder %v5244_v13, %v497_v36  ;;  %4236 = vmatprep.subr.msk.mxu1 %vm69_vm0, %v3664_v12 }
 0x238   :  { %3626 = vmatprep.mubr.msk.f32.mxu1 %vm681_vm10, %v7760_v57  ;;  %vm683_vm14 = vcmp.eq.s32.totalorder %v5247_v17, %v505_v37  ;;  %vm682_vm2 = vcmp.eq.s32.totalorder %v5244_v13, %v505_v37  ;;  %4312 = vmatprep.subr.mxu0 %v3658_v21  ;;  %v621_v37 = vadd.s32 4294967216, %v5244_v13 }
 0x239   :  { %v613_v44 = vsel %vm7750_vm3, %v611_v40, %v606_v31  ;;  %3627 = vmatmul.mubr.msk.f32.gmra.mxu1 %vm680_vm11, %v7760_v57  ;;  %4313 = vmatpush3.msra.mxu0 %v3642_v42  ;;  %v628_v40 = vadd.s32 4294967208, %v5244_v13 }
 0x23a   :  { %v5465_v55 = vsel %vm7757_vm4, %v618_v41, %v613_v44  ;;  %3628 = vmatprep.mubr.msk.f32.mxu1 %vm683_vm14, %v7760_v57  ;;  %4237 = vmatpush3.xpose.msk.msra.mxu1 %vm69_vm0, %v3648_v18  ;;  %v635_v44 = vadd.s32 4294967200, %v5244_v13  ;;  %v5624_v47 = vsub.s32 %v621_v37, %v5050_v49  ;;  %v5654_v18 = vsub.s32 %v656_v3, %v5050_v49 }
 0x23b   :  { %4238 = vmatprep.subr.msk.mxu1 %vm69_vm0, %v3663_v19  ;;  %v5628_v51 = vsub.s32 %v628_v40, %v5050_v49  ;;  %v4751_v40 = vld [vmem:[%s7745_s0 + $0x28] sm:$0xff] }
 0x23c   :  { %v5633_v53 = vsub.s32 %v635_v44, %v5050_v49 }
 0x23d   :  { %3629 = vmatmul.mubr.msk.f32.gmra.mxu1 %vm682_vm2, %v7760_v57 }
 0x23e   :  { %v5470_v56 = vpop.permute.xlu1 %512  ;;  %4239 = vmatpush3.xpose.msk.msra.mxu1 %vm69_vm0, %v3647_v48 }
 0x23f   :  { %vm685_vm10 = vcmp.eq.s32.totalorder %v5247_v17, %v5470_v56  ;;  %vm684_vm3 = vcmp.eq.s32.totalorder %v5244_v13, %v5470_v56  ;;  %4240 = vmatprep.subr.msk.mxu1 %vm69_vm0, %v3662_v24 }
 0x240   :  { %3630 = vmatprep.mubr.msk.f32.mxu1 %vm685_vm10, %v7760_v57 }
 0x241   :  { %3631 = vmatmul.mubr.msk.f32.gmra.mxu1 %vm684_vm3, %v7760_v57 }
 0x242   :  { %4241 = vmatpush3.xpose.msk.msra.mxu1 %vm69_vm0, %v3646_v25 }
 0x243   :  { %4242 = vmatprep.subr.msk.mxu1 %vm69_vm0, %v3661_v59 }
 0x246   :  { %v5478_v45 = vpop.permute.xlu1 %520  ;;  %4243 = vmatpush3.xpose.msk.msra.mxu1 %vm69_vm0, %v3645_v60 }
 0x247   :  { %vm687_vm11 = vcmp.eq.s32.totalorder %v5247_v17, %v5478_v45  ;;  %vm686_vm14 = vcmp.eq.s32.totalorder %v5244_v13, %v5478_v45  ;;  %4244 = vmatprep.subr.msk.mxu1 %vm69_vm0, %v3660_v0 }
 0x248   :  { %3632 = vmatprep.mubr.msk.f32.mxu1 %vm687_vm11, %v7760_v57  ;;  %vm7756_vm11 = vcmask 786112  }
 0x249   :  { %3633 = vmatmul.mubr.msk.f32.gmra.mxu1 %vm686_vm14, %v7760_v57  ;;  %vm7752_vm14 = vcmask 851712  }
 0x24a   :  { %4245 = vmatpush3.xpose.msk.msra.mxu1 %vm69_vm0, %v3644_v5  ;;  %v4748_v5 = vld [vmem:[%s7745_s0] sm:$0xff] }
 0x24b   :  { %4246 = vmatprep.subr.msk.mxu1 %vm69_vm0, %v3659_v6 }
 0x24e   :  { %v5486_v46 = vpop.permute.xlu1 %528  ;;  %4247 = vmatpush3.xpose.msk.msra.mxu1 %vm69_vm0, %v3643_v20 }
 0x24f   :  { %vm689_vm2 = vcmp.eq.s32.totalorder %v5247_v17, %v5486_v46  ;;  %vm688_vm3 = vcmp.eq.s32.totalorder %v5244_v13, %v5486_v46  ;;  %4248 = vmatprep.subr.msk.mxu1 %vm69_vm0, %v3658_v21  ;;  %v639_v8 = vrot.slane %v5486_v46, %v5633_v53 }
 0x250   :  { %3634 = vmatprep.mubr.msk.f32.mxu1 %vm689_vm2, %v7760_v57  ;;  %vm7755_vm2 = vcmask 917312  }
 0x251   :  { %3635 = vmatmul.mubr.msk.f32.gmra.mxu1 %vm688_vm3, %v7760_v57  ;;  %vm7754_vm3 = vcmask 982912  }
 0x252   :  { %4249 = vmatpush3.xpose.msk.msra.mxu1 %vm69_vm0, %v3642_v42 }
 0x263   :  { %v550_v62 = vpop.xlane.xlu0 %549 }
 0x264   :  { %4699 = vset.pattern.permute.xlu0 %v550_v62  ;;  %v625_v62 = vrot.slane %v5470_v56, %v5624_v47 }
 0x266   :  { %v627_v56 = vsel %vm7751_vm1, %v625_v62, %v5465_v55  ;;  %vm7753_vm1 = vcmask 1048512  }
 0x268   :  { %552 = vperm.xlu0 %4699, %v548_v4   ;;  %v632_v4 = vrot.slane %v5478_v45, %v5628_v51 }
 0x26a   :  { %v634_v45 = vsel %vm7756_vm11, %v632_v4, %v627_v56  ;;  %v4753_v4 = vld [vmem:[%s7745_s0 + $0x38] sm:$0xff]  ;;  %v4754_v56 = vld [vmem:[%s7745_s0 + $0x40] sm:$0xff] }
 0x26b   :  { %v5539_v9 = vpop.permute.xlu0 %536  ;;  %v641_v46 = vsel %vm7752_vm14, %v639_v8, %v634_v45 }
 0x26c   :  { %vm691_vm15 = vcmp.eq.s32.totalorder %v5247_v17, %v5539_v9  ;;  %vm690_vm10 = vcmp.eq.s32.totalorder %v5244_v13, %v5539_v9  ;;  %v646_v12 = vrot.slane %v5539_v9, %v5639_v2 }
 0x26d   :  { %3636 = vmatprep.mubr.msk.f32.mxu1 %vm691_vm15, %v7760_v57 }
 0x26e   :  { %3637 = vmatmul.mubr.msk.f32.gmra.mxu1 %vm690_vm10, %v7760_v57  ;;  %v648_v55 = vsel %vm7755_vm2, %v646_v12, %v641_v46 }
 0x280   :  { %v542_v1 = vpop.xlane.xlu1 %541 }
 0x281   :  { %4698 = vset.pattern.permute.xlu1 %v542_v1 }
 0x285   :  { %544 = vperm.xlu1 %4698, %v540_v16  }
 0x2d5   :  { %v4170_v43 = vpop.f32.mrf.mxu1 }
 0x2d7   :  { %v4171_v27 = vpop.f32.mrf.mxu1 }
 0x2d8   :  { %v4172_v9 = vadd.f32 %v4171_v27, %v4170_v43 }
 0x2d9   :  { %v4173_v23 = vpop.f32.mrf.mxu1 }
 0x2da   :  { %v5672_v6 = vsub.f32 %v4748_v5, %v4172_v9  ;;  %v4756_v9 = vld [vmem:[%s7745_s0 + $0x50] sm:$0xff] }
 0x2db   :  { %v4174_v26 = vpop.f32.mrf.mxu1 }
 0x2dc   :  { %v4175_v16 = vadd.f32 %v4174_v26, %v4173_v23  ;;  %v4749_v26 = vld [vmem:[%s7745_s0 + $0x18] sm:$0xff] }
 0x2dd   :  { %v4176_v28 = vpop.f32.mrf.mxu1 }
 0x2de   :  { %v5679_v21 = vsub.f32 %v4967_v33, %v4175_v16 }
 0x2df   :  { %v4177_v29 = vpop.f32.mrf.mxu1 }
 0x2e0   :  { %v4178_v42 = vadd.f32 %v4177_v29, %v4176_v28 }
 0x2e1   :  { %v4179_v30 = vpop.f32.mrf.mxu1 }
 0x2e2   :  { %v5686_v27 = vsub.f32 %v4976_v34, %v4178_v42  ;;  %v4758_v42 = vld [vmem:[%s7745_s0 + $0x60] sm:$0xff] }
 0x2e3   :  { %v4180_v31 = vpop.f32.mrf.mxu1  ;;  %v553_v19 = vpop.permute.xlu0 %552 }
 0x2e4   :  { %v660_v59 = vrot.slane %v553_v19, %v5654_v18  ;;  %vm695_vm14 = vcmp.eq.s32.totalorder %v5247_v17, %v553_v19  ;;  %v4181_v23 = vadd.f32 %v4180_v31, %v4179_v30  ;;  %v4750_v30 = vld [vmem:[%s7745_s0 + $0x20] sm:$0xff] }
 0x2e5   :  { %v5616_v36 = vpop.f32.mrf.mxu1 }
 0x2e6   :  { %v5695_v28 = vsub.f32 %v4749_v26, %v4181_v23 }
 0x2e7   :  { %v5620_v41 = vpop.f32.mrf.mxu1 }
 0x2e8   :  { %v4184_v29 = vadd.f32 %v5620_v41, %v5616_v36 }
 0x2e9   :  { %v5630_v52 = vpop.f32.mrf.mxu1 }
 0x2ea   :  { %v5706_v31 = vsub.f32 %v4750_v30, %v4184_v29  ;;  %v1261_v29 = vsub.s32 1, %v5050_v49 }
 0x2eb   :  { %v4186_v7 = vpop.f32.mrf.mxu1 }
 0x2ec   :  { %v4187_v37 = vadd.f32 %v4186_v7, %v5630_v52  ;;  %v4752_v52 = vld [vmem:[%s7745_s0 + $0x30] sm:$0xff] }
 0x2ee   :  { %v5716_v41 = vsub.f32 %v4751_v40, %v4187_v37  ;;  %v5801_v40 = vld [vmem:[%s7747_s2] sm:$0xff] }
 0x2ef   :  { %7805 = vst [vmem:[#allocation17_spill] sm:$0xff] %v5801_v40 }
 0x2f1   :  { %v4188_v38 = vpop.f32.mrf.mxu1 }
 0x2f3   :  { %v4189_v24 = vpop.f32.mrf.mxu1 }
 0x2f4   :  { %v4190_v44 = vadd.f32 %v4189_v24, %v4188_v38 }
 0x2f5   :  { %v4191_v1 = vpop.f32.mrf.mxu1 }
 0x2f6   :  { %v5725_v54 = vsub.f32 %v4752_v52, %v4190_v44  ;;  %v1262_v44 = vrot.slane %v5801_v40, %v1261_v29 }
 0x2f7   :  { %v4192_v20 = vpop.f32.mrf.mxu1 }
 0x2f8   :  { %v4193_v62 = vadd.f32 %v4192_v20, %v4191_v1  ;;  %v4757_v1 = vld [vmem:[%s7745_s0 + $0x58] sm:$0xff] }
 0x2f9   :  { %v4194_v43 = vpop.f32.mrf.mxu1 }
 0x2fa   :  { %v5734_v7 = vsub.f32 %v4753_v4, %v4193_v62  ;;  %v4761_v62 = vld [vmem:[%s7745_s0 + $0x70] sm:$0xff] }
 0x2fb   :  { %v4195_v33 = vpop.f32.mrf.mxu1 }
 0x2fc   :  { %v4196_v8 = vadd.f32 %v4195_v33, %v4194_v43  ;;  %v4759_v33 = vld [vmem:[%s7745_s0 + $0x68] sm:$0xff] }
 0x2fd   :  { %v4197_v34 = vpop.f32.mrf.mxu1 }
 0x2fe   :  { %v5743_v12 = vsub.f32 %v4754_v56, %v4196_v8 }
 0x2ff   :  { %v4198_v36 = vpop.f32.mrf.mxu1 }
 0x300   :  { %v545_v48 = vpop.permute.xlu1 %544  ;;  %v4199_v45 = vadd.f32 %v4198_v36, %v4197_v34  ;;  %v1265_v34 = vsub.s32 5, %v5050_v49 }
 0x301   :  { %v653_v25 = vrot.slane %v545_v48, %v5647_v39  ;;  %vm693_vm15 = vcmp.eq.s32.totalorder %v5247_v17, %v545_v48  ;;  %vm692_vm10 = vcmp.eq.s32.totalorder %v5244_v13, %v545_v48  ;;  %v4200_v50 = vpop.f32.mrf.mxu1  ;;  %v4755_v48 = vld [vmem:[%s7745_s0 + $0x48] sm:$0xff] }
 0x302   :  { %3638 = vmatprep.mubr.msk.f32.mxu1 %vm693_vm15, %v7760_v57  ;;  %vm694_vm15 = vcmp.eq.s32.totalorder %v5244_v13, %v553_v19  ;;  %v5752_v24 = vsub.f32 %v4755_v48, %v4199_v45 }
 0x303   :  { %v655_v60 = vsel %vm7754_vm3, %v653_v25, %v648_v55  ;;  %3639 = vmatmul.mubr.msk.f32.gmra.mxu1 %vm692_vm10, %v7760_v57  ;;  %v4201_v3 = vpop.f32.mrf.mxu1 }
 0x304   :  { %3640 = vmatprep.mubr.msk.f32.mxu1 %vm695_vm14, %v7760_v57  ;;  %v662_v0 = vsel %vm7753_vm1, %v660_v59, %v655_v60  ;;  %v4202_v25 = vadd.f32 %v4201_v3, %v4200_v50  ;;  %v1266_v50 = vrot.slane %v5801_v40, %v1265_v34 }
 0x305   :  { %663 = vst [vmem:[#allocation2] sm:$0x1] %v662_v0 }
 0x306   :  { %v5761_v59 = vsub.f32 %v4756_v9, %v4202_v25  ;;  %v5814_v56 = vrot.slane %v1266_v50, %v1261_v29 }
 0x307   :  { %3641 = vmatmul.mubr.msk.f32.gmra.mxu1 %vm694_vm15, %v7760_v57 }
 0x308   :  { %4250 = vmatprep.mubr.msk.f32.mxu1 %vm69_vm0, %v5672_v6  ;;  %7801 = vst [vmem:[#allocation13_spill] sm:$0xff] %v5761_v59 }
 0x309   :  { %v4203_v38 = vpop.f32.mrf.mxu1 }
 0x30b   :  { %4251 = vmatmul.mubr.msk.f32.vlgmr.msra.gmra.mxu1 %vm69_vm0, %v5672_v6  ;;  %v4204_v19 = vpop.f32.mrf.mxu1 }
 0x30c   :  { %4252 = vmatprep.mubr.msk.f32.mxu1 %vm69_vm0, %v5679_v21  ;;  %v4205_v60 = vadd.f32 %v4204_v19, %v4203_v38  ;;  %v5812_v38 = vrot.slane %v1262_v44, %v1261_v29  ;;  %v4762_v19 = vld [vmem:[%s7745_s0 + $0x78] sm:$0xff] }
 0x30e   :  { %v5770_v5 = vsub.f32 %v4757_v1, %v4205_v60 }
 0x30f   :  { %4253 = vmatmul.mubr.msk.f32.gmra.mxu1 %vm69_vm0, %v5679_v21 }
 0x310   :  { %4254 = vmatprep.mubr.msk.f32.mxu1 %vm69_vm0, %v5686_v27  ;;  %7802 = vst [vmem:[#allocation14_spill] sm:$0xff] %v5770_v5 }
 0x311   :  { %v4206_v46 = vpop.f32.mrf.mxu1 }
 0x313   :  { %4255 = vmatmul.mubr.msk.f32.gmra.mxu1 %vm69_vm0, %v5686_v27  ;;  %v4207_v55 = vpop.f32.mrf.mxu1 }
 0x314   :  { %4256 = vmatprep.mubr.msk.f32.mxu1 %vm69_vm0, %v5695_v28  ;;  %v4208_v16 = vadd.f32 %v4207_v55, %v4206_v46 }
 0x316   :  { %v5779_v43 = vsub.f32 %v4758_v42, %v4208_v16 }
 0x317   :  { %4257 = vmatmul.mubr.msk.f32.gmra.mxu1 %vm69_vm0, %v5695_v28 }
 0x318   :  { %4258 = vmatprep.mubr.msk.f32.mxu1 %vm69_vm0, %v5706_v31  ;;  %7803 = vst [vmem:[#allocation15_spill] sm:$0xff] %v5779_v43 }
 0x31b   :  { %4259 = vmatmul.mubr.msk.f32.gmra.mxu1 %vm69_vm0, %v5706_v31 }
 0x31c   :  { %4260 = vmatprep.mubr.msk.f32.mxu1 %vm69_vm0, %v5716_v41 }
 0x31f   :  { %4261 = vmatmul.mubr.msk.f32.gmra.mxu1 %vm69_vm0, %v5716_v41 }
 0x320   :  { %4262 = vmatprep.mubr.msk.f32.mxu1 %vm69_vm0, %v5725_v54 }
 0x323   :  { %4263 = vmatmul.mubr.msk.f32.gmra.mxu1 %vm69_vm0, %v5725_v54 }
 0x324   :  { %4264 = vmatprep.mubr.msk.f32.mxu1 %vm69_vm0, %v5734_v7 }
 0x327   :  { %4265 = vmatmul.mubr.msk.f32.gmra.mxu1 %vm69_vm0, %v5734_v7 }
 0x328   :  { %4266 = vmatprep.mubr.msk.f32.mxu1 %vm69_vm0, %v5743_v12 }
 0x32b   :  { %4267 = vmatmul.mubr.msk.f32.gmra.mxu1 %vm69_vm0, %v5743_v12 }
 0x32c   :  { %4268 = vmatprep.mubr.msk.f32.mxu1 %vm69_vm0, %v5752_v24 }
 0x32e   :  { %v4209_v0 = vpop.f32.mrf.mxu1 }
 0x32f   :  { %4269 = vmatmul.mubr.msk.f32.gmra.mxu1 %vm69_vm0, %v5752_v24 }
 0x330   :  { %4270 = vmatprep.mubr.msk.f32.mxu1 %vm69_vm0, %v5761_v59  ;;  %v4210_v20 = vpop.f32.mrf.mxu1 }
 0x331   :  { %v4211_v23 = vadd.f32 %v4210_v20, %v4209_v0 }
 0x333   :  { %4271 = vmatmul.mubr.msk.f32.gmra.mxu1 %vm69_vm0, %v5761_v59  ;;  %v5788_v26 = vsub.f32 %v4759_v33, %v4211_v23 }
 0x334   :  { %4272 = vmatprep.mubr.msk.f32.mxu1 %vm69_vm0, %v5770_v5 }
 0x335   :  { %7804 = vst [vmem:[#allocation16_spill] sm:$0xff] %v5788_v26 }
 0x337   :  { %4273 = vmatmul.mubr.msk.f32.gmra.mxu1 %vm69_vm0, %v5770_v5 }
 0x338   :  { %4274 = vmatprep.mubr.msk.f32.mxu1 %vm69_vm0, %v5779_v43 }
 0x33b   :  { %4275 = vmatmul.mubr.msk.f32.gmra.mxu1 %vm69_vm0, %v5779_v43 }
 0x33c   :  { %4276 = vmatprep.mubr.msk.f32.mxu1 %vm69_vm0, %v5788_v26 }
 0x33f   :  { %4277 = vmatmul.mubr.msk.f32.gmra.mxu1 %vm69_vm0, %v5788_v26 }
 0x3c3   :  { %v4212_v30 = vpop.f32.mrf.mxu1 }
 0x3c5   :  { %v4213_v37 = vpop.f32.mrf.mxu1 }
 0x3c6   :  { %v4214_v36 = vadd.f32 %v4213_v37, %v4212_v30 }
 0x3c7   :  { %v4215_v52 = vpop.f32.mrf.mxu1 }
 0x3c8   :  { %v5808_v3 = vsub.f32 %v4761_v62, %v4214_v36 }
 0x3c9   :  { %v4216_v4 = vpop.f32.mrf.mxu1 }
 0x3ca   :  { %7806 = vst [vmem:[#allocation18_spill] sm:$0xff] %v5808_v3  ;;  %v4217_v8 = vadd.f32 %v4216_v4, %v4215_v52  ;;  %4278 = vmatprep.mubr.msk.f32.mxu1 %vm69_vm0, %v5808_v3 }
 0x3cb   :  { %v1164_v45 = vpop.f32.mrf.mxu1  ;;  %4279 = vmatmul.mubr.msk.f32.gmra.mxu1 %vm69_vm0, %v5808_v3 }
 0x3cc   :  { %v5821_v46 = vsub.f32 %v4762_v19, %v4217_v8  ;;  %v5824_v25 = vsub.f32 %v5812_v38, %v1164_v45 }
 0x3cd   :  { %v1166_v48 = vpop.f32.mrf.mxu1 }
 0x3ce   :  { %7807 = vst [vmem:[#allocation19_spill] sm:$0xff] %v5821_v46  ;;  %v5827_v55 = vsub.f32 %v5814_v56, %v1166_v48  ;;  %4280 = vmatprep.mubr.msk.f32.mxu1 %vm69_vm0, %v5821_v46 }
 0x3cf   :  { %v1170_v9 = vpop.f32.mrf.mxu1  ;;  %4281 = vmatmul.mubr.msk.f32.gmra.mxu1 %vm69_vm0, %v5821_v46 }
 0x3d0   :  { %vm1309_vm14 = vcmp.le.f32.partialorder %v5824_v25, %v5827_v55  ;;  %v5841_v1 = vsub.f32 %v5812_v38, %v1170_v9 }
 0x3d1   :  { %v1172_v60 = vpop.f32.mrf.mxu1  ;;  %v1310_v0 = vsel %vm1309_vm14, %v5824_v25, %v5827_v55 }
 0x3d2   :  { %v5844_v16 = vsub.f32 %v5814_v56, %v1172_v60  ;;  %1312 = vmin.index.xlane.f32.xlu1 %v1310_v0 }
 0x3d3   :  { %v1176_v20 = vpop.f32.mrf.mxu1 }
 0x3d4   :  { %vm1317_vm10 = vcmp.le.f32.partialorder %v5841_v1, %v5844_v16  ;;  %v5854_v33 = vsub.f32 %v5812_v38, %v1176_v20 }
 0x3d5   :  { %v1178_v42 = vpop.f32.mrf.mxu1  ;;  %v1318_v23 = vsel %vm1317_vm10, %v5841_v1, %v5844_v16 }
 0x3d6   :  { %v5857_v29 = vsub.f32 %v5814_v56, %v1178_v42  ;;  %1320 = vmin.index.xlane.f32.xlu0 %v1318_v23 }
 0x3d7   :  { %v1182_v34 = vpop.f32.mrf.mxu1 }
 0x3d8   :  { %vm1325_vm15 = vcmp.le.f32.partialorder %v5854_v33, %v5857_v29  ;;  %v5867_v36 = vsub.f32 %v5812_v38, %v1182_v34 }
 0x3d9   :  { %v1184_v30 = vpop.f32.mrf.mxu1  ;;  %v1326_v37 = vsel %vm1325_vm15, %v5854_v33, %v5857_v29 }
 0x3da   :  { %v5870_v44 = vsub.f32 %v5814_v56, %v1184_v30  ;;  %1328 = vmin.index.xlane.f32.xlu0 %v1326_v37 }
 0x3db   :  { %v1188_v50 = vpop.f32.mrf.mxu1 }
 0x3dc   :  { %vm1333_vm1 = vcmp.le.f32.partialorder %v5867_v36, %v5870_v44  ;;  %v5880_v4 = vsub.f32 %v5812_v38, %v1188_v50 }
 0x3dd   :  { %v1190_v52 = vpop.f32.mrf.mxu1  ;;  %v1334_v62 = vsel %vm1333_vm1, %v5867_v36, %v5870_v44 }
 0x3de   :  { %v5883_v8 = vsub.f32 %v5814_v56, %v1190_v52  ;;  %1336 = vmin.index.xlane.f32.xlu1 %v1334_v62 }
 0x3df   :  { %v1194_v45 = vpop.f32.mrf.mxu1 }
 0x3e0   :  { %vm1341_vm3 = vcmp.le.f32.partialorder %v5880_v4, %v5883_v8  ;;  %v5893_v9 = vsub.f32 %v5812_v38, %v1194_v45 }
 0x3e1   :  { %v1196_v19 = vpop.f32.mrf.mxu1  ;;  %v1342_v48 = vsel %vm1341_vm3, %v5880_v4, %v5883_v8  ;;  %v1343_v1 = vsel %vm1341_vm3, %v5244_v13, %v5247_v17  ;;  %vm7810_vm3 = vcmask 261312  }
 0x3e2   :  { %v5896_v60 = vsub.f32 %v5814_v56, %v1196_v19  ;;  %1344 = vmin.index.xlane.f32.xlu0 %v1342_v48 }
 0x3e3   :  { %v1200_v0 = vpop.f32.mrf.mxu1 }
 0x3e4   :  { %vm1349_vm2 = vcmp.le.f32.partialorder %v5893_v9, %v5896_v60  ;;  %v5906_v23 = vsub.f32 %v5812_v38, %v1200_v0 }
 0x3e5   :  { %v1202_v20 = vpop.f32.mrf.mxu1  ;;  %v1350_v42 = vsel %vm1349_vm2, %v5893_v9, %v5896_v60 }
 0x3e6   :  { %v5909_v34 = vsub.f32 %v5814_v56, %v1202_v20  ;;  %1352 = vmin.index.xlane.f32.xlu1 %v1350_v42 }
 0x3e7   :  { %v1206_v30 = vpop.f32.mrf.mxu1 }
 0x3e8   :  { %vm1357_vm11 = vcmp.le.f32.partialorder %v5906_v23, %v5909_v34  ;;  %v5919_v52 = vsub.f32 %v5812_v38, %v1206_v30 }
 0x3e9   :  { %v1208_v37 = vpop.f32.mrf.mxu1  ;;  %v1358_v50 = vsel %vm1357_vm11, %v5906_v23, %v5909_v34  ;;  %v1359_v36 = vsel %vm1357_vm11, %v5244_v13, %v5247_v17  ;;  %vm7809_vm11 = vcmask 195712  }
 0x3ea   :  { %v5922_v62 = vsub.f32 %v5814_v56, %v1208_v37  ;;  %1360 = vmin.index.xlane.f32.xlu1 %v1358_v50 }
 0x3eb   :  { %v1212_v45 = vpop.f32.mrf.mxu1 }
 0x3ec   :  { %vm1365_vm4 = vcmp.le.f32.partialorder %v5919_v52, %v5922_v62  ;;  %v5932_v0 = vsub.f32 %v5812_v38, %v1212_v45 }
 0x3ed   :  { %v1214_v19 = vpop.f32.mrf.mxu1  ;;  %v1366_v48 = vsel %vm1365_vm4, %v5919_v52, %v5922_v62  ;;  %v1367_v25 = vsel %vm1365_vm4, %v5244_v13, %v5247_v17 }
 0x3ee   :  { %v5935_v20 = vsub.f32 %v5814_v56, %v1214_v19  ;;  %1368 = vmin.index.xlane.f32.xlu1 %v1366_v48 }
 0x3ef   :  { %v1218_v42 = vpop.f32.mrf.mxu1 }
 0x3f0   :  { %vm1373_vm9 = vcmp.le.f32.partialorder %v5932_v0, %v5935_v20  ;;  %v5945_v50 = vsub.f32 %v5812_v38, %v1218_v42 }
 0x3f1   :  { %v1220_v30 = vpop.f32.mrf.mxu1  ;;  %v1374_v37 = vsel %vm1373_vm9, %v5932_v0, %v5935_v20  ;;  %v1375_v4 = vsel %vm1373_vm9, %v5244_v13, %v5247_v17 }
 0x3f2   :  { %v5948_v45 = vsub.f32 %v5814_v56, %v1220_v30  ;;  %1376 = vmin.index.xlane.f32.xlu0 %v1374_v37 }
 0x3f3   :  { %v1224_v19 = vpop.f32.mrf.mxu1 }
 0x3f4   :  { %vm1381_vm8 = vcmp.le.f32.partialorder %v5945_v50, %v5948_v45  ;;  %v5958_v40 = vsub.f32 %v5812_v38, %v1224_v19 }
 0x3f5   :  { %v1226_v48 = vpop.f32.mrf.mxu1  ;;  %v1382_v57 = vsel %vm1381_vm8, %v5945_v50, %v5948_v45  ;;  %v1383_v29 = vsel %vm1381_vm8, %v5244_v13, %v5247_v17  ;;  %v3817_v50 = vld [vmem:[%s7746_s1 + $0x2f8] sm:$0xff]  ;;  %v3816_v45 = vld [vmem:[%s7746_s1 + $0x2f0] sm:$0xff] }
 0x3f6   :  { %v5961_v42 = vsub.f32 %v5814_v56, %v1226_v48  ;;  %1384 = vmin.index.xlane.f32.xlu0 %v1382_v57  ;;  %4362 = vmatprep.subr.msk.mxu1 %vm69_vm0, %v3817_v50 }
 0x3f7   :  { %v1230_v30 = vpop.f32.mrf.mxu1  ;;  %4426 = vmatprep.subr.mxu0 %v3817_v50 }
 0x3f8   :  { %vm1389_vm5 = vcmp.le.f32.partialorder %v5958_v40, %v5961_v42  ;;  %v1299_v46 = vsub.f32 %v5812_v38, %v1230_v30 }
 0x3f9   :  { %v1232_v37 = vpop.f32.mrf.mxu1  ;;  %v1390_v49 = vsel %vm1389_vm5, %v5958_v40, %v5961_v42  ;;  %v1391_v9 = vsel %vm1389_vm5, %v5244_v13, %v5247_v17  ;;  %v3801_v40 = vld [vmem:[%s7746_s1 + $0x278] sm:$0xff]  ;;  %v3800_v42 = vld [vmem:[%s7746_s1 + $0x270] sm:$0xff] }
 0x3fa   :  { %v1300_v19 = vsub.f32 %v5814_v56, %v1232_v37  ;;  %1392 = vmin.index.xlane.f32.xlu1 %v1390_v49  ;;  %4363 = vmatpush3.xpose.msk.msra.mxu1 %vm69_vm0, %v3801_v40 }
 0x3fb   :  { %v1236_v3 = vpop.f32.mrf.mxu1  ;;  %4364 = vmatprep.subr.msk.mxu1 %vm69_vm0, %v3816_v45 }
 0x3fc   :  { %vm1397_vm13 = vcmp.le.f32.partialorder %v1299_v46, %v1300_v19  ;;  %v5974_v26 = vsub.f32 %v5812_v38, %v1236_v3 }
 0x3fd   :  { %v1238_v48 = vpop.f32.mrf.mxu1  ;;  %v1398_v57 = vsel %vm1397_vm13, %v1299_v46, %v1300_v19  ;;  %v1399_v23 = vsel %vm1397_vm13, %v5244_v13, %v5247_v17  ;;  %v1311_v46 = vsel %vm1309_vm14, %v5244_v13, %v5247_v17  ;;  %vm7811_vm14 = vcmask 326912  }
 0x3fe   :  { %v5977_v43 = vsub.f32 %v5814_v56, %v1238_v48  ;;  %1400 = vmin.index.xlane.f32.xlu1 %v1398_v57  ;;  %4365 = vmatpush3.xpose.msk.msra.mxu1 %vm69_vm0, %v3800_v42 }
 0x3ff   :  { %v1242_v5 = vpop.f32.mrf.mxu1 }
 0x400   :  { %vm1405_vm12 = vcmp.le.f32.partialorder %v5974_v26, %v5977_v43  ;;  %v5987_v37 = vsub.f32 %v5812_v38, %v1242_v5  ;;  %v1319_v5 = vsel %vm1317_vm10, %v5244_v13, %v5247_v17 }
 0x401   :  { %v1244_v30 = vpop.f32.mrf.mxu1  ;;  %v1406_v49 = vsel %vm1405_vm12, %v5974_v26, %v5977_v43  ;;  %v1407_v52 = vsel %vm1405_vm12, %v5244_v13, %v5247_v17 }
 0x402   :  { %v5990_v3 = vsub.f32 %v5814_v56, %v1244_v30  ;;  %1408 = vmin.index.xlane.f32.xlu0 %v1406_v49 }
 0x404   :  { %vm1413_vm7 = vcmp.le.f32.partialorder %v5987_v37, %v5990_v3 }
 0x405   :  { %v1414_v48 = vsel %vm1413_vm7, %v5987_v37, %v5990_v3  ;;  %v1415_v55 = vsel %vm1413_vm7, %v5244_v13, %v5247_v17  ;;  %v3815_v37 = vld [vmem:[%s7746_s1 + $0x2e8] sm:$0xff] }
 0x406   :  { %1416 = vmin.index.xlane.f32.xlu1 %v1414_v48  ;;  %v1335_v48 = vsel %vm1333_vm1, %v5244_v13, %v5247_v17  ;;  %4366 = vmatprep.subr.msk.mxu1 %vm69_vm0, %v3815_v37 }
 0x45b   :  { %v1313_v57 = vpop.xlane.xlu1 %1312 }
 0x45c   :  { %4700 = vset.pattern.permute.xlu0 %v1313_v57 }
 0x45f   :  { %v1321_v59 = vpop.xlane.xlu0 %1320 }
 0x460   :  { %4701 = vset.pattern.permute.xlu1 %v1321_v59 }
 0x463   :  { %v1329_v49 = vpop.xlane.xlu0 %1328 }
 0x464   :  { %1323 = vperm.xlu1 %4701, %v1319_v5  }
 0x467   :  { %v1337_v30 = vpop.xlane.xlu1 %1336 }
 0x468   :  { %4703 = vset.pattern.permute.xlu1 %v1337_v30 }
 0x46b   :  { %v1345_v57 = vpop.xlane.xlu0 %1344 }
 0x46c   :  { %1339 = vperm.xlu1 %4703, %v1335_v48  }
 0x46f   :  { %v1353_v59 = vpop.xlane.xlu1 %1352 }
 0x470   :  { %4704 = vset.pattern.permute.xlu1 %v1345_v57 }
 0x473   :  { %v1361_v16 = vpop.xlane.xlu1 %1360 }
 0x474   :  { %1347 = vperm.xlu1 %4704, %v1343_v1  }
 0x477   :  { %v1369_v44 = vpop.xlane.xlu1 %1368 }
 0x478   :  { %4706 = vset.pattern.permute.xlu1 %v1361_v16 }
 0x47b   :  { %v1377_v5 = vpop.xlane.xlu0 %1376 }
 0x47c   :  { %1363 = vperm.xlu1 %4706, %v1359_v36  }
 0x47f   :  { %v1385_v33 = vpop.xlane.xlu0 %1384 }
 0x480   :  { %4708 = vset.pattern.permute.xlu1 %v1377_v5 }
 0x483   :  { %v1393_v30 = vpop.xlane.xlu1 %1392 }
 0x484   :  { %1379 = vperm.xlu1 %4708, %v1375_v4   ;;  %v1327_v4 = vsel %vm1325_vm15, %v5244_v13, %v5247_v17 }
 0x487   :  { %v1401_v8 = vpop.xlane.xlu1 %1400 }
 0x488   :  { %4711 = vset.pattern.permute.xlu1 %v1401_v8  ;;  %v3799_v8 = vld [vmem:[%s7746_s1 + $0x268] sm:$0xff] }
 0x489   :  { %4367 = vmatpush3.xpose.msk.msra.mxu1 %vm69_vm0, %v3799_v8 }
 0x48b   :  { %v1248_v48 = vpop.f32.mrf.mxu1  ;;  %v1409_v60 = vpop.xlane.xlu0 %1408 }
 0x48c   :  { %1403 = vperm.xlu1 %4711, %v1399_v23   ;;  %v1305_v57 = vsub.f32 %v5812_v38, %v1248_v48  ;;  %v3814_v23 = vld [vmem:[%s7746_s1 + $0x2e0] sm:$0xff] }
 0x48d   :  { %v1250_v34 = vpop.f32.mrf.mxu1  ;;  %4368 = vmatprep.subr.msk.mxu1 %vm69_vm0, %v3814_v23 }
 0x48e   :  { %v1306_v1 = vsub.f32 %v5814_v56, %v1250_v34 }
 0x48f   :  { %v1417_v16 = vpop.xlane.xlu1 %1416  ;;  %v1254_v20 = vpop.f32.mrf.mxu1 }
 0x490   :  { %vm1421_vm1 = vcmp.le.f32.partialorder %v1305_v57, %v1306_v1  ;;  %4713 = vset.pattern.permute.xlu1 %v1417_v16  ;;  %v6039_v5 = vsub.f32 %v5812_v38, %v1254_v20  ;;  %v1351_v38 = vsel %vm1349_vm2, %v5244_v13, %v5247_v17 }
 0x491   :  { %v1422_v0 = vsel %vm1421_vm1, %v1305_v57, %v1306_v1  ;;  %v1256_v36 = vpop.f32.mrf.mxu1  ;;  %v1423_v43 = vsel %vm1421_vm1, %v5244_v13, %v5247_v17 }
 0x492   :  { %1424 = vmin.index.xlane.f32.xlu0 %v1422_v0  ;;  %v6036_v19 = vsub.f32 %v5814_v56, %v1256_v36 }
 0x494   :  { %vm1429_vm13 = vcmp.le.f32.partialorder %v6039_v5, %v6036_v19 }
 0x495   :  { %v1430_v56 = vsel %vm1429_vm13, %v6039_v5, %v6036_v19  ;;  %v3812_v19 = vld [vmem:[%s7746_s1 + $0x2d0] sm:$0xff] }
 0x4a8   :  { %1315 = vperm.xlu0 %4700, %v1311_v46  }
 0x4ac   :  { %4702 = vset.pattern.permute.xlu0 %v1329_v49 }
 0x4b0   :  { %1331 = vperm.xlu0 %4702, %v1327_v4   ;;  %1432 = vmin.index.xlane.f32.xlu1 %v1430_v56 }
 0x4b4   :  { %4705 = vset.pattern.permute.xlu0 %v1353_v59 }
 0x4b8   :  { %1355 = vperm.xlu0 %4705, %v1351_v38  }
 0x4bc   :  { %4707 = vset.pattern.permute.xlu0 %v1369_v44 }
 0x4c0   :  { %1371 = vperm.xlu0 %4707, %v1367_v25  }
 0x4c1   :  { %1419 = vperm.xlu1 %4713, %v1415_v55  }
 0x4c4   :  { %4709 = vset.pattern.permute.xlu0 %v1385_v33 }
 0x4c8   :  { %1387 = vperm.xlu0 %4709, %v1383_v29  }
 0x4cc   :  { %4710 = vset.pattern.permute.xlu0 %v1393_v30  ;;  %v7808_v30 = vmov 1.0  }
 0x4d0   :  { %1395 = vperm.xlu0 %4710, %v1391_v9  }
 0x4d4   :  { %4712 = vset.pattern.permute.xlu0 %v1409_v60 }
 0x4d8   :  { %1411 = vperm.xlu0 %4712, %v1407_v52  }
 0x4df   :  { %v1324_v26 = vpop.permute.xlu1 %1323 }
 0x4e0   :  { %v1444_v49 = vrot.slane %v1324_v26, %v5370_v58  ;;  %vm1520_vm5 = vcmp.eq.s32.totalorder %v5247_v17, %v1324_v26  ;;  %vm1519_vm8 = vcmp.eq.s32.totalorder %v5244_v13, %v1324_v26  ;;  %v3797_v26 = vld [vmem:[%s7746_s1 + $0x258] sm:$0xff] }
 0x4e7   :  { %v1340_v44 = vpop.permute.xlu1 %1339 }
 0x4e8   :  { %v1454_v16 = vrot.slane %v1340_v44, %v5398_v14  ;;  %vm1524_vm2 = vcmp.eq.s32.totalorder %v5247_v17, %v1340_v44  ;;  %vm1523_vm10 = vcmp.eq.s32.totalorder %v5244_v13, %v1340_v44  ;;  %v3795_v44 = vld [vmem:[%s7746_s1 + $0x248] sm:$0xff] }
 0x4ef   :  { %v1348_v34 = vpop.permute.xlu1 %1347 }
 0x4f0   :  { %v1459_v20 = vrot.slane %v1348_v34, %v5406_v22  ;;  %vm1526_vm15 = vcmp.eq.s32.totalorder %v5247_v17, %v1348_v34  ;;  %vm1525_vm1 = vcmp.eq.s32.totalorder %v5244_v13, %v1348_v34  ;;  %v3809_v34 = vld [vmem:[%s7746_s1 + $0x2b8] sm:$0xff] }
 0x4f7   :  { %v1364_v0 = vpop.permute.xlu1 %1363 }
 0x4f8   :  { %v1469_v55 = vrot.slane %v1364_v0, %v5429_v11 }
 0x4ff   :  { %v1380_v56 = vpop.permute.xlu1 %1379 }
 0x507   :  { %v6143_v33 = vpop.permute.xlu1 %1403 }
 0x51b   :  { %v1425_v62 = vpop.xlane.xlu0 %1424 }
 0x51c   :  { %4714 = vset.pattern.permute.xlu1 %v1425_v62  ;;  %v3798_v62 = vld [vmem:[%s7746_s1 + $0x260] sm:$0xff] }
 0x51d   :  { %4369 = vmatpush3.xpose.msk.msra.mxu1 %vm69_vm0, %v3798_v62 }
 0x520   :  { %1427 = vperm.xlu1 %4714, %v1423_v43   ;;  %v3813_v43 = vld [vmem:[%s7746_s1 + $0x2d8] sm:$0xff] }
 0x521   :  { %4370 = vmatprep.subr.msk.mxu1 %vm69_vm0, %v3813_v43 }
 0x522   :  { %4371 = vmatpush3.xpose.msk.msra.mxu1 %vm69_vm0, %v3797_v26 }
 0x523   :  { %v1316_v3 = vpop.permute.xlu0 %1315  ;;  %4372 = vmatprep.subr.msk.mxu1 %vm69_vm0, %v3812_v19 }
 0x524   :  { %v1440_v59 = vrot.slane %v1316_v3, %v5375_v61  ;;  %vm1517_vm7 = vcmp.eq.s32.totalorder %v5244_v13, %v1316_v3  ;;  %vm1518_vm12 = vcmp.eq.s32.totalorder %v5247_v17, %v1316_v3  ;;  %v3811_v3 = vld [vmem:[%s7746_s1 + $0x2c8] sm:$0xff] }
 0x525   :  { %3754 = vmatprep.mubr.msk.f32.mxu0 %vm1518_vm12, %v7808_v30 }
 0x526   :  { %v1445_v48 = vsel %vm563_vm6, %v1444_v49, %v1440_v59  ;;  %3755 = vmatmul.mubr.msk.f32.vlgmr.msra.gmra.mxu0 %vm1517_vm7, %v7808_v30  ;;  %vm7812_vm7 = vcmask 392512  }
 0x527   :  { %3756 = vmatprep.mubr.msk.f32.mxu0 %vm1520_vm5, %v7808_v30  ;;  %4427 = vmatpush3.msra.mxu0 %v3801_v40  ;;  %vm7813_vm5 = vcmask 458112   ;;  %v1479_v40 = vrot.slane %v1380_v56, %v5449_v32 }
 0x528   :  { %4428 = vmatprep.subr.mxu0 %v3816_v45  ;;  %v1431_v45 = vsel %vm1429_vm13, %v5244_v13, %v5247_v17  ;;  %vm7815_vm13 = vcmask 589312  }
 0x529   :  { %4429 = vmatpush3.msra.mxu0 %v3800_v42 }
 0x52a   :  { %3757 = vmatmul.mubr.msk.f32.gmra.mxu0 %vm1519_vm8, %v7808_v30  ;;  %4430 = vmatprep.subr.mxu0 %v3815_v37  ;;  %v3796_v37 = vld [vmem:[%s7746_s1 + $0x250] sm:$0xff] }
 0x52b   :  { %v1332_v57 = vpop.permute.xlu0 %1331  ;;  %4431 = vmatpush3.msra.mxu0 %v3799_v8  ;;  %4373 = vmatpush3.xpose.msk.msra.mxu1 %vm69_vm0, %v3796_v37  ;;  %v3810_v8 = vld [vmem:[%s7746_s1 + $0x2c0] sm:$0xff] }
 0x52c   :  { %v1449_v1 = vrot.slane %v1332_v57, %v5381_v63  ;;  %vm1522_vm9 = vcmp.eq.s32.totalorder %v5247_v17, %v1332_v57  ;;  %vm1521_vm4 = vcmp.eq.s32.totalorder %v5244_v13, %v1332_v57  ;;  %4432 = vmatprep.subr.mxu0 %v3814_v23  ;;  %4374 = vmatprep.subr.msk.mxu1 %vm69_vm0, %v3811_v3  ;;  %v3794_v23 = vld [vmem:[%s7746_s1 + $0x240] sm:$0xff]  ;;  %v3793_v57 = vld [vmem:[%s7746_s1 + $0x238] sm:$0xff] }
 0x52d   :  { %3758 = vmatprep.mubr.msk.f32.mxu0 %vm1522_vm9, %v7808_v30  ;;  %vm1530_vm9 = vcmp.eq.s32.totalorder %v5247_v17, %v1364_v0  ;;  %4433 = vmatpush3.msra.mxu0 %v3798_v62  ;;  %v3788_v62 = vld [vmem:[%s7746_s1 + $0x210] sm:$0xff] }
 0x52e   :  { %v1450_v36 = vsel %vm7809_vm11, %v1449_v1, %v1445_v48  ;;  %3759 = vmatmul.mubr.msk.f32.gmra.mxu0 %vm1521_vm4, %v7808_v30  ;;  %vm1529_vm4 = vcmp.eq.s32.totalorder %v5244_v13, %v1364_v0  ;;  %vm7814_vm11 = vcmask 523712   ;;  %4434 = vmatprep.subr.mxu0 %v3813_v43  ;;  %v3808_v1 = vld [vmem:[%s7746_s1 + $0x2b0] sm:$0xff]  ;;  %v3786_v43 = vld [vmem:[%s7746_s1 + $0x200] sm:$0xff] }
 0x52f   :  { %v1455_v46 = vsel %vm7810_vm3, %v1454_v16, %v1450_v36  ;;  %3760 = vmatprep.mubr.msk.f32.mxu0 %vm1524_vm2, %v7808_v30  ;;  %4435 = vmatpush3.msra.mxu0 %v3797_v26  ;;  %v3792_v16 = vld [vmem:[%s7746_s1 + $0x230] sm:$0xff] }
 0x530   :  { %v1460_v4 = vsel %vm7811_vm14, %v1459_v20, %v1455_v46  ;;  %vm1534_vm14 = vcmp.eq.s32.totalorder %v5247_v17, %v1380_v56  ;;  %4436 = vmatprep.subr.mxu0 %v3812_v19  ;;  %4375 = vmatpush3.xpose.msk.msra.mxu1 %vm69_vm0, %v3795_v44  ;;  %v3807_v20 = vld [vmem:[%s7746_s1 + $0x2a8] sm:$0xff]  ;;  %v1494_v46 = vrot.slane %v6143_v33, %v5628_v51 }
 0x531   :  { %4437 = vmatpush3.msra.mxu0 %v3796_v37  ;;  %4376 = vmatprep.subr.msk.mxu1 %vm69_vm0, %v3810_v8 }
 0x532   :  { %3761 = vmatmul.mubr.msk.f32.gmra.mxu0 %vm1523_vm10, %v7808_v30  ;;  %4438 = vmatprep.subr.mxu0 %v3811_v3  ;;  %vm1533_vm10 = vcmp.eq.s32.totalorder %v5244_v13, %v1380_v56  ;;  %v3791_v56 = vld [vmem:[%s7746_s1 + $0x228] sm:$0xff] }
 0x533   :  { %3762 = vmatprep.mubr.msk.f32.mxu0 %vm1526_vm15, %v7808_v30  ;;  %v1356_v38 = vpop.permute.xlu0 %1355  ;;  %4439 = vmatpush3.msra.mxu0 %v3795_v44  ;;  %vm7816_vm15 = vcmask 654912  }
 0x534   :  { %v1464_v25 = vrot.slane %v1356_v38, %v5424_v10  ;;  %vm1528_vm12 = vcmp.eq.s32.totalorder %v5247_v17, %v1356_v38  ;;  %vm1527_vm8 = vcmp.eq.s32.totalorder %v5244_v13, %v1356_v38  ;;  %4440 = vmatprep.subr.mxu0 %v3810_v8  ;;  %4377 = vmatpush3.xpose.msk.msra.mxu1 %vm69_vm0, %v3794_v23 }
 0x535   :  { %4441 = vmatpush3.msra.mxu0 %v3794_v23  ;;  %4378 = vmatprep.subr.msk.mxu1 %vm69_vm0, %v3809_v34 }
 0x536   :  { %v1465_v29 = vsel %vm7812_vm7, %v1464_v25, %v1460_v4  ;;  %3763 = vmatmul.mubr.msk.f32.gmra.mxu0 %vm1525_vm1, %v7808_v30  ;;  %4442 = vmatprep.subr.mxu0 %v3809_v34  ;;  %v3806_v25 = vld [vmem:[%s7746_s1 + $0x2a0] sm:$0xff] }
 0x537   :  { %3764 = vmatprep.mubr.msk.f32.mxu0 %vm1528_vm12, %v7808_v30  ;;  %v1470_v9 = vsel %vm7813_vm5, %v1469_v55, %v1465_v29  ;;  %4443 = vmatpush3.msra.mxu0 %v3793_v57  ;;  %v3790_v55 = vld [vmem:[%s7746_s1 + $0x220] sm:$0xff]  ;;  %v3805_v29 = vld [vmem:[%s7746_s1 + $0x298] sm:$0xff] }
 0x538   :  { %4444 = vmatprep.subr.mxu0 %v3808_v1  ;;  %4379 = vmatpush3.xpose.msk.msra.mxu1 %vm69_vm0, %v3793_v57 }
 0x539   :  { %v1433_v60 = vpop.xlane.xlu1 %1432  ;;  %4445 = vmatpush3.msra.mxu0 %v3792_v16  ;;  %4380 = vmatprep.subr.msk.mxu1 %vm69_vm0, %v3808_v1 }
 0x53a   :  { %3765 = vmatmul.mubr.msk.f32.gmra.mxu0 %vm1527_vm8, %v7808_v30  ;;  %4715 = vset.pattern.permute.xlu1 %v1433_v60  ;;  %vm7817_vm8 = vcmask 720512  }
 0x53b   :  { %3766 = vmatprep.mubr.msk.f32.mxu0 %vm1530_vm9, %v7808_v30  ;;  %v1372_v52 = vpop.permute.xlu0 %1371  ;;  %4446 = vmatprep.subr.mxu0 %v3807_v20  ;;  %vm1540_vm9 = vcmp.eq.s32.totalorder %v5247_v17, %v6143_v33 }
 0x53c   :  { %v1474_v50 = vrot.slane %v1372_v52, %v5432_v15  ;;  %vm1532_vm2 = vcmp.eq.s32.totalorder %v5247_v17, %v1372_v52  ;;  %vm1531_vm3 = vcmp.eq.s32.totalorder %v5244_v13, %v1372_v52  ;;  %4447 = vmatpush3.msra.mxu0 %v3791_v56  ;;  %4381 = vmatpush3.xpose.msk.msra.mxu1 %vm69_vm0, %v3792_v16 }
 0x53d   :  { %4448 = vmatprep.subr.mxu0 %v3806_v25  ;;  %v1420_v60 = vpop.permute.xlu1 %1419  ;;  %4382 = vmatprep.subr.msk.mxu1 %vm69_vm0, %v3807_v20 }
 0x53e   :  { %v1475_v42 = vsel %vm7814_vm11, %v1474_v50, %v1470_v9  ;;  %3767 = vmatmul.mubr.msk.f32.gmra.mxu0 %vm1529_vm4, %v7808_v30  ;;  %1435 = vperm.xlu1 %4715, %v1431_v45   ;;  %vm7818_vm4 = vcmask 786112   ;;  %vm1539_vm11 = vcmp.eq.s32.totalorder %v5244_v13, %v6143_v33  ;;  %v3789_v9 = vld [vmem:[%s7746_s1 + $0x218] sm:$0xff]  ;;  %v3804_v33 = vld [vmem:[%s7746_s1 + $0x290] sm:$0xff]  ;;  %v3803_v50 = vld [vmem:[%s7746_s1 + $0x288] sm:$0xff]  ;;  %v1504_v37 = vrot.slane %v1420_v60, %v5639_v2 }
 0x53f   :  { %3768 = vmatprep.mubr.msk.f32.mxu0 %vm1532_vm2, %v7808_v30  ;;  %v1480_v5 = vsel %vm7815_vm13, %v1479_v40, %v1475_v42  ;;  %4449 = vmatpush3.msra.mxu0 %v3790_v55  ;;  %v3787_v40 = vld [vmem:[%s7746_s1 + $0x208] sm:$0xff]  ;;  %v3802_v45 = vld [vmem:[%s7746_s1 + $0x280] sm:$0xff] }
 0x540   :  { %4450 = vmatprep.subr.mxu0 %v3805_v29  ;;  %4383 = vmatpush3.xpose.msk.msra.mxu1 %vm69_vm0, %v3791_v56 }
 0x541   :  { %4451 = vmatpush3.msra.mxu0 %v3789_v9  ;;  %4384 = vmatprep.subr.msk.mxu1 %vm69_vm0, %v3806_v25 }
 0x542   :  { %3769 = vmatmul.mubr.msk.f32.gmra.mxu0 %vm1531_vm3, %v7808_v30  ;;  %4452 = vmatprep.subr.mxu0 %v3804_v33  ;;  %vm1544_vm3 = vcmp.eq.s32.totalorder %v5247_v17, %v1420_v60 }
 0x543   :  { %3770 = vmatprep.mubr.msk.f32.mxu0 %vm1534_vm14, %v7808_v30  ;;  %v1388_v49 = vpop.permute.xlu0 %1387  ;;  %4453 = vmatpush3.msra.mxu0 %v3788_v62  ;;  %vm1543_vm14 = vcmp.eq.s32.totalorder %v5244_v13, %v1420_v60 }
 0x544   :  { %v1484_v59 = vrot.slane %v1388_v49, %v5452_v35  ;;  %vm1536_vm1 = vcmp.eq.s32.totalorder %v5247_v17, %v1388_v49  ;;  %vm1535_vm7 = vcmp.eq.s32.totalorder %v5244_v13, %v1388_v49  ;;  %4454 = vmatprep.subr.mxu0 %v3803_v50  ;;  %4385 = vmatpush3.xpose.msk.msra.mxu1 %vm69_vm0, %v3790_v55 }
 0x545   :  { %4386 = vmatprep.subr.msk.mxu1 %vm69_vm0, %v3805_v29  ;;  %4455 = vmatpush3.msra.mxu0 %v3787_v40 }
 0x546   :  { %v1485_v48 = vsel %vm7816_vm15, %v1484_v59, %v1480_v5  ;;  %3771 = vmatmul.mubr.msk.f32.gmra.mxu0 %vm1533_vm10, %v7808_v30  ;;  %4456 = vmatprep.subr.mxu0 %v3802_v45 }
 0x547   :  { %3772 = vmatprep.mubr.msk.f32.mxu0 %vm1536_vm1, %v7808_v30  ;;  %4457 = vmatpush3.msra.mxu0 %v3786_v43  ;;  %vm7819_vm1 = vcmask 851712  }
 0x548   :  { %4387 = vmatpush3.xpose.msk.msra.mxu1 %vm69_vm0, %v3789_v9 }
 0x549   :  { %4388 = vmatprep.subr.msk.mxu1 %vm69_vm0, %v3804_v33 }
 0x54a   :  { %3773 = vmatmul.mubr.msk.f32.gmra.mxu0 %vm1535_vm7, %v7808_v30  ;;  %vm7820_vm7 = vcmask 917312  }
 0x54b   :  { %v1396_v0 = vpop.permute.xlu0 %1395 }
 0x54c   :  { %v1489_v36 = vrot.slane %v1396_v0, %v5624_v47  ;;  %vm1538_vm12 = vcmp.eq.s32.totalorder %v5247_v17, %v1396_v0  ;;  %vm1537_vm5 = vcmp.eq.s32.totalorder %v5244_v13, %v1396_v0  ;;  %4389 = vmatpush3.xpose.msk.msra.mxu1 %vm69_vm0, %v3788_v62 }
 0x54d   :  { %3774 = vmatprep.mubr.msk.f32.mxu0 %vm1538_vm12, %v7808_v30  ;;  %4390 = vmatprep.subr.msk.mxu1 %vm69_vm0, %v3803_v50 }
 0x54e   :  { %v1490_v4 = vsel %vm7817_vm8, %v1489_v36, %v1485_v48  ;;  %3775 = vmatmul.mubr.msk.f32.gmra.mxu0 %vm1537_vm5, %v7808_v30  ;;  %vm7821_vm8 = vcmask 982912  }
 0x54f   :  { %3776 = vmatprep.mubr.msk.f32.mxu0 %vm1540_vm9, %v7808_v30  ;;  %v1495_v38 = vsel %vm7818_vm4, %v1494_v46, %v1490_v4  ;;  %vm7822_vm9 = vcmask 1048512  }
 0x550   :  { %4391 = vmatpush3.xpose.msk.msra.mxu1 %vm69_vm0, %v3787_v40 }
 0x551   :  { %4392 = vmatprep.subr.msk.mxu1 %vm69_vm0, %v3802_v45 }
 0x552   :  { %3777 = vmatmul.mubr.msk.f32.gmra.mxu0 %vm1539_vm11, %v7808_v30 }
 0x553   :  { %v1412_v52 = vpop.permute.xlu0 %1411 }
 0x554   :  { %vm1542_vm2 = vcmp.eq.s32.totalorder %v5247_v17, %v1412_v52  ;;  %vm1541_vm13 = vcmp.eq.s32.totalorder %v5244_v13, %v1412_v52  ;;  %4393 = vmatpush3.xpose.msk.msra.mxu1 %vm69_vm0, %v3786_v43  ;;  %v1499_v42 = vrot.slane %v1412_v52, %v5633_v53 }
 0x555   :  { %3778 = vmatprep.mubr.msk.f32.mxu0 %vm1542_vm2, %v7808_v30 }
 0x556   :  { %3779 = vmatmul.mubr.msk.f32.gmra.mxu0 %vm1541_vm13, %v7808_v30  ;;  %v1500_v19 = vsel %vm7819_vm1, %v1499_v42, %v1495_v38 }
 0x557   :  { %3780 = vmatprep.mubr.msk.f32.mxu0 %vm1544_vm3, %v7808_v30  ;;  %v1505_v49 = vsel %vm7820_vm7, %v1504_v37, %v1500_v19 }
 0x55a   :  { %3781 = vmatmul.mubr.msk.f32.gmra.mxu0 %vm1543_vm14, %v7808_v30 }
 0x59b   :  { %v1428_v26 = vpop.permute.xlu1 %1427 }
 0x59c   :  { %vm1546_vm10 = vcmp.eq.s32.totalorder %v5247_v17, %v1428_v26  ;;  %vm1545_vm15 = vcmp.eq.s32.totalorder %v5244_v13, %v1428_v26  ;;  %v1509_v5 = vrot.slane %v1428_v26, %v5647_v39 }
 0x59d   :  { %3782 = vmatprep.mubr.msk.f32.mxu0 %vm1546_vm10, %v7808_v30 }
 0x59e   :  { %3783 = vmatmul.mubr.msk.f32.gmra.mxu0 %vm1545_vm15, %v7808_v30  ;;  %v1510_v44 = vsel %vm7821_vm8, %v1509_v5, %v1505_v49 }
 0x5b9   :  { %v1436_v3 = vpop.permute.xlu1 %1435 }
 0x5ba   :  { %v1514_v59 = vrot.slane %v1436_v3, %v5654_v18  ;;  %vm1548_vm12 = vcmp.eq.s32.totalorder %v5247_v17, %v1436_v3  ;;  %vm1547_vm5 = vcmp.eq.s32.totalorder %v5244_v13, %v1436_v3 }
 0x5bb   :  { %3784 = vmatprep.mubr.msk.f32.mxu0 %vm1548_vm12, %v7808_v30 }
 0x5bc   :  { %v1515_v8 = vsel %vm7822_vm9, %v1514_v59, %v1510_v44  ;;  %3785 = vmatmul.mubr.msk.f32.gmra.mxu0 %vm1547_vm5, %v7808_v30 }
 0x5bd   :  { %1516 = vst [vmem:[#allocation2 + $0x1] sm:$0x1] %v1515_v8 }
 0x5e6   :  { %v4314_v48 = vpop.f32.mrf.mxu0 }
 0x5e8   :  { %v4315_v23 = vpop.f32.mrf.mxu0 }
 0x5e9   :  { %v4316_v34 = vadd.f32 %v4315_v23, %v4314_v48 }
 0x5ea   :  { %v4317_v57 = vpop.f32.mrf.mxu0 }
 0x5eb   :  { %v6320_v1 = vsub.f32 %v5672_v6, %v4316_v34 }
 0x5ec   :  { %v4318_v16 = vpop.f32.mrf.mxu0 }
 0x5ed   :  { %v4319_v0 = vadd.f32 %v4318_v16, %v4317_v57  ;;  %4394 = vmatprep.mubr.msk.f32.mxu1 %vm69_vm0, %v6320_v1 }
 0x5ee   :  { %v4320_v20 = vpop.f32.mrf.mxu0  ;;  %4395 = vmatmul.mubr.msk.f32.vlgmr.msra.gmra.mxu1 %vm69_vm0, %v6320_v1 }
 0x5ef   :  { %v6327_v36 = vsub.f32 %v5679_v21, %v4319_v0 }
 0x5f0   :  { %v4321_v46 = vpop.f32.mrf.mxu0 }
 0x5f1   :  { %v4322_v4 = vadd.f32 %v4321_v46, %v4320_v20  ;;  %4396 = vmatprep.mubr.msk.f32.mxu1 %vm69_vm0, %v6327_v36 }
 0x5f2   :  { %v4323_v56 = vpop.f32.mrf.mxu0  ;;  %4397 = vmatmul.mubr.msk.f32.gmra.mxu1 %vm69_vm0, %v6327_v36 }
 0x5f3   :  { %v6334_v6 = vsub.f32 %v5686_v27, %v4322_v4 }
 0x5f4   :  { %v4324_v38 = vpop.f32.mrf.mxu0 }
 0x5f5   :  { %v4325_v25 = vadd.f32 %v4324_v38, %v4323_v56  ;;  %4398 = vmatprep.mubr.msk.f32.mxu1 %vm69_vm0, %v6334_v6  ;;  %v7830_v56 = vld [vmem:[#allocation15_spill] sm:$0xff] }
 0x5f6   :  { %v4326_v55 = vpop.f32.mrf.mxu0  ;;  %4399 = vmatmul.mubr.msk.f32.gmra.mxu1 %vm69_vm0, %v6334_v6 }
 0x5f7   :  { %v6341_v21 = vsub.f32 %v5695_v28, %v4325_v25 }
 0x5f8   :  { %v4327_v29 = vpop.f32.mrf.mxu0 }
 0x5f9   :  { %v4328_v9 = vadd.f32 %v4327_v29, %v4326_v55  ;;  %4400 = vmatprep.mubr.msk.f32.mxu1 %vm69_vm0, %v6341_v21  ;;  %v7832_v29 = vld [vmem:[#allocation16_spill] sm:$0xff] }
 0x5fa   :  { %v4329_v60 = vpop.f32.mrf.mxu0  ;;  %4401 = vmatmul.mubr.msk.f32.gmra.mxu1 %vm69_vm0, %v6341_v21 }
 0x5fb   :  { %v6348_v27 = vsub.f32 %v5706_v31, %v4328_v9 }
 0x5fc   :  { %v4330_v52 = vpop.f32.mrf.mxu0 }
 0x5fd   :  { %v4331_v33 = vadd.f32 %v4330_v52, %v4329_v60  ;;  %4402 = vmatprep.mubr.msk.f32.mxu1 %vm69_vm0, %v6348_v27 }
 0x5fe   :  { %v4332_v62 = vpop.f32.mrf.mxu0  ;;  %4403 = vmatmul.mubr.msk.f32.gmra.mxu1 %vm69_vm0, %v6348_v27 }
 0x5ff   :  { %v6355_v28 = vsub.f32 %v5716_v41, %v4331_v33 }
 0x600   :  { %v4333_v50 = vpop.f32.mrf.mxu0 }
 0x601   :  { %v4334_v40 = vadd.f32 %v4333_v50, %v4332_v62  ;;  %4404 = vmatprep.mubr.msk.f32.mxu1 %vm69_vm0, %v6355_v28  ;;  %v7834_v62 = vld [vmem:[#allocation18_spill] sm:$0xff] }
 0x602   :  { %v4335_v45 = vpop.f32.mrf.mxu0  ;;  %4405 = vmatmul.mubr.msk.f32.gmra.mxu1 %vm69_vm0, %v6355_v28 }
 0x603   :  { %v6362_v31 = vsub.f32 %v5725_v54, %v4334_v40 }
 0x604   :  { %v4336_v43 = vpop.f32.mrf.mxu0 }
 0x605   :  { %v4337_v26 = vadd.f32 %v4336_v43, %v4335_v45  ;;  %4406 = vmatprep.mubr.msk.f32.mxu1 %vm69_vm0, %v6362_v31 }
 0x606   :  { %v4338_v42 = vpop.f32.mrf.mxu0  ;;  %4407 = vmatmul.mubr.msk.f32.gmra.mxu1 %vm69_vm0, %v6362_v31 }
 0x607   :  { %v6369_v41 = vsub.f32 %v5734_v7, %v4337_v26  ;;  %v7836_v26 = vld [vmem:[#allocation19_spill] sm:$0xff] }
 0x608   :  { %v4339_v19 = vpop.f32.mrf.mxu0 }
 0x609   :  { %7823 = vst [vmem:[#allocation20_spill] sm:$0xff] %v6369_v41  ;;  %v4340_v5 = vadd.f32 %v4339_v19, %v4338_v42  ;;  %4408 = vmatprep.mubr.msk.f32.mxu1 %vm69_vm0, %v6369_v41  ;;  %v7838_v19 = vld [vmem:[#allocation5_spill] sm:$0xff] }
 0x60a   :  { %v4341_v37 = vpop.f32.mrf.mxu0  ;;  %4409 = vmatmul.mubr.msk.f32.gmra.mxu1 %vm69_vm0, %v6369_v41 }
 0x60b   :  { %v6376_v54 = vsub.f32 %v5743_v12, %v4340_v5  ;;  %v7826_v12 = vld [vmem:[#allocation13_spill] sm:$0xff]  ;;  %v2114_v5 = vsub.s32 2, %v7838_v19 }
 0x60c   :  { %v4342_v3 = vpop.f32.mrf.mxu0 }
 0x60d   :  { %7824 = vst [vmem:[#allocation21_spill] sm:$0xff] %v6376_v54  ;;  %v4343_v49 = vadd.f32 %v4342_v3, %v4341_v37  ;;  %4410 = vmatprep.mubr.msk.f32.mxu1 %vm69_vm0, %v6376_v54  ;;  %v2118_v37 = vsub.s32 6, %v7838_v19  ;;  %v7839_v3 = vld [vmem:[#allocation17_spill] sm:$0xff] }
 0x60e   :  { %v4344_v59 = vpop.f32.mrf.mxu0  ;;  %4411 = vmatmul.mubr.msk.f32.gmra.mxu1 %vm69_vm0, %v6376_v54 }
 0x60f   :  { %v6383_v7 = vsub.f32 %v5752_v24, %v4343_v49  ;;  %v7828_v24 = vld [vmem:[#allocation14_spill] sm:$0xff]  ;;  %v2115_v49 = vrot.slane %v7839_v3, %v2114_v5 }
 0x610   :  { %v4345_v44 = vpop.f32.mrf.mxu0 }
 0x611   :  { %7825 = vst [vmem:[#allocation22_spill] sm:$0xff] %v6383_v7  ;;  %v4346_v8 = vadd.f32 %v4345_v44, %v4344_v59  ;;  %4412 = vmatprep.mubr.msk.f32.mxu1 %vm69_vm0, %v6383_v7  ;;  %v2119_v59 = vrot.slane %v7839_v3, %v2118_v37  ;;  %v6435_v44 = vrot.slane %v2115_v49, %v2114_v5 }
 0x612   :  { %v4347_v48 = vpop.f32.mrf.mxu0  ;;  %4413 = vmatmul.mubr.msk.f32.gmra.mxu1 %vm69_vm0, %v6383_v7 }
 0x613   :  { %v6390_v23 = vsub.f32 %v7826_v12, %v4346_v8  ;;  %v6437_v8 = vrot.slane %v2119_v59, %v2114_v5 }
 0x614   :  { %v4348_v34 = vpop.f32.mrf.mxu0 }
 0x615   :  { %7827 = vst [vmem:[#allocation13_spill] sm:$0xff] %v6390_v23  ;;  %v4349_v57 = vadd.f32 %v4348_v34, %v4347_v48  ;;  %4414 = vmatprep.mubr.msk.f32.mxu1 %vm69_vm0, %v6390_v23 }
 0x616   :  { %v4350_v16 = vpop.f32.mrf.mxu0  ;;  %4415 = vmatmul.mubr.msk.f32.gmra.mxu1 %vm69_vm0, %v6390_v23  ;;  %v7000_v23 = vld [vmem:[%s7746_s1 + $0x300] sm:$0xff] }
 0x617   :  { %v6397_v0 = vsub.f32 %v7828_v24, %v4349_v57 }
 0x618   :  { %v4351_v20 = vpop.f32.mrf.mxu0 }
 0x619   :  { %7829 = vst [vmem:[#allocation14_spill] sm:$0xff] %v6397_v0  ;;  %v4352_v46 = vadd.f32 %v4351_v20, %v4350_v16  ;;  %4416 = vmatprep.mubr.msk.f32.mxu1 %vm69_vm0, %v6397_v0 }
 0x61a   :  { %v4353_v4 = vpop.f32.mrf.mxu0  ;;  %4417 = vmatmul.mubr.msk.f32.gmra.mxu1 %vm69_vm0, %v6397_v0  ;;  %v6993_v0 = vld [vmem:[%s7746_s1 + $0x380] sm:$0xff] }
 0x61b   :  { %v6404_v38 = vsub.f32 %v7830_v56, %v4352_v46 }
 0x61c   :  { %v4354_v25 = vpop.f32.mrf.mxu0 }
 0x61d   :  { %7831 = vst [vmem:[#allocation15_spill] sm:$0xff] %v6404_v38  ;;  %v4355_v55 = vadd.f32 %v4354_v25, %v4353_v4  ;;  %4418 = vmatprep.mubr.msk.f32.mxu1 %vm69_vm0, %v6404_v38 }
 0x61e   :  { %4419 = vmatmul.mubr.msk.f32.gmra.mxu1 %vm69_vm0, %v6404_v38 }
 0x61f   :  { %v6411_v9 = vsub.f32 %v7832_v29, %v4355_v55 }
 0x621   :  { %7833 = vst [vmem:[#allocation16_spill] sm:$0xff] %v6411_v9  ;;  %4420 = vmatprep.mubr.msk.f32.mxu1 %vm69_vm0, %v6411_v9 }
 0x622   :  { %4421 = vmatmul.mubr.msk.f32.gmra.mxu1 %vm69_vm0, %v6411_v9 }
 0x65e   :  { %v4356_v60 = vpop.f32.mrf.mxu0 }
 0x660   :  { %v4357_v52 = vpop.f32.mrf.mxu0 }
 0x661   :  { %v4358_v33 = vadd.f32 %v4357_v52, %v4356_v60 }
 0x663   :  { %v6418_v50 = vsub.f32 %v7834_v62, %v4358_v33 }
 0x665   :  { %7835 = vst [vmem:[#allocation18_spill] sm:$0xff] %v6418_v50  ;;  %4422 = vmatprep.mubr.msk.f32.mxu1 %vm69_vm0, %v6418_v50 }
 0x666   :  { %4423 = vmatmul.mubr.msk.f32.gmra.mxu1 %vm69_vm0, %v6418_v50 }
 0x67c   :  { %v4359_v40 = vpop.f32.mrf.mxu0 }
 0x67e   :  { %v4360_v45 = vpop.f32.mrf.mxu0 }
 0x67f   :  { %v4361_v43 = vadd.f32 %v4360_v45, %v4359_v40 }
 0x681   :  { %v6425_v42 = vsub.f32 %v7836_v26, %v4361_v43 }
 0x683   :  { %7837 = vst [vmem:[#allocation19_spill] sm:$0xff] %v6425_v42  ;;  %4424 = vmatprep.mubr.msk.f32.mxu1 %vm69_vm0, %v6425_v42 }
 0x684   :  { %4425 = vmatmul.mubr.msk.f32.gmra.mxu1 %vm69_vm0, %v6425_v42 }
 0x6ae   :  { %v2017_v48 = vpop.f32.mrf.mxu1 }
 0x6af   :  { %v6440_v34 = vsub.f32 %v6435_v44, %v2017_v48 }
 0x6b0   :  { %v2019_v12 = vpop.f32.mrf.mxu1 }
 0x6b1   :  { %v6443_v57 = vsub.f32 %v6437_v8, %v2019_v12 }
 0x6b2   :  { %v2023_v16 = vpop.f32.mrf.mxu1 }
 0x6b3   :  { %vm2162_vm4 = vcmp.le.f32.partialorder %v6440_v34, %v6443_v57  ;;  %v6453_v46 = vsub.f32 %v6435_v44, %v2023_v16 }
 0x6b4   :  { %v2025_v24 = vpop.f32.mrf.mxu1  ;;  %v2163_v20 = vsel %vm2162_vm4, %v6440_v34, %v6443_v57 }
 0x6b5   :  { %v6456_v4 = vsub.f32 %v6437_v8, %v2025_v24  ;;  %2165 = vmin.index.xlane.f32.xlu1 %v2163_v20 }
 0x6b6   :  { %v2029_v56 = vpop.f32.mrf.mxu1 }
 0x6b7   :  { %vm2170_vm11 = vcmp.le.f32.partialorder %v6453_v46, %v6456_v4  ;;  %v6466_v29 = vsub.f32 %v6435_v44, %v2029_v56 }
 0x6b8   :  { %v2031_v25 = vpop.f32.mrf.mxu1  ;;  %v2171_v55 = vsel %vm2170_vm11, %v6453_v46, %v6456_v4 }
 0x6b9   :  { %v6469_v60 = vsub.f32 %v6437_v8, %v2031_v25  ;;  %2173 = vmin.index.xlane.f32.xlu0 %v2171_v55 }
 0x6ba   :  { %v2035_v52 = vpop.f32.mrf.mxu1 }
 0x6bb   :  { %vm2178_vm2 = vcmp.le.f32.partialorder %v6466_v29, %v6469_v60  ;;  %v6479_v40 = vsub.f32 %v6435_v44, %v2035_v52 }
 0x6bc   :  { %v2037_v33 = vpop.f32.mrf.mxu1  ;;  %v2179_v62 = vsel %vm2178_vm2, %v6466_v29, %v6469_v60 }
 0x6bd   :  { %v6482_v45 = vsub.f32 %v6437_v8, %v2037_v33  ;;  %2181 = vmin.index.xlane.f32.xlu0 %v2179_v62 }
 0x6be   :  { %v2041_v43 = vpop.f32.mrf.mxu1 }
 0x6bf   :  { %vm2186_vm13 = vcmp.le.f32.partialorder %v6479_v40, %v6482_v45  ;;  %v6492_v37 = vsub.f32 %v6435_v44, %v2041_v43 }
 0x6c0   :  { %v2043_v26 = vpop.f32.mrf.mxu1  ;;  %v2187_v5 = vsel %vm2186_vm13, %v6479_v40, %v6482_v45 }
 0x6c1   :  { %v6495_v3 = vsub.f32 %v6437_v8, %v2043_v26  ;;  %2189 = vmin.index.xlane.f32.xlu1 %v2187_v5 }
 0x6c2   :  { %v2047_v49 = vpop.f32.mrf.mxu1 }
 0x6c3   :  { %vm2194_vm3 = vcmp.le.f32.partialorder %v6492_v37, %v6495_v3  ;;  %v6505_v12 = vsub.f32 %v6435_v44, %v2047_v49 }
 0x6c4   :  { %v2049_v59 = vpop.f32.mrf.mxu1  ;;  %v2195_v48 = vsel %vm2194_vm3, %v6492_v37, %v6495_v3  ;;  %v2196_v57 = vsel %vm2194_vm3, %v5244_v13, %v5247_v17 }
 0x6c5   :  { %v6508_v16 = vsub.f32 %v6437_v8, %v2049_v59  ;;  %2197 = vmin.index.xlane.f32.xlu1 %v2195_v48 }
 0x6c6   :  { %v2053_v24 = vpop.f32.mrf.mxu1 }
 0x6c7   :  { %vm2202_vm14 = vcmp.le.f32.partialorder %v6505_v12, %v6508_v16  ;;  %v6518_v25 = vsub.f32 %v6435_v44, %v2053_v24 }
 0x6c8   :  { %v2055_v20 = vpop.f32.mrf.mxu1  ;;  %v2203_v56 = vsel %vm2202_vm14, %v6505_v12, %v6508_v16  ;;  %v2204_v29 = vsel %vm2202_vm14, %v5244_v13, %v5247_v17 }
 0x6c9   :  { %v6521_v55 = vsub.f32 %v6437_v8, %v2055_v20  ;;  %2205 = vmin.index.xlane.f32.xlu0 %v2203_v56 }
 0x6ca   :  { %v2059_v52 = vpop.f32.mrf.mxu1 }
 0x6cb   :  { %vm2210_vm10 = vcmp.le.f32.partialorder %v6518_v25, %v6521_v55  ;;  %v6531_v43 = vsub.f32 %v6435_v44, %v2059_v52 }
 0x6cc   :  { %v2061_v33 = vpop.f32.mrf.mxu1  ;;  %v2211_v62 = vsel %vm2210_vm10, %v6518_v25, %v6521_v55  ;;  %v2212_v60 = vsel %vm2210_vm10, %v5244_v13, %v5247_v17 }
 0x6cd   :  { %v6534_v26 = vsub.f32 %v6437_v8, %v2061_v33  ;;  %2213 = vmin.index.xlane.f32.xlu1 %v2211_v62 }
 0x6ce   :  { %v2065_v5 = vpop.f32.mrf.mxu1 }
 0x6cf   :  { %vm2218_vm15 = vcmp.le.f32.partialorder %v6531_v43, %v6534_v26  ;;  %v6544_v48 = vsub.f32 %v6435_v44, %v2065_v5 }
 0x6d0   :  { %v2067_v49 = vpop.f32.mrf.mxu1  ;;  %v2219_v59 = vsel %vm2218_vm15, %v6531_v43, %v6534_v26  ;;  %v6702_v26 = vld [vmem:[%s7746_s1 + $0x378] sm:$0xff] }
 0x6d1   :  { %v6547_v24 = vsub.f32 %v6437_v8, %v2067_v49  ;;  %2221 = vmin.index.xlane.f32.xlu1 %v2219_v59 }
 0x6d2   :  { %v2071_v20 = vpop.f32.mrf.mxu1 }
 0x6d3   :  { %vm2226_vm1 = vcmp.le.f32.partialorder %v6544_v48, %v6547_v24  ;;  %v6557_v33 = vsub.f32 %v6435_v44, %v2071_v20 }
 0x6d4   :  { %v2073_v56 = vpop.f32.mrf.mxu1  ;;  %v2227_v52 = vsel %vm2226_vm1, %v6544_v48, %v6547_v24  ;;  %v6707_v48 = vld [vmem:[%s7746_s1 + $0x3f0] sm:$0xff]  ;;  %v6724_v24 = vld [vmem:[%s7746_s1 + $0x3e8] sm:$0xff] }
 0x6d5   :  { %v6560_v62 = vsub.f32 %v6437_v8, %v2073_v56  ;;  %2229 = vmin.index.xlane.f32.xlu0 %v2227_v52 }
 0x6d6   :  { %v2077_v5 = vpop.f32.mrf.mxu1 }
 0x6d7   :  { %vm2234_vm7 = vcmp.le.f32.partialorder %v6557_v33, %v6560_v62  ;;  %v6570_v42 = vsub.f32 %v6435_v44, %v2077_v5 }
 0x6d8   :  { %v2079_v49 = vpop.f32.mrf.mxu1  ;;  %v2235_v59 = vsel %vm2234_vm7, %v6557_v33, %v6560_v62  ;;  %v2228_v33 = vsel %vm2226_vm1, %v5244_v13, %v5247_v17  ;;  %vm7840_vm1 = vcmask 195712  }
 0x6d9   :  { %v6573_v20 = vsub.f32 %v6437_v8, %v2079_v49  ;;  %2237 = vmin.index.xlane.f32.xlu1 %v2235_v59 }
 0x6da   :  { %v2083_v56 = vpop.f32.mrf.mxu1 }
 0x6db   :  { %vm2242_vm12 = vcmp.le.f32.partialorder %v6570_v42, %v6573_v20  ;;  %v6583_v9 = vsub.f32 %v6435_v44, %v2083_v56  ;;  %v2164_v56 = vsel %vm2162_vm4, %v5244_v13, %v5247_v17 }
 0x6dc   :  { %v2085_v52 = vpop.f32.mrf.mxu1  ;;  %v2243_v50 = vsel %vm2242_vm12, %v6570_v42, %v6573_v20  ;;  %v2244_v43 = vsel %vm2242_vm12, %v5244_v13, %v5247_v17  ;;  %v6719_v42 = vld [vmem:[%s7746_s1 + $0x370] sm:$0xff] }
 0x6dd   :  { %v6586_v5 = vsub.f32 %v6437_v8, %v2085_v52  ;;  %2245 = vmin.index.xlane.f32.xlu1 %v2243_v50  ;;  %v2172_v52 = vsel %vm2170_vm11, %v5244_v13, %v5247_v17 }
 0x6de   :  { %v2089_v37 = vpop.f32.mrf.mxu1 }
 0x6df   :  { %vm2250_vm5 = vcmp.le.f32.partialorder %v6583_v9, %v6586_v5  ;;  %v6634_v16 = vsub.f32 %v6435_v44, %v2089_v37 }
 0x6e0   :  { %v2251_v49 = vsel %vm2250_vm5, %v6583_v9, %v6586_v5  ;;  %v2091_v3 = vpop.f32.mrf.mxu1  ;;  %v2252_v37 = vsel %vm2250_vm5, %v5244_v13, %v5247_v17  ;;  %v6697_v9 = vld [vmem:[%s7746_s1 + $0x3f8] sm:$0xff]  ;;  %vm7841_vm5 = vcmask 261312  }
 0x6e1   :  { %2253 = vmin.index.xlane.f32.xlu1 %v2251_v49  ;;  %4506 = vmatprep.subr.msk.mxu1 %vm69_vm0, %v6697_v9 }
 0x6e2   :  { %4570 = vmatprep.subr.mxu0 %v6697_v9  ;;  %4507 = vmatpush3.xpose.msk.msra.mxu1 %vm69_vm0, %v6702_v26 }
 0x6e3   :  { %4508 = vmatprep.subr.msk.mxu1 %vm69_vm0, %v6707_v48 }
 0x6e6   :  { %4509 = vmatpush3.xpose.msk.msra.mxu1 %vm69_vm0, %v6719_v42 }
 0x6e7   :  { %4510 = vmatprep.subr.msk.mxu1 %vm69_vm0, %v6724_v24 }
 0x73e   :  { %v2166_v59 = vpop.xlane.xlu1 %2165 }
 0x73f   :  { %4716 = vset.pattern.permute.xlu0 %v2166_v59  ;;  %v2180_v59 = vsel %vm2178_vm2, %v5244_v13, %v5247_v17 }
 0x742   :  { %v2174_v38 = vpop.xlane.xlu0 %2173 }
 0x743   :  { %4717 = vset.pattern.permute.xlu1 %v2174_v38  ;;  %2168 = vperm.xlu0 %4716, %v2164_v56   ;;  %v2188_v38 = vsel %vm2186_vm13, %v5244_v13, %v5247_v17  ;;  %v2095_v56 = vpop.f32.mrf.mxu1 }
 0x745   :  { %v2097_v12 = vpop.f32.mrf.mxu1 }
 0x746   :  { %v2182_v50 = vpop.xlane.xlu0 %2181  ;;  %v6639_v25 = vsub.f32 %v6437_v8, %v2097_v12 }
 0x747   :  { %2176 = vperm.xlu1 %4717, %v2172_v52   ;;  %4718 = vset.pattern.permute.xlu0 %v2182_v50  ;;  %v6631_v50 = vsub.f32 %v6437_v8, %v2091_v3  ;;  %v2101_v52 = vpop.f32.mrf.mxu1 }
 0x749   :  { %vm2258_vm8 = vcmp.le.f32.partialorder %v6634_v16, %v6631_v50  ;;  %v2103_v55 = vpop.f32.mrf.mxu1 }
 0x74a   :  { %v2190_v49 = vpop.xlane.xlu1 %2189 }
 0x74b   :  { %2184 = vperm.xlu0 %4718, %v2180_v59   ;;  %v2259_v59 = vsel %vm2258_vm8, %v6634_v16, %v6631_v50  ;;  %v2107_v62 = vpop.f32.mrf.mxu1 }
 0x74d   :  { %v2109_v20 = vpop.f32.mrf.mxu1 }
 0x74e   :  { %v2198_v34 = vpop.xlane.xlu1 %2197  ;;  %v6733_v3 = vsub.f32 %v6437_v8, %v2109_v20 }
 0x74f   :  { %4719 = vset.pattern.permute.xlu0 %v2190_v49  ;;  %4720 = vset.pattern.permute.xlu1 %v2198_v34  ;;  %v6642_v49 = vsub.f32 %v6435_v44, %v2095_v56  ;;  %v6652_v34 = vsub.f32 %v6437_v8, %v2103_v55  ;;  %v6738_v56 = vsub.f32 %v6435_v44, %v2107_v62  ;;  %v6791_v62 = vld [vmem:[%s7746_s1 + $0x360] sm:$0xff] }
 0x751   :  { %vm2266_vm9 = vcmp.le.f32.partialorder %v6642_v49, %v6639_v25  ;;  %vm2282_vm14 = vcmp.le.f32.partialorder %v6738_v56, %v6733_v3 }
 0x752   :  { %v2206_v46 = vpop.xlane.xlu0 %2205  ;;  %v2268_v41 = vsel %vm2266_vm9, %v5244_v13, %v5247_v17 }
 0x753   :  { %2192 = vperm.xlu0 %4719, %v2188_v38   ;;  %2200 = vperm.xlu1 %4720, %v2196_v57   ;;  %v6655_v38 = vsub.f32 %v6435_v44, %v2101_v52  ;;  %v2267_v57 = vsel %vm2266_vm9, %v6642_v49, %v6639_v25  ;;  %vm7845_vm9 = vcmask 523712  }
 0x755   :  { %vm2274_vm4 = vcmp.le.f32.partialorder %v6655_v38, %v6652_v34 }
 0x756   :  { %v2214_v4 = vpop.xlane.xlu1 %2213  ;;  %v2276_v16 = vsel %vm2274_vm4, %v5244_v13, %v5247_v17 }
 0x757   :  { %4721 = vset.pattern.permute.xlu1 %v2206_v46  ;;  %4722 = vset.pattern.permute.xlu0 %v2214_v4  ;;  %v2275_v46 = vsel %vm2274_vm4, %v6655_v38, %v6652_v34 }
 0x75a   :  { %v2222_v40 = vpop.xlane.xlu1 %2221 }
 0x75b   :  { %2208 = vperm.xlu1 %4721, %v2204_v29   ;;  %2216 = vperm.xlu0 %4722, %v2212_v60   ;;  %v2236_v29 = vsel %vm2234_vm7, %v5244_v13, %v5247_v17 }
 0x75f   :  { %4723 = vset.pattern.permute.xlu1 %v2222_v40  ;;  %v2220_v40 = vsel %vm2218_vm15, %v5244_v13, %v5247_v17 }
 0x762   :  { %v2238_v45 = vpop.xlane.xlu1 %2237 }
 0x763   :  { %4725 = vset.pattern.permute.xlu0 %v2238_v45  ;;  %v2230_v45 = vpop.xlane.xlu0 %2229 }
 0x766   :  { %v2246_v4 = vpop.xlane.xlu1 %2245 }
 0x76a   :  { %v2254_v60 = vpop.xlane.xlu1 %2253 }
 0x77a   :  { %2261 = vmin.index.xlane.f32.xlu0 %v2259_v59 }
 0x77f   :  { %2269 = vmin.index.xlane.f32.xlu1 %v2267_v57  ;;  %v2283_v57 = vsel %vm2282_vm14, %v6738_v56, %v6733_v3 }
 0x783   :  { %2277 = vmin.index.xlane.f32.xlu1 %v2275_v46 }
 0x790   :  { %2240 = vperm.xlu0 %4725, %v2236_v29  }
 0x794   :  { %2224 = vperm.xlu1 %4723, %v2220_v40   ;;  %4727 = vset.pattern.permute.xlu0 %v2254_v60 }
 0x798   :  { %4724 = vset.pattern.permute.xlu1 %v2230_v45  ;;  %2256 = vperm.xlu0 %4727, %v2252_v37   ;;  %v6775_v37 = vld [vmem:[%s7746_s1 + $0x368] sm:$0xff] }
 0x799   :  { %4511 = vmatpush3.xpose.msk.msra.mxu1 %vm69_vm0, %v6775_v37 }
 0x79c   :  { %2232 = vperm.xlu1 %4724, %v2228_v33  }
 0x7a0   :  { %4726 = vset.pattern.permute.xlu1 %v2246_v4 }
 0x7a4   :  { %2248 = vperm.xlu1 %4726, %v2244_v43   ;;  %v6784_v43 = vld [vmem:[%s7746_s1 + $0x3e0] sm:$0xff] }
 0x7a5   :  { %4512 = vmatprep.subr.msk.mxu1 %vm69_vm0, %v6784_v43 }
 0x7a6   :  { %4513 = vmatpush3.xpose.msk.msra.mxu1 %vm69_vm0, %v6791_v62 }
 0x7be   :  { %v2169_v5 = vpop.permute.xlu0 %2168 }
 0x7bf   :  { %vm2370_vm11 = vcmp.eq.s32.totalorder %v5244_v13, %v2169_v5  ;;  %vm2371_vm2 = vcmp.eq.s32.totalorder %v5247_v17, %v2169_v5  ;;  %v2293_v52 = vrot.slane %v2169_v5, %v5375_v61  ;;  %v6977_v61 = vld [vmem:[%s7746_s1 + $0x388] sm:$0xff] }
 0x7c0   :  { %3898 = vmatprep.mubr.msk.f32.mxu0 %vm2371_vm2, %v7808_v30  ;;  %vm7842_vm2 = vcmask 326912  }
 0x7c1   :  { %3899 = vmatmul.mubr.msk.f32.vlgmr.msra.gmra.mxu0 %vm2370_vm11, %v7808_v30 }
 0x7c2   :  { %v2177_v12 = vpop.permute.xlu1 %2176  ;;  %4571 = vmatpush3.msra.mxu0 %v6702_v26 }
 0x7c3   :  { %v2297_v55 = vrot.slane %v2177_v12, %v5370_v58  ;;  %vm2373_vm13 = vcmp.eq.s32.totalorder %v5247_v17, %v2177_v12  ;;  %vm2372_vm3 = vcmp.eq.s32.totalorder %v5244_v13, %v2177_v12  ;;  %4572 = vmatprep.subr.mxu0 %v6707_v48  ;;  %v6802_v12 = vld [vmem:[%s7746_s1 + $0x3d8] sm:$0xff]  ;;  %v6982_v58 = vld [vmem:[%s7746_s1 + $0x308] sm:$0xff] }
 0x7c4   :  { %3900 = vmatprep.mubr.msk.f32.mxu0 %vm2373_vm13, %v7808_v30  ;;  %4573 = vmatpush3.msra.mxu0 %v6719_v42 }
 0x7c5   :  { %v2298_v44 = vsel %vm563_vm6, %v2297_v55, %v2293_v52  ;;  %3901 = vmatmul.mubr.msk.f32.gmra.mxu0 %vm2372_vm3, %v7808_v30  ;;  %4574 = vmatprep.subr.mxu0 %v6724_v24 }
 0x7c6   :  { %v2185_v8 = vpop.permute.xlu0 %2184  ;;  %4575 = vmatpush3.msra.mxu0 %v6775_v37  ;;  %4514 = vmatprep.subr.msk.mxu1 %vm69_vm0, %v6802_v12 }
 0x7c7   :  { %v2302_v59 = vrot.slane %v2185_v8, %v5381_v63  ;;  %vm2375_vm10 = vcmp.eq.s32.totalorder %v5247_v17, %v2185_v8  ;;  %vm2374_vm15 = vcmp.eq.s32.totalorder %v5244_v13, %v2185_v8  ;;  %4576 = vmatprep.subr.mxu0 %v6784_v43  ;;  %v6820_v8 = vld [vmem:[%s7746_s1 + $0x3d0] sm:$0xff] }
 0x7c8   :  { %2285 = vmin.index.xlane.f32.xlu1 %v2283_v57  ;;  %3902 = vmatprep.mubr.msk.f32.mxu0 %vm2375_vm10, %v7808_v30  ;;  %v6952_v63 = vld [vmem:[%s7746_s1 + $0x310] sm:$0xff] }
 0x7c9   :  { %v2303_v46 = vsel %vm7840_vm1, %v2302_v59, %v2298_v44  ;;  %3903 = vmatmul.mubr.msk.f32.gmra.mxu0 %vm2374_vm15, %v7808_v30  ;;  %v6814_v44 = vld [vmem:[%s7746_s1 + $0x358] sm:$0xff]  ;;  %vm7843_vm15 = vcmask 392512  }
 0x7ca   :  { %4577 = vmatpush3.msra.mxu0 %v6791_v62  ;;  %4515 = vmatpush3.xpose.msk.msra.mxu1 %vm69_vm0, %v6814_v44 }
 0x7cb   :  { %4578 = vmatprep.subr.mxu0 %v6802_v12  ;;  %4516 = vmatprep.subr.msk.mxu1 %vm69_vm0, %v6820_v8 }
 0x7cc   :  { %4579 = vmatpush3.msra.mxu0 %v6814_v44 }
 0x7cd   :  { %4580 = vmatprep.subr.mxu0 %v6820_v8 }
 0x7ce   :  { %v2193_v4 = vpop.permute.xlu0 %2192  ;;  %v2201_v29 = vpop.permute.xlu1 %2200 }
 0x7cf   :  { %v2307_v60 = vrot.slane %v2193_v4, %v5398_v14  ;;  %v2312_v40 = vrot.slane %v2201_v29, %v5406_v22  ;;  %vm2377_vm7 = vcmp.eq.s32.totalorder %v5247_v17, %v2193_v4  ;;  %vm2376_vm12 = vcmp.eq.s32.totalorder %v5244_v13, %v2193_v4  ;;  %v6844_v4 = vld [vmem:[%s7746_s1 + $0x3c8] sm:$0xff]  ;;  %v6940_v22 = vld [vmem:[%s7746_s1 + $0x318] sm:$0xff]  ;;  %v6946_v14 = vld [vmem:[%s7746_s1 + $0x390] sm:$0xff] }
 0x7d0   :  { %3904 = vmatprep.mubr.msk.f32.mxu0 %vm2377_vm7, %v7808_v30  ;;  %vm2379_vm11 = vcmp.eq.s32.totalorder %v5247_v17, %v2201_v29  ;;  %vm2378_vm13 = vcmp.eq.s32.totalorder %v5244_v13, %v2201_v29  ;;  %vm7844_vm7 = vcmask 458112   ;;  %v6856_v29 = vld [vmem:[%s7746_s1 + $0x348] sm:$0xff] }
 0x7d1   :  { %v2308_v45 = vsel %vm7841_vm5, %v2307_v60, %v2303_v46  ;;  %3905 = vmatmul.mubr.msk.f32.gmra.mxu0 %vm2376_vm12, %v7808_v30  ;;  %v6837_v46 = vld [vmem:[%s7746_s1 + $0x350] sm:$0xff]  ;;  %v6862_v60 = vld [vmem:[%s7746_s1 + $0x3c0] sm:$0xff] }
 0x7d2   :  { %v2313_v33 = vsel %vm7842_vm2, %v2312_v40, %v2308_v45  ;;  %3906 = vmatprep.mubr.msk.f32.mxu0 %vm2379_vm11, %v7808_v30  ;;  %4517 = vmatpush3.xpose.msk.msra.mxu1 %vm69_vm0, %v6837_v46  ;;  %v6868_v40 = vld [vmem:[%s7746_s1 + $0x340] sm:$0xff]  ;;  %v6876_v45 = vld [vmem:[%s7746_s1 + $0x3b8] sm:$0xff]  ;;  %vm7846_vm2 = vcmask 589312  }
 0x7d3   :  { %4581 = vmatpush3.msra.mxu0 %v6837_v46  ;;  %4518 = vmatprep.subr.msk.mxu1 %vm69_vm0, %v6844_v4 }
 0x7d4   :  { %4582 = vmatprep.subr.mxu0 %v6844_v4 }
 0x7d5   :  { %3907 = vmatmul.mubr.msk.f32.gmra.mxu0 %vm2378_vm13, %v7808_v30 }
 0x7d6   :  { %v2217_v20 = vpop.permute.xlu0 %2216  ;;  %v2209_v5 = vpop.permute.xlu1 %2208  ;;  %4583 = vmatpush3.msra.mxu0 %v6856_v29  ;;  %4519 = vmatpush3.xpose.msk.msra.mxu1 %vm69_vm0, %v6856_v29 }
 0x7d7   :  { %v2322_v52 = vrot.slane %v2217_v20, %v5429_v11  ;;  %v2317_v55 = vrot.slane %v2209_v5, %v5424_v10  ;;  %vm2381_vm3 = vcmp.eq.s32.totalorder %v5247_v17, %v2209_v5  ;;  %vm2380_vm10 = vcmp.eq.s32.totalorder %v5244_v13, %v2209_v5  ;;  %4584 = vmatprep.subr.mxu0 %v6862_v60  ;;  %v6896_v5 = vld [vmem:[%s7746_s1 + $0x330] sm:$0xff]  ;;  %v6924_v11 = vld [vmem:[%s7746_s1 + $0x320] sm:$0xff]  ;;  %v6932_v10 = vld [vmem:[%s7746_s1 + $0x398] sm:$0xff] }
 0x7d8   :  { %3908 = vmatprep.mubr.msk.f32.mxu0 %vm2381_vm3, %v7808_v30  ;;  %vm2383_vm1 = vcmp.eq.s32.totalorder %v5247_v17, %v2217_v20  ;;  %vm2382_vm12 = vcmp.eq.s32.totalorder %v5244_v13, %v2217_v20  ;;  %4585 = vmatpush3.msra.mxu0 %v6868_v40  ;;  %v6890_v20 = vld [vmem:[%s7746_s1 + $0x3b0] sm:$0xff]  ;;  %vm7847_vm3 = vcmask 654912  }
 0x7d9   :  { %v2318_v59 = vsel %vm7843_vm15, %v2317_v55, %v2313_v33  ;;  %3909 = vmatmul.mubr.msk.f32.gmra.mxu0 %vm2380_vm10, %v7808_v30  ;;  %4520 = vmatprep.subr.msk.mxu1 %vm69_vm0, %v6862_v60  ;;  %v6884_v33 = vld [vmem:[%s7746_s1 + $0x338] sm:$0xff]  ;;  %v6912_v55 = vld [vmem:[%s7746_s1 + $0x328] sm:$0xff] }
 0x7da   :  { %3910 = vmatprep.mubr.msk.f32.mxu0 %vm2383_vm1, %v7808_v30  ;;  %v6828_v57 = vsel %vm7844_vm7, %v2322_v52, %v2318_v59  ;;  %4586 = vmatprep.subr.mxu0 %v6876_v45  ;;  %v6904_v52 = vld [vmem:[%s7746_s1 + $0x3a8] sm:$0xff]  ;;  %v6918_v59 = vld [vmem:[%s7746_s1 + $0x3a0] sm:$0xff]  ;;  %vm7848_vm7 = vcmask 720512  }
 0x7db   :  { %4587 = vmatpush3.msra.mxu0 %v6884_v33  ;;  %4521 = vmatpush3.xpose.msk.msra.mxu1 %vm69_vm0, %v6868_v40 }
 0x7dc   :  { %4588 = vmatprep.subr.mxu0 %v6890_v20  ;;  %4522 = vmatprep.subr.msk.mxu1 %vm69_vm0, %v6876_v45 }
 0x7dd   :  { %3911 = vmatmul.mubr.msk.f32.gmra.mxu0 %vm2382_vm12, %v7808_v30 }
 0x7de   :  { %4589 = vmatpush3.msra.mxu0 %v6896_v5 }
 0x7df   :  { %4590 = vmatprep.subr.mxu0 %v6904_v52  ;;  %4523 = vmatpush3.xpose.msk.msra.mxu1 %vm69_vm0, %v6884_v33 }
 0x7e0   :  { %4591 = vmatpush3.msra.mxu0 %v6912_v55  ;;  %4524 = vmatprep.subr.msk.mxu1 %vm69_vm0, %v6890_v20 }
 0x7e1   :  { %4592 = vmatprep.subr.mxu0 %v6918_v59 }
 0x7e2   :  { %4593 = vmatpush3.msra.mxu0 %v6924_v11 }
 0x7e3   :  { %4594 = vmatprep.subr.mxu0 %v6932_v10  ;;  %4525 = vmatpush3.xpose.msk.msra.mxu1 %vm69_vm0, %v6896_v5 }
 0x7e4   :  { %4595 = vmatpush3.msra.mxu0 %v6940_v22  ;;  %4526 = vmatprep.subr.msk.mxu1 %vm69_vm0, %v6904_v52 }
 0x7e5   :  { %4596 = vmatprep.subr.mxu0 %v6946_v14 }
 0x7e6   :  { %4597 = vmatpush3.msra.mxu0 %v6952_v63 }
 0x7e7   :  { %4527 = vmatpush3.xpose.msk.msra.mxu1 %vm69_vm0, %v6912_v55  ;;  %4598 = vmatprep.subr.mxu0 %v6977_v61 }
 0x7e8   :  { %4528 = vmatprep.subr.msk.mxu1 %vm69_vm0, %v6918_v59  ;;  %4599 = vmatpush3.msra.mxu0 %v6982_v58 }
 0x7e9   :  { %4600 = vmatprep.subr.mxu0 %v6993_v0 }
 0x7ea   :  { %4601 = vmatpush3.msra.mxu0 %v7000_v23 }
 0x7eb   :  { %4529 = vmatpush3.xpose.msk.msra.mxu1 %vm69_vm0, %v6924_v11 }
 0x7ec   :  { %4530 = vmatprep.subr.msk.mxu1 %vm69_vm0, %v6932_v10 }
 0x7ef   :  { %4531 = vmatpush3.xpose.msk.msra.mxu1 %vm69_vm0, %v6940_v22 }
 0x7f0   :  { %4532 = vmatprep.subr.msk.mxu1 %vm69_vm0, %v6946_v14 }
 0x7f3   :  { %4533 = vmatpush3.xpose.msk.msra.mxu1 %vm69_vm0, %v6952_v63 }
 0x7f4   :  { %4534 = vmatprep.subr.msk.mxu1 %vm69_vm0, %v6977_v61 }
 0x7f7   :  { %4535 = vmatpush3.xpose.msk.msra.mxu1 %vm69_vm0, %v6982_v58 }
 0x7f8   :  { %4536 = vmatprep.subr.msk.mxu1 %vm69_vm0, %v6993_v0 }
 0x7fb   :  { %4537 = vmatpush3.xpose.msk.msra.mxu1 %vm69_vm0, %v7000_v23 }
 0x7fc   :  { %4650 = vmatprep.subr.mxu1 %v6697_v9 }
 0x803   :  { %v2262_v19 = vpop.xlane.xlu0 %2261 }
 0x804   :  { %4728 = vset.pattern.permute.xlu1 %v2262_v19  ;;  %v2260_v19 = vsel %vm2258_vm8, %v5244_v13, %v5247_v17 }
 0x808   :  { %2264 = vperm.xlu1 %4728, %v2260_v19   ;;  %v2270_v7 = vpop.xlane.xlu1 %2269 }
 0x809   :  { %4729 = vset.pattern.permute.xlu0 %v2270_v7 }
 0x80c   :  { %v2278_v54 = vpop.xlane.xlu1 %2277 }
 0x80d   :  { %2272 = vperm.xlu0 %4729, %v2268_v41   ;;  %4730 = vset.pattern.permute.xlu1 %v2278_v54  ;;  %v2241_v54 = vpop.permute.xlu0 %2240 }
 0x80e   :  { %v2337_v49 = vrot.slane %v2241_v54, %v5452_v35  ;;  %vm2389_vm13 = vcmp.eq.s32.totalorder %v5247_v17, %v2241_v54  ;;  %vm2388_vm10 = vcmp.eq.s32.totalorder %v5244_v13, %v2241_v54 }
 0x810   :  { %v2225_v50 = vpop.permute.xlu1 %2224 }
 0x811   :  { %v2327_v19 = vrot.slane %v2225_v50, %v5432_v15  ;;  %2280 = vperm.xlu1 %4730, %v2276_v16   ;;  %vm2385_vm8 = vcmp.eq.s32.totalorder %v5247_v17, %v2225_v50  ;;  %vm2384_vm5 = vcmp.eq.s32.totalorder %v5244_v13, %v2225_v50 }
 0x812   :  { %3912 = vmatprep.mubr.msk.f32.mxu0 %vm2385_vm8, %v7808_v30 }
 0x813   :  { %v2328_v41 = vsel %vm7845_vm9, %v2327_v19, %v6828_v57  ;;  %3913 = vmatmul.mubr.msk.f32.gmra.mxu0 %vm2384_vm5, %v7808_v30  ;;  %v2257_v9 = vpop.permute.xlu0 %2256 }
 0x814   :  { %vm2393_vm12 = vcmp.eq.s32.totalorder %v5247_v17, %v2257_v9  ;;  %vm2392_vm8 = vcmp.eq.s32.totalorder %v5244_v13, %v2257_v9 }
 0x817   :  { %v2233_v7 = vpop.permute.xlu1 %2232 }
 0x818   :  { %v2332_v25 = vrot.slane %v2233_v7, %v5449_v32  ;;  %vm2387_vm4 = vcmp.eq.s32.totalorder %v5247_v17, %v2233_v7  ;;  %vm2386_vm11 = vcmp.eq.s32.totalorder %v5244_v13, %v2233_v7  ;;  %v2347_v7 = vrot.slane %v2257_v9, %v5628_v51 }
 0x819   :  { %3914 = vmatprep.mubr.msk.f32.mxu0 %vm2387_vm4, %v7808_v30  ;;  %vm7849_vm4 = vcmask 786112  }
 0x81a   :  { %v2333_v34 = vsel %vm7846_vm2, %v2332_v25, %v2328_v41  ;;  %3915 = vmatmul.mubr.msk.f32.gmra.mxu0 %vm2386_vm11, %v7808_v30  ;;  %v2284_v41 = vsel %vm2282_vm14, %v5244_v13, %v5247_v17  ;;  %vm7850_vm14 = vcmask 851712  }
 0x81b   :  { %3916 = vmatprep.mubr.msk.f32.mxu0 %vm2389_vm13, %v7808_v30  ;;  %v2338_v38 = vsel %vm7847_vm3, %v2337_v49, %v2333_v34 }
 0x81e   :  { %3917 = vmatmul.mubr.msk.f32.gmra.mxu0 %vm2388_vm10, %v7808_v30  ;;  %vm7851_vm10 = vcmask 917312  }
 0x81f   :  { %v2249_v57 = vpop.permute.xlu1 %2248 }
 0x820   :  { %v2342_v50 = vrot.slane %v2249_v57, %v5624_v47  ;;  %vm2391_vm15 = vcmp.eq.s32.totalorder %v5247_v17, %v2249_v57  ;;  %vm2390_vm1 = vcmp.eq.s32.totalorder %v5244_v13, %v2249_v57 }
 0x821   :  { %3918 = vmatprep.mubr.msk.f32.mxu0 %vm2391_vm15, %v7808_v30 }
 0x822   :  { %v2343_v16 = vsel %vm7848_vm7, %v2342_v50, %v2338_v38  ;;  %3919 = vmatmul.mubr.msk.f32.gmra.mxu0 %vm2390_vm1, %v7808_v30  ;;  %vm7852_vm7 = vcmask 982912  }
 0x823   :  { %3920 = vmatprep.mubr.msk.f32.mxu0 %vm2393_vm12, %v7808_v30  ;;  %v2348_v57 = vsel %vm7849_vm4, %v2347_v7, %v2343_v16  ;;  %vm7853_vm12 = vcmask 1048512  }
 0x826   :  { %3921 = vmatmul.mubr.msk.f32.gmra.mxu0 %vm2392_vm8, %v7808_v30 }
 0x851   :  { %v2286_v19 = vpop.xlane.xlu1 %2285 }
 0x852   :  { %4731 = vset.pattern.permute.xlu1 %v2286_v19 }
 0x856   :  { %2288 = vperm.xlu1 %4731, %v2284_v41  }
 0x881   :  { %v4458_v54 = vpop.f32.mrf.mxu0 }
 0x883   :  { %v4459_v25 = vpop.f32.mrf.mxu0  ;;  %v2265_v49 = vpop.permute.xlu1 %2264 }
 0x884   :  { %v4460_v34 = vadd.f32 %v4459_v25, %v4458_v54  ;;  %v2352_v38 = vrot.slane %v2265_v49, %v5633_v53  ;;  %vm2395_vm5 = vcmp.eq.s32.totalorder %v5247_v17, %v2265_v49  ;;  %vm2394_vm9 = vcmp.eq.s32.totalorder %v5244_v13, %v2265_v49 }
 0x885   :  { %v4461_v50 = vpop.f32.mrf.mxu0  ;;  %3922 = vmatprep.mubr.msk.f32.mxu0 %vm2395_vm5, %v7808_v30 }
 0x886   :  { %v7063_v3 = vsub.f32 %v6320_v1, %v4460_v34  ;;  %v7066_v56 = vsel %vm7850_vm14, %v2352_v38, %v2348_v57  ;;  %3923 = vmatmul.mubr.msk.f32.gmra.mxu0 %vm2394_vm9, %v7808_v30  ;;  %v7856_v34 = vld [vmem:[#allocation22_spill] sm:$0xff] }
 0x887   :  { %v4462_v9 = vpop.f32.mrf.mxu0 }
 0x888   :  { %v4463_v19 = vadd.f32 %v4462_v9, %v4461_v50  ;;  %4538 = vmatprep.mubr.msk.f32.mxu1 %vm69_vm0, %v7063_v3  ;;  %v7071_v41 = vpop.permute.xlu0 %2272  ;;  %v7857_v9 = vld [vmem:[#allocation13_spill] sm:$0xff] }
 0x889   :  { %v4464_v54 = vpop.f32.mrf.mxu0  ;;  %4539 = vmatmul.mubr.msk.f32.vlgmr.msra.gmra.mxu1 %vm69_vm0, %v7063_v3  ;;  %vm2397_vm11 = vcmp.eq.s32.totalorder %v5247_v17, %v7071_v41  ;;  %vm2396_vm2 = vcmp.eq.s32.totalorder %v5244_v13, %v7071_v41 }
 0x88a   :  { %v7080_v1 = vsub.f32 %v6327_v36, %v4463_v19  ;;  %3924 = vmatprep.mubr.msk.f32.mxu0 %vm2397_vm11, %v7808_v30  ;;  %4666 = vmatpush3.msra.mxu1 %v6702_v26 }
 0x88b   :  { %v4465_v16 = vpop.f32.mrf.mxu0  ;;  %3925 = vmatmul.mubr.msk.f32.gmra.mxu0 %vm2396_vm2, %v7808_v30  ;;  %4651 = vmatprep.subr.mxu1 %v6707_v48 }
 0x88c   :  { %v4466_v7 = vadd.f32 %v4465_v16, %v4464_v54  ;;  %4540 = vmatprep.mubr.msk.f32.mxu1 %vm69_vm0, %v7080_v1  ;;  %v7088_v25 = vpop.permute.xlu1 %2280  ;;  %4667 = vmatpush3.msra.mxu1 %v6719_v42  ;;  %v7858_v16 = vld [vmem:[#allocation14_spill] sm:$0xff] }
 0x88d   :  { %4541 = vmatmul.mubr.msk.f32.gmra.mxu1 %vm69_vm0, %v7080_v1  ;;  %vm2399_vm13 = vcmp.eq.s32.totalorder %v5247_v17, %v7088_v25  ;;  %vm2398_vm3 = vcmp.eq.s32.totalorder %v5244_v13, %v7088_v25  ;;  %4652 = vmatprep.subr.mxu1 %v6724_v24 }
 0x88e   :  { %v7099_v36 = vsub.f32 %v6334_v6, %v4466_v7  ;;  %3926 = vmatprep.mubr.msk.f32.mxu0 %vm2399_vm13, %v7808_v30  ;;  %4668 = vmatpush3.msra.mxu1 %v6775_v37 }
 0x88f   :  { %3927 = vmatmul.mubr.msk.f32.gmra.mxu0 %vm2398_vm3, %v7808_v30  ;;  %4653 = vmatprep.subr.mxu1 %v6784_v43 }
 0x890   :  { %4542 = vmatprep.mubr.msk.f32.mxu1 %vm69_vm0, %v7099_v36  ;;  %4669 = vmatpush3.msra.mxu1 %v6791_v62 }
 0x891   :  { %v4467_v26 = vpop.f32.mrf.mxu0  ;;  %4543 = vmatmul.mubr.msk.f32.gmra.mxu1 %vm69_vm0, %v7099_v36  ;;  %4654 = vmatprep.subr.mxu1 %v6802_v12 }
 0x892   :  { %4670 = vmatpush3.msra.mxu1 %v6814_v44 }
 0x893   :  { %v4468_v6 = vpop.f32.mrf.mxu0  ;;  %4655 = vmatprep.subr.mxu1 %v6820_v8 }
 0x894   :  { %v4469_v48 = vadd.f32 %v4468_v6, %v4467_v26  ;;  %4671 = vmatpush3.msra.mxu1 %v6837_v46 }
 0x895   :  { %v4470_v42 = vpop.f32.mrf.mxu0  ;;  %4656 = vmatprep.subr.mxu1 %v6844_v4 }
 0x896   :  { %v7116_v24 = vsub.f32 %v6341_v21, %v4469_v48  ;;  %4672 = vmatpush3.msra.mxu1 %v6856_v29  ;;  %v4763_v48 = vld [vmem:[%s7747_s2] sm:$0xff]  ;;  %s4803_s2 = smov [#allocation2]  }
 0x897   :  { %v4471_v37 = vpop.f32.mrf.mxu0  ;;  %4657 = vmatprep.subr.mxu1 %v6862_v60  ;;  %s3520_s24 = sshll.u32 %s4803_s2, 4  ;;  %s3521_s24 = int_to_ptr.vmem [resolvable:$true] %s3520_s24 }
 0x898   :  { %v4472_v43 = vadd.f32 %v4471_v37, %v4470_v42  ;;  %4544 = vmatprep.mubr.msk.f32.mxu1 %vm69_vm0, %v7116_v24  ;;  %4673 = vmatpush3.msra.mxu1 %v6868_v40  ;;  %s4780_s25 = scalar_lea.vmem %s3521_s24, 64  ;;  %p4785_p1 = scmp.lt.s32.totalorder %s3521_s24, %s3521_s24 }
 0x899   :  { %v4473_v62 = vpop.f32.mrf.mxu0  ;;  %4545 = vmatmul.mubr.msk.f32.gmra.mxu1 %vm69_vm0, %v7116_v24  ;;  %4658 = vmatprep.subr.mxu1 %v6876_v45  ;;  %p4781_p0 = scmp.ne.s32.totalorder %s3521_s24, %s4780_s25  ;;  %p4786_p2 = scmp.lt.s32.totalorder %s4780_s25, %s4780_s25 }
 0x89a   :  { %v7127_v21 = vsub.f32 %v6348_v27, %v4472_v43  ;;  %4674 = vmatpush3.msra.mxu1 %v6884_v33 }
 0x89b   :  { %v4474_v12 = vpop.f32.mrf.mxu0  ;;  %4659 = vmatprep.subr.mxu1 %v6890_v20  ;;  %p4787_p3 = por %p4786_p2, %p4785_p1 }
 0x89c   :  { %v4475_v44 = vadd.f32 %v4474_v12, %v4473_v62  ;;  %4546 = vmatprep.mubr.msk.f32.mxu1 %vm69_vm0, %v7127_v21  ;;  %4675 = vmatpush3.msra.mxu1 %v6896_v5  ;;  %v7855_v5 = vld [vmem:[#allocation21_spill] sm:$0xff] }
 0x89d   :  { %v4476_v8 = vpop.f32.mrf.mxu0  ;;  %4547 = vmatmul.mubr.msk.f32.gmra.mxu1 %vm69_vm0, %v7127_v21  ;;  %4660 = vmatprep.subr.mxu1 %v6904_v52  ;;  %p4788_p4 = pnand %p4787_p3, %p4781_p0 }
 0x89e   :  { %v7138_v27 = vsub.f32 %v6355_v28, %v4475_v44  ;;  %4676 = vmatpush3.msra.mxu1 %v6912_v55 }
 0x89f   :  { %v4477_v46 = vpop.f32.mrf.mxu0  ;;  %4661 = vmatprep.subr.mxu1 %v6918_v59 }
 0x8a0   :  { %v4478_v4 = vadd.f32 %v4477_v46, %v4476_v8  ;;  %4548 = vmatprep.mubr.msk.f32.mxu1 %vm69_vm0, %v7138_v27  ;;  %4677 = vmatpush3.msra.mxu1 %v6924_v11 }
 0x8a1   :  { %4549 = vmatmul.mubr.msk.f32.gmra.mxu1 %vm69_vm0, %v7138_v27  ;;  %4662 = vmatprep.subr.mxu1 %v6932_v10 }
 0x8a2   :  { %v7149_v29 = vsub.f32 %v6362_v31, %v4478_v4  ;;  %4678 = vmatpush3.msra.mxu1 %v6940_v22  ;;  %v2357_v22 = vrot.slane %v7071_v41, %v5639_v2  ;;  %v7860_v4 = vld [vmem:[#allocation15_spill] sm:$0xff] }
 0x8a3   :  { %4663 = vmatprep.subr.mxu1 %v6946_v14  ;;  %v2362_v14 = vrot.slane %v7088_v25, %v5647_v39  ;;  %v7859_v25 = vld [vmem:[#allocation5_spill] sm:$0xff] }
 0x8a4   :  { %4550 = vmatprep.mubr.msk.f32.mxu1 %vm69_vm0, %v7149_v29  ;;  %4679 = vmatpush3.msra.mxu1 %v6952_v63  ;;  %v2358_v63 = vsel %vm7851_vm10, %v2357_v22, %v7066_v56  ;;  %v2967_v26 = vsub.s32 3, %v7859_v25  ;;  %v2971_v6 = vsub.s32 7, %v7859_v25 }
 0x8a5   :  { %4551 = vmatmul.mubr.msk.f32.gmra.mxu1 %vm69_vm0, %v7149_v29  ;;  %4664 = vmatprep.subr.mxu1 %v6977_v61 }
 0x8a6   :  { %4680 = vmatpush3.msra.mxu1 %v6982_v58  ;;  %v2363_v58 = vsel %vm7852_vm7, %v2362_v14, %v2358_v63  ;;  %v2968_v42 = vrot.slane %v4763_v48, %v2967_v26  ;;  %v2972_v37 = vrot.slane %v4763_v48, %v2971_v6 }
 0x8a7   :  { %4665 = vmatprep.subr.mxu1 %v6993_v0  ;;  %v7854_v0 = vld [vmem:[#allocation20_spill] sm:$0xff] }
 0x8a8   :  { %4681 = vmatpush3.msra.mxu1 %v7000_v23  ;;  %v7215_v12 = vrot.slane %v2968_v42, %v2967_v26  ;;  %v7217_v44 = vrot.slane %v2972_v37, %v2967_v26 }
 0x8d1   :  { %v2289_v10 = vpop.permute.xlu1 %2288 }
 0x8d2   :  { %v2367_v11 = vrot.slane %v2289_v10, %v5654_v18  ;;  %vm2401_vm15 = vcmp.eq.s32.totalorder %v5247_v17, %v2289_v10  ;;  %vm2400_vm1 = vcmp.eq.s32.totalorder %v5244_v13, %v2289_v10 }
 0x8d3   :  { %v4479_v61 = vpop.f32.mrf.mxu0  ;;  %3928 = vmatprep.mubr.msk.f32.mxu0 %vm2401_vm15, %v7808_v30 }
 0x8d4   :  { %v2368_v28 = vsel %vm7853_vm12, %v2367_v11, %v2363_v58  ;;  %3929 = vmatmul.mubr.msk.f32.gmra.mxu0 %vm2400_vm1, %v7808_v30 }
 0x8d5   :  { %2369 = vst [vmem:[#allocation2 + $0x2] sm:$0x1] %v2368_v28  ;;  %v4480_v31 = vpop.f32.mrf.mxu0 }
 0x8d6   :  { %v4481_v23 = vadd.f32 %v4480_v31, %v4479_v61 }
 0x8d8   :  { %v7176_v60 = vsub.f32 %v7854_v0, %v4481_v23 }
 0x8da   :  { %v4482_v40 = vpop.f32.mrf.mxu0  ;;  %4552 = vmatprep.mubr.msk.f32.mxu1 %vm69_vm0, %v7176_v60 }
 0x8db   :  { %4553 = vmatmul.mubr.msk.f32.gmra.mxu1 %vm69_vm0, %v7176_v60 }
 0x8dc   :  { %v4483_v45 = vpop.f32.mrf.mxu0 }
 0x8dd   :  { %v4484_v33 = vadd.f32 %v4483_v45, %v4482_v40  ;;  %v7861_v40 = vld [vmem:[#allocation16_spill] sm:$0xff] }
 0x8de   :  { %v4485_v20 = vpop.f32.mrf.mxu0 }
 0x8df   :  { %v7183_v52 = vsub.f32 %v7855_v5, %v4484_v33 }
 0x8e0   :  { %v4486_v55 = vpop.f32.mrf.mxu0 }
 0x8e1   :  { %v4487_v59 = vadd.f32 %v4486_v55, %v4485_v20  ;;  %4554 = vmatprep.mubr.msk.f32.mxu1 %vm69_vm0, %v7183_v52 }
 0x8e2   :  { %v4488_v49 = vpop.f32.mrf.mxu0  ;;  %4555 = vmatmul.mubr.msk.f32.gmra.mxu1 %vm69_vm0, %v7183_v52 }
 0x8e3   :  { %v7190_v38 = vsub.f32 %v7856_v34, %v4487_v59 }
 0x8e4   :  { %v4489_v57 = vpop.f32.mrf.mxu0 }
 0x8e5   :  { %v4490_v50 = vadd.f32 %v4489_v57, %v4488_v49  ;;  %4556 = vmatprep.mubr.msk.f32.mxu1 %vm69_vm0, %v7190_v38  ;;  %v7862_v57 = vld [vmem:[#allocation18_spill] sm:$0xff] }
 0x8e6   :  { %v4491_v56 = vpop.f32.mrf.mxu0  ;;  %4557 = vmatmul.mubr.msk.f32.gmra.mxu1 %vm69_vm0, %v7190_v38 }
 0x8e7   :  { %v7197_v19 = vsub.f32 %v7857_v9, %v4490_v50 }
 0x8e8   :  { %v4492_v41 = vpop.f32.mrf.mxu0 }
 0x8e9   :  { %v4493_v54 = vadd.f32 %v4492_v41, %v4491_v56  ;;  %4558 = vmatprep.mubr.msk.f32.mxu1 %vm69_vm0, %v7197_v19 }
 0x8ea   :  { %4559 = vmatmul.mubr.msk.f32.gmra.mxu1 %vm69_vm0, %v7197_v19 }
 0x8eb   :  { %v7204_v7 = vsub.f32 %v7858_v16, %v4493_v54 }
 0x8ed   :  { %4560 = vmatprep.mubr.msk.f32.mxu1 %vm69_vm0, %v7204_v7 }
 0x8ee   :  { %4561 = vmatmul.mubr.msk.f32.gmra.mxu1 %vm69_vm0, %v7204_v7 }
 0x946   :  { %v4494_v43 = vpop.f32.mrf.mxu0 }
 0x948   :  { %v4495_v62 = vpop.f32.mrf.mxu0 }
 0x949   :  { %v4496_v8 = vadd.f32 %v4495_v62, %v4494_v43  ;;  %v2870_v46 = vpop.f32.mrf.mxu1 }
 0x94a   :  { %v7223_v63 = vsub.f32 %v7215_v12, %v2870_v46 }
 0x94b   :  { %v7220_v22 = vsub.f32 %v7860_v4, %v4496_v8  ;;  %v4497_v14 = vpop.f32.mrf.mxu0  ;;  %v2872_v10 = vpop.f32.mrf.mxu1 }
 0x94c   :  { %v7226_v11 = vsub.f32 %v7217_v44, %v2872_v10 }
 0x94d   :  { %v4498_v58 = vpop.f32.mrf.mxu0  ;;  %v2876_v61 = vpop.f32.mrf.mxu1  ;;  %4562 = vmatprep.mubr.msk.f32.mxu1 %vm69_vm0, %v7220_v22 }
 0x94e   :  { %vm3015_vm8 = vcmp.le.f32.partialorder %v7223_v63, %v7226_v11  ;;  %v4499_v28 = vadd.f32 %v4498_v58, %v4497_v14  ;;  %4563 = vmatmul.mubr.msk.f32.gmra.mxu1 %vm69_vm0, %v7220_v22  ;;  %v7243_v33 = vsub.f32 %v7215_v12, %v2876_v61 }
 0x94f   :  { %v4500_v31 = vpop.f32.mrf.mxu0  ;;  %v2878_v23 = vpop.f32.mrf.mxu1  ;;  %v3016_v0 = vsel %vm3015_vm8, %v7223_v63, %v7226_v11 }
 0x950   :  { %v7240_v45 = vsub.f32 %v7861_v40, %v4499_v28  ;;  %v7246_v20 = vsub.f32 %v7217_v44, %v2878_v23  ;;  %3018 = vmin.index.xlane.f32.xlu1 %v3016_v0 }
 0x951   :  { %v4501_v5 = vpop.f32.mrf.mxu0  ;;  %v2882_v55 = vpop.f32.mrf.mxu1 }
 0x952   :  { %vm3023_vm5 = vcmp.le.f32.partialorder %v7243_v33, %v7246_v20  ;;  %v4502_v59 = vadd.f32 %v4501_v5, %v4500_v31  ;;  %4564 = vmatprep.mubr.msk.f32.mxu1 %vm69_vm0, %v7240_v45  ;;  %v7263_v56 = vsub.f32 %v7215_v12, %v2882_v55  ;;  %v7863_v55 = vld [vmem:[#allocation19_spill] sm:$0xff] }
 0x953   :  { %v2884_v49 = vpop.f32.mrf.mxu1  ;;  %4565 = vmatmul.mubr.msk.f32.gmra.mxu1 %vm69_vm0, %v7240_v45  ;;  %v3024_v34 = vsel %vm3023_vm5, %v7243_v33, %v7246_v20 }
 0x954   :  { %v7260_v50 = vsub.f32 %v7862_v57, %v4502_v59  ;;  %v7266_v9 = vsub.f32 %v7217_v44, %v2884_v49  ;;  %3026 = vmin.index.xlane.f32.xlu0 %v3024_v34 }
 0x956   :  { %vm3031_vm9 = vcmp.le.f32.partialorder %v7263_v56, %v7266_v9  ;;  %4566 = vmatprep.mubr.msk.f32.mxu1 %vm69_vm0, %v7260_v50 }
 0x957   :  { %4567 = vmatmul.mubr.msk.f32.gmra.mxu1 %vm69_vm0, %v7260_v50  ;;  %v3032_v41 = vsel %vm3031_vm9, %v7263_v56, %v7266_v9 }
 0x958   :  { %3034 = vmin.index.xlane.f32.xlu1 %v3032_v41 }
 0x959   :  { %v2888_v54 = vpop.f32.mrf.mxu1 }
 0x95a   :  { %v7280_v25 = vsub.f32 %v7215_v12, %v2888_v54 }
 0x95b   :  { %v2890_v16 = vpop.f32.mrf.mxu1 }
 0x95c   :  { %v7283_v26 = vsub.f32 %v7217_v44, %v2890_v16 }
 0x95d   :  { %v2894_v6 = vpop.f32.mrf.mxu1 }
 0x95e   :  { %vm3039_vm4 = vcmp.le.f32.partialorder %v7280_v25, %v7283_v26  ;;  %v7293_v37 = vsub.f32 %v7215_v12, %v2894_v6 }
 0x95f   :  { %v2896_v48 = vpop.f32.mrf.mxu1  ;;  %v3040_v42 = vsel %vm3039_vm4, %v7280_v25, %v7283_v26 }
 0x960   :  { %v7296_v43 = vsub.f32 %v7217_v44, %v2896_v48  ;;  %3042 = vmin.index.xlane.f32.xlu1 %v3040_v42 }
 0x961   :  { %v2900_v62 = vpop.f32.mrf.mxu1 }
 0x962   :  { %vm3047_vm14 = vcmp.le.f32.partialorder %v7293_v37, %v7296_v43  ;;  %v7306_v4 = vsub.f32 %v7215_v12, %v2900_v62 }
 0x963   :  { %v2902_v8 = vpop.f32.mrf.mxu1  ;;  %v3048_v46 = vsel %vm3047_vm14, %v7293_v37, %v7296_v43  ;;  %v3049_v33 = vsel %vm3047_vm14, %v5244_v13, %v5247_v17 }
 0x964   :  { %v7309_v14 = vsub.f32 %v7217_v44, %v2902_v8  ;;  %3050 = vmin.index.xlane.f32.xlu0 %v3048_v46 }
 0x965   :  { %v2906_v10 = vpop.f32.mrf.mxu1 }
 0x966   :  { %vm3055_vm11 = vcmp.le.f32.partialorder %v7306_v4, %v7309_v14  ;;  %v7319_v28 = vsub.f32 %v7215_v12, %v2906_v10 }
 0x967   :  { %v2908_v58 = vpop.f32.mrf.mxu1  ;;  %v3056_v61 = vsel %vm3055_vm11, %v7306_v4, %v7309_v14 }
 0x968   :  { %v7322_v31 = vsub.f32 %v7217_v44, %v2908_v58  ;;  %3058 = vmin.index.xlane.f32.xlu1 %v3056_v61 }
 0x96a   :  { %vm3063_vm2 = vcmp.le.f32.partialorder %v7319_v28, %v7322_v31 }
 0x96b   :  { %v3064_v23 = vsel %vm3063_vm2, %v7319_v28, %v7322_v31  ;;  %v3065_v25 = vsel %vm3063_vm2, %v5244_v13, %v5247_v17  ;;  %v3017_v31 = vsel %vm3015_vm8, %v5244_v13, %v5247_v17 }
 0x96c   :  { %3066 = vmin.index.xlane.f32.xlu1 %v3064_v23 }
 0x994   :  { %v4503_v0 = vpop.f32.mrf.mxu0 }
 0x996   :  { %v4504_v40 = vpop.f32.mrf.mxu0 }
 0x997   :  { %v4505_v5 = vadd.f32 %v4504_v40, %v4503_v0 }
 0x999   :  { %v7332_v59 = vsub.f32 %v7863_v55, %v4505_v5 }
 0x99b   :  { %v2912_v49 = vpop.f32.mrf.mxu1  ;;  %4568 = vmatprep.mubr.msk.f32.mxu1 %vm69_vm0, %v7332_v59 }
 0x99c   :  { %4569 = vmatmul.mubr.msk.f32.gmra.mxu1 %vm69_vm0, %v7332_v59  ;;  %v7339_v57 = vsub.f32 %v7215_v12, %v2912_v49 }
 0x99d   :  { %v2914_v34 = vpop.f32.mrf.mxu1 }
 0x99e   :  { %v7342_v41 = vsub.f32 %v7217_v44, %v2914_v34 }
 0x9a0   :  { %vm3071_vm13 = vcmp.le.f32.partialorder %v7339_v57, %v7342_v41 }
 0x9a1   :  { %v3072_v54 = vsel %vm3071_vm13, %v7339_v57, %v7342_v41 }
 0x9a2   :  { %v2918_v16 = vpop.f32.mrf.mxu1  ;;  %3074 = vmin.index.xlane.f32.xlu1 %v3072_v54 }
 0x9a3   :  { %v7352_v48 = vsub.f32 %v7215_v12, %v2918_v16 }
 0x9a4   :  { %v2920_v6 = vpop.f32.mrf.mxu1 }
 0x9a5   :  { %v7355_v42 = vsub.f32 %v7217_v44, %v2920_v6 }
 0x9a6   :  { %v2924_v62 = vpop.f32.mrf.mxu1 }
 0x9a7   :  { %vm3079_vm3 = vcmp.le.f32.partialorder %v7352_v48, %v7355_v42  ;;  %v7365_v10 = vsub.f32 %v7215_v12, %v2924_v62 }
 0x9a8   :  { %v2926_v8 = vpop.f32.mrf.mxu1  ;;  %v3080_v46 = vsel %vm3079_vm3, %v7352_v48, %v7355_v42  ;;  %v3057_v48 = vsel %vm3055_vm11, %v5244_v13, %v5247_v17 }
 0x9a9   :  { %v7368_v58 = vsub.f32 %v7217_v44, %v2926_v8  ;;  %3082 = vmin.index.xlane.f32.xlu0 %v3080_v46  ;;  %v3025_v46 = vsel %vm3023_vm5, %v5244_v13, %v5247_v17 }
 0x9aa   :  { %v2930_v61 = vpop.f32.mrf.mxu1 }
 0x9ab   :  { %vm3087_vm10 = vcmp.le.f32.partialorder %v7365_v10, %v7368_v58  ;;  %v7378_v40 = vsub.f32 %v7215_v12, %v2930_v61 }
 0x9ac   :  { %v2932_v23 = vpop.f32.mrf.mxu1  ;;  %v3088_v0 = vsel %vm3087_vm10, %v7365_v10, %v7368_v58  ;;  %v3089_v11 = vsel %vm3087_vm10, %v5244_v13, %v5247_v17  ;;  %v3073_v10 = vsel %vm3071_vm13, %v5244_v13, %v5247_v17  ;;  %vm7871_vm10 = vcmask 326912  }
 0x9ad   :  { %v7381_v5 = vsub.f32 %v7217_v44, %v2932_v23  ;;  %3090 = vmin.index.xlane.f32.xlu0 %v3088_v0  ;;  %v3041_v0 = vsel %vm3039_vm4, %v5244_v13, %v5247_v17 }
 0x9ae   :  { %v2936_v55 = vpop.f32.mrf.mxu1 }
 0x9af   :  { %vm3095_vm15 = vcmp.le.f32.partialorder %v7378_v40, %v7381_v5  ;;  %v7391_v54 = vsub.f32 %v7215_v12, %v2936_v55 }
 0x9b0   :  { %v2938_v49 = vpop.f32.mrf.mxu1  ;;  %v3096_v34 = vsel %vm3095_vm15, %v7378_v40, %v7381_v5  ;;  %v3097_v42 = vsel %vm3095_vm15, %v5244_v13, %v5247_v17 }
 0x9b1   :  { %v7394_v16 = vsub.f32 %v7217_v44, %v2938_v49  ;;  %3098 = vmin.index.xlane.f32.xlu0 %v3096_v34 }
 0x9b3   :  { %vm3103_vm1 = vcmp.le.f32.partialorder %v7391_v54, %v7394_v16 }
 0x9b4   :  { %v3104_v6 = vsel %vm3103_vm1, %v7391_v54, %v7394_v16  ;;  %v3105_v14 = vsel %vm3103_vm1, %v5244_v13, %v5247_v17 }
 0x9b5   :  { %3106 = vmin.index.xlane.f32.xlu0 %v3104_v6 }
 0x9d9   :  { %v3019_v62 = vpop.xlane.xlu1 %3018 }
 0x9da   :  { %4732 = vset.pattern.permute.xlu0 %v3019_v62 }
 0x9dd   :  { %v3027_v8 = vpop.xlane.xlu0 %3026 }
 0x9de   :  { %4733 = vset.pattern.permute.xlu1 %v3027_v8 }
 0x9e1   :  { %v3035_v61 = vpop.xlane.xlu1 %3034 }
 0x9e2   :  { %3029 = vperm.xlu1 %4733, %v3025_v46  }
 0x9e9   :  { %v3043_v23 = vpop.xlane.xlu1 %3042 }
 0x9ea   :  { %4735 = vset.pattern.permute.xlu1 %v3043_v23 }
 0x9ed   :  { %v3051_v55 = vpop.xlane.xlu0 %3050 }
 0x9ee   :  { %3045 = vperm.xlu1 %4735, %v3041_v0  }
 0x9f1   :  { %v3059_v49 = vpop.xlane.xlu1 %3058 }
 0x9f2   :  { %4736 = vset.pattern.permute.xlu1 %v3051_v55  ;;  %v3081_v55 = vsel %vm3079_vm3, %v5244_v13, %v5247_v17  ;;  %vm7870_vm3 = vcmask 261312  }
 0x9f5   :  { %v3067_v20 = vpop.xlane.xlu1 %3066 }
 0x9f6   :  { %3053 = vperm.xlu1 %4736, %v3049_v33   ;;  %v3033_v33 = vsel %vm3031_vm9, %v5244_v13, %v5247_v17 }
 0x9fa   :  { %4738 = vset.pattern.permute.xlu1 %v3067_v20 }
 0x9fe   :  { %3069 = vperm.xlu1 %4738, %v3065_v25  }
 0xa0e   :  { %v2942_v26 = vpop.f32.mrf.mxu1 }
 0xa0f   :  { %v3007_v6 = vsub.f32 %v7215_v12, %v2942_v26 }
 0xa10   :  { %v2944_v34 = vpop.f32.mrf.mxu1 }
 0xa11   :  { %v3008_v62 = vsub.f32 %v7217_v44, %v2944_v34 }
 0xa13   :  { %vm3111_vm7 = vcmp.le.f32.partialorder %v3007_v6, %v3008_v62  ;;  %v2948_v8 = vpop.f32.mrf.mxu1 }
 0xa14   :  { %v3112_v37 = vsel %vm3111_vm7, %v3007_v6, %v3008_v62  ;;  %v3009_v46 = vsub.f32 %v7215_v12, %v2948_v8  ;;  %v3113_v16 = vsel %vm3111_vm7, %v5244_v13, %v5247_v17  ;;  %v7864_v8 = vld [vmem:[#allocation6_spill] sm:$0xff] }
 0xa15   :  { %3114 = vmin.index.xlane.f32.xlu0 %v3112_v37  ;;  %v2950_v43 = vpop.f32.mrf.mxu1 }
 0xa16   :  { %v3010_v23 = vsub.f32 %v7217_v44, %v2950_v43  ;;  %v7865_v43 = vld [vmem:[#allocation7_spill] sm:$0xff] }
 0xa17   :  { %v2954_v58 = vpop.f32.mrf.mxu1 }
 0xa18   :  { %vm3119_vm12 = vcmp.le.f32.partialorder %v3009_v46, %v3010_v23 }
 0xa19   :  { %v3120_v28 = vsel %vm3119_vm12, %v3009_v46, %v3010_v23  ;;  %v2956_v40 = vpop.f32.mrf.mxu1  ;;  %v3121_v25 = vsel %vm3119_vm12, %v5244_v13, %v5247_v17  ;;  %vm7874_vm12 = vcmask 392512  }
 0xa1a   :  { %3122 = vmin.index.xlane.f32.xlu0 %v3120_v28 }
 0xa2b   :  { %v3075_v9 = vpop.xlane.xlu1 %3074 }
 0xa30   :  { %3021 = vperm.xlu0 %4732, %v3017_v31   ;;  %v7866_v31 = vld [vmem:[#allocation8_spill] sm:$0xff] }
 0xa32   :  { %v3083_v0 = vpop.xlane.xlu0 %3082 }
 0xa33   :  { %4740 = vset.pattern.permute.xlu1 %v3083_v0 }
 0xa34   :  { %4734 = vset.pattern.permute.xlu0 %v3035_v61 }
 0xa36   :  { %v3091_v63 = vpop.xlane.xlu0 %3090 }
 0xa37   :  { %3085 = vperm.xlu1 %4740, %v3081_v55   ;;  %v7867_v55 = vld [vmem:[#allocation9_spill] sm:$0xff] }
 0xa38   :  { %3037 = vperm.xlu0 %4734, %v3033_v33  }
 0xa3a   :  { %v3099_v56 = vpop.xlane.xlu0 %3098 }
 0xa3b   :  { %4741 = vset.pattern.permute.xlu1 %v3091_v63  ;;  %v7868_v63 = vld [vmem:[#allocation10_spill] sm:$0xff] }
 0xa3c   :  { %4737 = vset.pattern.permute.xlu0 %v3059_v49 }
 0xa3e   :  { %v3107_v4 = vpop.xlane.xlu0 %3106 }
 0xa3f   :  { %3093 = vperm.xlu1 %4741, %v3089_v11  }
 0xa40   :  { %3061 = vperm.xlu0 %4737, %v3057_v48  }
 0xa43   :  { %4742 = vset.pattern.permute.xlu1 %v3099_v56 }
 0xa44   :  { %4739 = vset.pattern.permute.xlu0 %v3075_v9 }
 0xa47   :  { %3101 = vperm.xlu1 %4742, %v3097_v42  }
 0xa48   :  { %3077 = vperm.xlu0 %4739, %v3073_v10  }
 0xa4b   :  { %4743 = vset.pattern.permute.xlu1 %v3107_v4 }
 0xa4f   :  { %3109 = vperm.xlu1 %4743, %v3105_v14   ;;  %v7872_v14 = vld [vmem:[#allocation11_spill] sm:$0xff] }
 0xa5c   :  { %v2960_v5 = vpop.f32.mrf.mxu1 }
 0xa5d   :  { %v7473_v57 = vsub.f32 %v7215_v12, %v2960_v5  ;;  %v3030_v26 = vpop.permute.xlu1 %3029 }
 0xa5e   :  { %v2962_v61 = vpop.f32.mrf.mxu1  ;;  %v3150_v37 = vrot.slane %v3030_v26, %v7864_v8  ;;  %vm3226_vm4 = vcmp.eq.s32.totalorder %v5247_v17, %v3030_v26  ;;  %vm3225_vm14 = vcmp.eq.s32.totalorder %v5244_v13, %v3030_v26  ;;  %v7527_v26 = vsub.f32 %v7215_v12, %v2954_v58 }
 0xa5f   :  { %v7470_v49 = vsub.f32 %v7217_v44, %v2962_v61  ;;  %v7873_v61 = vld [vmem:[#allocation12_spill] sm:$0xff] }
 0xa61   :  { %vm3135_vm8 = vcmp.le.f32.partialorder %v7473_v57, %v7470_v49 }
 0xa62   :  { %v3136_v41 = vsel %vm3135_vm8, %v7473_v57, %v7470_v49 }
 0xa67   :  { %3138 = vmin.index.xlane.f32.xlu0 %v3136_v41 }
 0xa69   :  { %v3046_v62 = vpop.permute.xlu1 %3045 }
 0xa6a   :  { %v3160_v33 = vrot.slane %v3046_v62, %v7867_v55  ;;  %vm3230_vm13 = vcmp.eq.s32.totalorder %v5247_v17, %v3046_v62  ;;  %vm3229_vm15 = vcmp.eq.s32.totalorder %v5244_v13, %v3046_v62 }
 0xa71   :  { %v3054_v46 = vpop.permute.xlu1 %3053 }
 0xa72   :  { %v3165_v11 = vrot.slane %v3054_v46, %v7868_v63  ;;  %vm3232_vm1 = vcmp.eq.s32.totalorder %v5247_v17, %v3054_v46  ;;  %vm3231_vm7 = vcmp.eq.s32.totalorder %v5244_v13, %v3054_v46 }
 0xa79   :  { %v3070_v9 = vpop.permute.xlu1 %3069 }
 0xa7a   :  { %v3175_v41 = vrot.slane %v3070_v9, %v7873_v61 }
 0xa9e   :  { %v3115_v54 = vpop.xlane.xlu0 %3114 }
 0xa9f   :  { %4744 = vset.pattern.permute.xlu1 %v3115_v54 }
 0xaa3   :  { %v3123_v20 = vpop.xlane.xlu0 %3122  ;;  %3117 = vperm.xlu1 %4744, %v3113_v16   ;;  %v7522_v16 = vsub.f32 %v7217_v44, %v2956_v40 }
 0xaa4   :  { %4745 = vset.pattern.permute.xlu0 %v3123_v20 }
 0xaa8   :  { %3125 = vperm.xlu0 %4745, %v3121_v25  }
 0xaab   :  { %v3022_v34 = vpop.permute.xlu0 %3021 }
 0xaac   :  { %v3146_v28 = vrot.slane %v3022_v34, %v7865_v43  ;;  %vm3223_vm5 = vcmp.eq.s32.totalorder %v5244_v13, %v3022_v34  ;;  %vm3224_vm9 = vcmp.eq.s32.totalorder %v5247_v17, %v3022_v34 }
 0xaad   :  { %4042 = vmatprep.mubr.msk.f32.mxu0 %vm3224_vm9, %v7808_v30  ;;  %vm7875_vm9 = vcmask 458112  }
 0xaae   :  { %v3151_v6 = vsel %vm563_vm6, %v3150_v37, %v3146_v28  ;;  %4043 = vmatmul.mubr.msk.f32.vlgmr.msra.gmra.mxu0 %vm3223_vm5, %v7808_v30  ;;  %vm7869_vm6 = vcmask 195712  }
 0xaaf   :  { %4044 = vmatprep.mubr.msk.f32.mxu0 %vm3226_vm4, %v7808_v30 }
 0xab2   :  { %4045 = vmatmul.mubr.msk.f32.gmra.mxu0 %vm3225_vm14, %v7808_v30  ;;  %v3086_v4 = vpop.permute.xlu1 %3085  ;;  %vm3236_vm14 = vcmp.eq.s32.totalorder %v5247_v17, %v3070_v9 }
 0xab3   :  { %v3038_v23 = vpop.permute.xlu0 %3037  ;;  %v3185_v8 = vrot.slane %v3086_v4, %v5449_v32 }
 0xab4   :  { %v3155_v0 = vrot.slane %v3038_v23, %v7866_v31  ;;  %vm3228_vm11 = vcmp.eq.s32.totalorder %v5247_v17, %v3038_v23  ;;  %vm3227_vm2 = vcmp.eq.s32.totalorder %v5244_v13, %v3038_v23 }
 0xab5   :  { %4046 = vmatprep.mubr.msk.f32.mxu0 %vm3228_vm11, %v7808_v30  ;;  %vm3127_vm11 = vcmp.le.f32.partialorder %v7527_v26, %v7522_v16 }
 0xab6   :  { %v3156_v48 = vsel %vm7869_vm6, %v3155_v0, %v3151_v6  ;;  %4047 = vmatmul.mubr.msk.f32.gmra.mxu0 %vm3227_vm2, %v7808_v30  ;;  %vm3235_vm2 = vcmp.eq.s32.totalorder %v5244_v13, %v3070_v9  ;;  %vm7876_vm6 = vcmask 523712   ;;  %v3128_v37 = vsel %vm3127_vm11, %v7527_v26, %v7522_v16 }
 0xab7   :  { %v3161_v56 = vsel %vm7870_vm3, %v3160_v33, %v3156_v48  ;;  %4048 = vmatprep.mubr.msk.f32.mxu0 %vm3230_vm13, %v7808_v30  ;;  %vm7877_vm3 = vcmask 589312   ;;  %v3137_v6 = vsel %vm3135_vm8, %v5244_v13, %v5247_v17 }
 0xab8   :  { %v3166_v42 = vsel %vm7871_vm10, %v3165_v11, %v3161_v56  ;;  %vm7878_vm10 = vcmask 654912   ;;  %v4764_v56 = vld [vmem:[%s7745_s0] sm:$0xff] }
 0xaba   :  { %4049 = vmatmul.mubr.msk.f32.gmra.mxu0 %vm3229_vm15, %v7808_v30  ;;  %v3094_v25 = vpop.permute.xlu1 %3093 }
 0xabb   :  { %v3062_v10 = vpop.permute.xlu0 %3061  ;;  %4050 = vmatprep.mubr.msk.f32.mxu0 %vm3232_vm1, %v7808_v30  ;;  %v3190_v12 = vrot.slane %v3094_v25, %v5452_v35  ;;  %vm7879_vm1 = vcmask 720512  }
 0xabc   :  { %v3170_v5 = vrot.slane %v3062_v10, %v7872_v14  ;;  %vm3234_vm5 = vcmp.eq.s32.totalorder %v5247_v17, %v3062_v10  ;;  %vm3233_vm4 = vcmp.eq.s32.totalorder %v5244_v13, %v3062_v10 }
 0xabe   :  { %v3171_v54 = vsel %vm7874_vm12, %v3170_v5, %v3166_v42  ;;  %4051 = vmatmul.mubr.msk.f32.gmra.mxu0 %vm3231_vm7, %v7808_v30  ;;  %vm3240_vm7 = vcmp.eq.s32.totalorder %v5247_v17, %v3086_v4  ;;  %vm3239_vm12 = vcmp.eq.s32.totalorder %v5244_v13, %v3086_v4 }
 0xabf   :  { %4052 = vmatprep.mubr.msk.f32.mxu0 %vm3234_vm5, %v7808_v30  ;;  %v3176_v20 = vsel %vm7875_vm9, %v3175_v41, %v3171_v54  ;;  %vm3242_vm5 = vcmp.eq.s32.totalorder %v5247_v17, %v3094_v25  ;;  %vm3241_vm9 = vcmp.eq.s32.totalorder %v5244_v13, %v3094_v25 }
 0xac2   :  { %4053 = vmatmul.mubr.msk.f32.gmra.mxu0 %vm3233_vm4, %v7808_v30  ;;  %v3102_v44 = vpop.permute.xlu1 %3101 }
 0xac3   :  { %v3078_v34 = vpop.permute.xlu0 %3077  ;;  %4054 = vmatprep.mubr.msk.f32.mxu0 %vm3236_vm14, %v7808_v30  ;;  %vm3244_vm4 = vcmp.eq.s32.totalorder %v5247_v17, %v3102_v44  ;;  %vm3243_vm14 = vcmp.eq.s32.totalorder %v5244_v13, %v3102_v44 }
 0xac4   :  { %v3180_v40 = vrot.slane %v3078_v34, %v5432_v15  ;;  %vm3238_vm13 = vcmp.eq.s32.totalorder %v5247_v17, %v3078_v34  ;;  %v3195_v15 = vrot.slane %v3102_v44, %v5624_v47  ;;  %vm3237_vm15 = vcmp.eq.s32.totalorder %v5244_v13, %v3078_v34 }
 0xac6   :  { %v3181_v58 = vsel %vm7876_vm6, %v3180_v40, %v3176_v20  ;;  %4055 = vmatmul.mubr.msk.f32.gmra.mxu0 %vm3235_vm2, %v7808_v30 }
 0xac7   :  { %v3186_v32 = vsel %vm7877_vm3, %v3185_v8, %v3181_v58  ;;  %3130 = vmin.index.xlane.f32.xlu1 %v3128_v37  ;;  %4056 = vmatprep.mubr.msk.f32.mxu0 %vm3238_vm13, %v7808_v30 }
 0xac8   :  { %v3191_v35 = vsel %vm7878_vm10, %v3190_v12, %v3186_v32  ;;  %vm7880_vm10 = vcmask 786112  }
 0xac9   :  { %v3196_v43 = vsel %vm7879_vm1, %v3195_v15, %v3191_v35 }
 0xaca   :  { %4057 = vmatmul.mubr.msk.f32.gmra.mxu0 %vm3237_vm15, %v7808_v30  ;;  %v3110_v47 = vpop.permute.xlu1 %3109  ;;  %vm7881_vm15 = vcmask 851712  }
 0xacb   :  { %4058 = vmatprep.mubr.msk.f32.mxu0 %vm3240_vm7, %v7808_v30  ;;  %vm3246_vm2 = vcmp.eq.s32.totalorder %v5247_v17, %v3110_v47  ;;  %vm3245_vm6 = vcmp.eq.s32.totalorder %v5244_v13, %v3110_v47  ;;  %v3200_v62 = vrot.slane %v3110_v47, %v5628_v51 }
 0xacd   :  { %v3201_v31 = vsel %vm7880_vm10, %v3200_v62, %v3196_v43 }
 0xace   :  { %4059 = vmatmul.mubr.msk.f32.gmra.mxu0 %vm3239_vm12, %v7808_v30  ;;  %vm7882_vm12 = vcmask 917312  }
 0xacf   :  { %4060 = vmatprep.mubr.msk.f32.mxu0 %vm3242_vm5, %v7808_v30 }
 0xad2   :  { %4061 = vmatmul.mubr.msk.f32.gmra.mxu0 %vm3241_vm9, %v7808_v30  ;;  %vm7883_vm9 = vcmask 982912  }
 0xad3   :  { %4062 = vmatprep.mubr.msk.f32.mxu0 %vm3244_vm4, %v7808_v30  ;;  %vm7884_vm4 = vcmask 1048512  }
 0xad6   :  { %4063 = vmatmul.mubr.msk.f32.gmra.mxu0 %vm3243_vm14, %v7808_v30 }
 0xad7   :  { %4064 = vmatprep.mubr.msk.f32.mxu0 %vm3246_vm2, %v7808_v30 }
 0xada   :  { %4065 = vmatmul.mubr.msk.f32.gmra.mxu0 %vm3245_vm6, %v7808_v30 }
 0xaf0   :  { %v3139_v28 = vpop.xlane.xlu0 %3138 }
 0xaf1   :  { %4747 = vset.pattern.permute.xlu0 %v3139_v28 }
 0xaf5   :  { %3141 = vperm.xlu0 %4747, %v3137_v6  }
 0xb1e   :  { %v3118_v46 = vpop.permute.xlu1 %3117 }
 0xb1f   :  { %v3205_v23 = vrot.slane %v3118_v46, %v5633_v53  ;;  %vm3247_vm13 = vcmp.eq.s32.totalorder %v5244_v13, %v3118_v46  ;;  %vm3248_vm3 = vcmp.eq.s32.totalorder %v5247_v17, %v3118_v46  ;;  %v3129_v53 = vsel %vm3127_vm11, %v5244_v13, %v5247_v17 }
 0xb20   :  { %4066 = vmatprep.mubr.msk.f32.mxu1 %vm3248_vm3, %v7808_v30 }
 0xb21   :  { %v7582_v0 = vsel %vm7881_vm15, %v3205_v23, %v3201_v31  ;;  %4067 = vmatmul.mubr.msk.f32.vlgmr.msra.gmra.mxu1 %vm3247_vm13, %v7808_v30 }
 0xb23   :  { %v7585_v49 = vpop.permute.xlu0 %3125 }
 0xb24   :  { %vm3249_vm8 = vcmp.eq.s32.totalorder %v5244_v13, %v7585_v49  ;;  %vm3250_vm1 = vcmp.eq.s32.totalorder %v5247_v17, %v7585_v49 }
 0xb25   :  { %4068 = vmatprep.mubr.msk.f32.mxu1 %vm3250_vm1, %v7808_v30 }
 0xb26   :  { %4069 = vmatmul.mubr.msk.f32.gmra.mxu1 %vm3249_vm8, %v7808_v30 }
 0xb50   :  { %v3131_v51 = vpop.xlane.xlu1 %3130 }
 0xb51   :  { %4746 = vset.pattern.permute.xlu1 %v3131_v51 }
 0xb55   :  { %3133 = vperm.xlu1 %4746, %v3129_v53  }
 0xb6e   :  { %v4602_v57 = vpop.f32.mrf.mxu0 }
 0xb70   :  { %v4603_v55 = vpop.f32.mrf.mxu0 }
 0xb71   :  { %v4604_v33 = vadd.f32 %v4603_v55, %v4602_v57 }
 0xb72   :  { %v4605_v63 = vpop.f32.mrf.mxu0 }
 0xb73   :  { %v3464_v11 = vsub.f32 %v7063_v3, %v4604_v33  ;;  %v4765_v3 = vld [vmem:[%s7745_s0 + $0x8] sm:$0xff] }
 0xb74   :  { %v4606_v48 = vpop.f32.mrf.mxu0 }
 0xb75   :  { %v3480_v9 = vsub.f32 %v4764_v56, %v3464_v11  ;;  %v4607_v42 = vadd.f32 %v4606_v48, %v4605_v63 }
 0xb76   :  { %v4608_v10 = vpop.f32.mrf.mxu0 }
 0xb77   :  { %3496 = vst.msk [vmem:[%s7748_s3] sm:$0xff] %vm69_vm0, %v3480_v9  ;;  %v3465_v4 = vsub.f32 %v7080_v1, %v4607_v42  ;;  %v4766_v1 = vld [vmem:[%s7745_s0 + $0x10] sm:$0xff] }
 0xb78   :  { %v4609_v14 = vpop.f32.mrf.mxu0 }
 0xb79   :  { %v3481_v5 = vsub.f32 %v4765_v3, %v3465_v4  ;;  %v4610_v61 = vadd.f32 %v4609_v14, %v4608_v10 }
 0xb7a   :  { %v4611_v41 = vpop.f32.mrf.mxu0 }
 0xb7b   :  { %3497 = vst.msk [vmem:[%s7748_s3 + $0x8] sm:$0xff] %vm69_vm0, %v3481_v5  ;;  %v3466_v54 = vsub.f32 %v7099_v36, %v4610_v61  ;;  %v4767_v36 = vld [vmem:[%s7745_s0 + $0x18] sm:$0xff] }
 0xb7c   :  { %v4612_v16 = vpop.f32.mrf.mxu0 }
 0xb7d   :  { %v3482_v20 = vsub.f32 %v4766_v1, %v3466_v54  ;;  %v4613_v25 = vadd.f32 %v4612_v16, %v4611_v41 }
 0xb7e   :  { %v4614_v26 = vpop.f32.mrf.mxu0 }
 0xb7f   :  { %3498 = vst.msk [vmem:[%s7748_s3 + $0x10] sm:$0xff] %vm69_vm0, %v3482_v20  ;;  %v3467_v34 = vsub.f32 %v7116_v24, %v4613_v25  ;;  %v4768_v24 = vld [vmem:[%s7745_s0 + $0x20] sm:$0xff]  ;;  %v4775_v25 = vld [vmem:[%s7745_s0 + $0x58] sm:$0xff] }
 0xb80   :  { %v4615_v44 = vpop.f32.mrf.mxu0 }
 0xb81   :  { %v3483_v40 = vsub.f32 %v4767_v36, %v3467_v34  ;;  %v4616_v8 = vadd.f32 %v4615_v44, %v4614_v26  ;;  %v3142_v34 = vpop.permute.xlu0 %3141 }
 0xb82   :  { %v4617_v12 = vpop.f32.mrf.mxu0  ;;  %vm3254_vm5 = vcmp.eq.s32.totalorder %v5247_v17, %v3142_v34  ;;  %vm3253_vm14 = vcmp.eq.s32.totalorder %v5244_v13, %v3142_v34 }
 0xb83   :  { %3499 = vst.msk [vmem:[%s7748_s3 + $0x18] sm:$0xff] %vm69_vm0, %v3483_v40  ;;  %v3468_v58 = vsub.f32 %v7127_v21, %v4616_v8  ;;  %v4769_v21 = vld [vmem:[%s7745_s0 + $0x28] sm:$0xff]  ;;  %v3220_v40 = vrot.slane %v3142_v34, %v5654_v18 }
 0xb84   :  { %v4618_v37 = vpop.f32.mrf.mxu0 }
 0xb85   :  { %v3484_v15 = vsub.f32 %v4768_v24, %v3468_v58  ;;  %v4619_v32 = vadd.f32 %v4618_v37, %v4617_v12 }
 0xb86   :  { %v4620_v35 = vpop.f32.mrf.mxu0 }
 0xb87   :  { %3500 = vst.msk [vmem:[%s7748_s3 + $0x20] sm:$0xff] %vm69_vm0, %v3484_v15  ;;  %v3469_v43 = vsub.f32 %v7138_v27, %v4619_v32  ;;  %v4770_v27 = vld [vmem:[%s7745_s0 + $0x30] sm:$0xff] }
 0xb88   :  { %v4621_v47 = vpop.f32.mrf.mxu0 }
 0xb89   :  { %v3485_v28 = vsub.f32 %v4769_v21, %v3469_v43  ;;  %v4622_v6 = vadd.f32 %v4621_v47, %v4620_v35 }
 0xb8a   :  { %v4623_v62 = vpop.f32.mrf.mxu0 }
 0xb8b   :  { %3501 = vst.msk [vmem:[%s7748_s3 + $0x28] sm:$0xff] %vm69_vm0, %v3485_v28  ;;  %v3470_v46 = vsub.f32 %v7149_v29, %v4622_v6  ;;  %v4771_v29 = vld [vmem:[%s7745_s0 + $0x38] sm:$0xff] }
 0xb8c   :  { %v4624_v23 = vpop.f32.mrf.mxu0 }
 0xb8d   :  { %v3486_v31 = vsub.f32 %v4770_v27, %v3470_v46  ;;  %v4625_v51 = vadd.f32 %v4624_v23, %v4623_v62 }
 0xb8e   :  { %v4626_v53 = vpop.f32.mrf.mxu0 }
 0xb8f   :  { %3502 = vst.msk [vmem:[%s7748_s3 + $0x30] sm:$0xff] %vm69_vm0, %v3486_v31  ;;  %v3471_v57 = vsub.f32 %v7176_v60, %v4625_v51  ;;  %v4772_v60 = vld [vmem:[%s7745_s0 + $0x40] sm:$0xff] }
 0xb90   :  { %v4627_v55 = vpop.f32.mrf.mxu0 }
 0xb91   :  { %v3487_v33 = vsub.f32 %v4771_v29, %v3471_v57  ;;  %v4628_v63 = vadd.f32 %v4627_v55, %v4626_v53 }
 0xb92   :  { %v4629_v11 = vpop.f32.mrf.mxu0 }
 0xb93   :  { %3503 = vst.msk [vmem:[%s7748_s3 + $0x38] sm:$0xff] %vm69_vm0, %v3487_v33  ;;  %v3472_v48 = vsub.f32 %v7183_v52, %v4628_v63  ;;  %v4773_v52 = vld [vmem:[%s7745_s0 + $0x48] sm:$0xff] }
 0xb94   :  { %v4630_v56 = vpop.f32.mrf.mxu0 }
 0xb95   :  { %v3488_v9 = vsub.f32 %v4772_v60, %v3472_v48  ;;  %v4631_v42 = vadd.f32 %v4630_v56, %v4629_v11 }
 0xb96   :  { %v4632_v10 = vpop.f32.mrf.mxu0 }
 0xb97   :  { %3504 = vst.msk [vmem:[%s7748_s3 + $0x40] sm:$0xff] %vm69_vm0, %v3488_v9  ;;  %v3473_v4 = vsub.f32 %v7190_v38, %v4631_v42  ;;  %v4774_v38 = vld [vmem:[%s7745_s0 + $0x50] sm:$0xff] }
 0xb98   :  { %v4633_v14 = vpop.f32.mrf.mxu0 }
 0xb99   :  { %v3489_v3 = vsub.f32 %v4773_v52, %v3473_v4  ;;  %v4634_v5 = vadd.f32 %v4633_v14, %v4632_v10 }
 0xb9a   :  { %v4635_v61 = vpop.f32.mrf.mxu0 }
 0xb9b   :  { %3505 = vst.msk [vmem:[%s7748_s3 + $0x48] sm:$0xff] %vm69_vm0, %v3489_v3  ;;  %v3474_v41 = vsub.f32 %v7197_v19, %v4634_v5  ;;  %v3210_v19 = vrot.slane %v7585_v49, %v5639_v2 }
 0xb9c   :  { %v4636_v54 = vpop.f32.mrf.mxu0 }
 0xb9d   :  { %v3490_v16 = vsub.f32 %v4774_v38, %v3474_v41  ;;  %v4637_v1 = vadd.f32 %v4636_v54, %v4635_v61 }
 0xb9f   :  { %3506 = vst.msk [vmem:[%s7748_s3 + $0x50] sm:$0xff] %vm69_vm0, %v3490_v16  ;;  %v3475_v20 = vsub.f32 %v7204_v7, %v4637_v1  ;;  %v3211_v7 = vsel %vm7882_vm12, %v3210_v19, %v7582_v0 }
 0xba1   :  { %v3491_v26 = vsub.f32 %v4775_v25, %v3475_v20 }
 0xba3   :  { %3507 = vst.msk [vmem:[%s7748_s3 + $0x58] sm:$0xff] %vm69_vm0, %v3491_v26 }
 0xbd0   :  { %v3134_v44 = vpop.permute.xlu1 %3133 }
 0xbd1   :  { %v3215_v36 = vrot.slane %v3134_v44, %v5647_v39  ;;  %vm3251_vm11 = vcmp.eq.s32.totalorder %v5244_v13, %v3134_v44  ;;  %vm3252_vm7 = vcmp.eq.s32.totalorder %v5247_v17, %v3134_v44  ;;  %v4776_v17 = vld [vmem:[%s7745_s0 + $0x60] sm:$0xff] }
 0xbd2   :  { %4070 = vmatprep.mubr.msk.f32.mxu1 %vm3252_vm7, %v7808_v30 }
 0xbd3   :  { %v3216_v8 = vsel %vm7883_vm9, %v3215_v36, %v3211_v7  ;;  %4071 = vmatmul.mubr.msk.f32.gmra.mxu1 %vm3251_vm11, %v7808_v30 }
 0xbd4   :  { %v3221_v2 = vsel %vm7884_vm4, %v3220_v40, %v3216_v8  ;;  %4072 = vmatprep.mubr.msk.f32.mxu1 %vm3254_vm5, %v7808_v30 }
 0xbd5   :  { %3222 = vst [vmem:[#allocation2 + $0x3] sm:$0x1] %v3221_v2 }
 0xbd7   :  { %4073 = vmatmul.mubr.msk.f32.gmra.mxu1 %vm3253_vm14, %v7808_v30  ;;  %v4777_v30 = vld [vmem:[%s7745_s0 + $0x68] sm:$0xff] }
 0xbe1   :  { %v4638_v39 = vpop.f32.mrf.mxu1 }
 0xbe3   :  { %v4639_v0 = vpop.f32.mrf.mxu1 }
 0xbe4   :  { %v4640_v18 = vadd.f32 %v4639_v0, %v4638_v39 }
 0xbe6   :  { %v3476_v49 = vsub.f32 %v7220_v22, %v4640_v18  ;;  %v4641_v12 = vpop.f32.mrf.mxu1 }
 0xbe8   :  { %v3492_v58 = vsub.f32 %v4776_v17, %v3476_v49  ;;  %v4642_v37 = vpop.f32.mrf.mxu1 }
 0xbe9   :  { %v4643_v24 = vadd.f32 %v4642_v37, %v4641_v12 }
 0xbea   :  { %3508 = vst.msk [vmem:[%s7748_s3 + $0x60] sm:$0xff] %vm69_vm0, %v3492_v58 }
 0xbeb   :  { %v3477_v13 = vsub.f32 %v7240_v45, %v4643_v24 }
 0xbed   :  { %v3493_v22 = vsub.f32 %v4777_v30, %v3477_v13 }
 0xbef   :  { %3509 = vst.msk [vmem:[%s7748_s3 + $0x68] sm:$0xff] %vm69_vm0, %v3493_v22 }
 0xbf0   :  { %4791 = shalt.err (!%p4788_p4)
}
 0xbf1   :  { %3523 = dma.vmem_to_hbm [thread:$0]  %s3521_s24, 64, %s7749_s4, [#allocation3]   ;;  %v4778_v21 = vld [vmem:[%s7745_s0 + $0x70] sm:$0xff]  ;;  %v4779_v46 = vld [vmem:[%s7745_s0 + $0x78] sm:$0xff] }
 0xc93   :  { %v4644_v45 = vpop.f32.mrf.mxu1 }
 0xc95   :  { %v4645_v15 = vpop.f32.mrf.mxu1 }
 0xc96   :  { %v4646_v32 = vadd.f32 %v4645_v15, %v4644_v45 }
 0xc97   :  { %v4647_v35 = vpop.f32.mrf.mxu1 }
 0xc98   :  { %v3478_v43 = vsub.f32 %v7260_v50, %v4646_v32 }
 0xc99   :  { %v4648_v47 = vpop.f32.mrf.mxu1 }
 0xc9a   :  { %v3494_v28 = vsub.f32 %v4778_v21, %v3478_v43  ;;  %v4649_v6 = vadd.f32 %v4648_v47, %v4647_v35 }
 0xc9c   :  { %3510 = vst.msk [vmem:[%s7748_s3 + $0x70] sm:$0xff] %vm69_vm0, %v3494_v28  ;;  %v3479_v62 = vsub.f32 %v7332_v59, %v4649_v6 }
 0xc9e   :  { %v3495_v23 = vsub.f32 %v4779_v46, %v3479_v62 }
 0xca0   :  { %3511 = vst.msk [vmem:[%s7748_s3 + $0x78] sm:$0xff] %vm69_vm0, %v3495_v23 }
 0xca1   :  { %4800 = dma.done.wait [#allocation3], 64  }
 0xca2   :  { %4801 = vsyncadd [#allocation3], 4294967232 }
 0xca3   :  { %3529 = vsyncpa [#allocation3], 1 }

</bundles_post_ra>
